<compile_context>
chip_gen: v6e
topology: v6e:2x2x1
jax: 0.10.0
libtpu: 0.0.40
codegen_flags: <defaults>
</compile_context>

<pallas_src>
import functools

import numpy as np

import jax
import jax.numpy as jnp
from jax.experimental import pallas as pl
from jax.experimental.pallas import tpu as pltpu


def _round_up(x, m):
    return -(-x // m) * m


# ----------------------------------------------------------------------------
# Pallas kernels
# ----------------------------------------------------------------------------
def conv_bn_relu_pool_kernel(xs_ref, w_ref, scale_ref, bias_ref, o_ref, *, ho_c, ka):
    """Fused Conv(7x7, s1, 'same') + folded BN + ReLU + MaxPool(2,2), one batch block.

    xs_ref   : (G, Hs, Ws*4*Cin)   space-to-depth, width-flattened padded input (bf16)
    w_ref    : (ka, Ws*4*Cin, 4*Wo_c*Cout)  banded s2d conv weight (bf16), resident
    scale_ref: (1, 4*Wo_c*Cout)    folded BN scale, tiled over (phase, col) (f32)
    bias_ref : (1, 4*Wo_c*Cout)    folded BN bias (f32)
    o_ref    : (G, Ho_c, Wo_c*Cout==128)  pooled output, 128-lane dense (bf16)
    """
    g = xs_ref.shape[0]
    kdim = xs_ref.shape[2]
    n4 = w_ref.shape[2]
    npool = n4 // 4                      # Wo_c * Cout == 128  (lane-dense)
    m = g * ho_c

    # ka shifted row-band loads -> one uninterrupted chain of MXU dots into a
    # single f32 accumulator.  ho_c is a multiple of 8, so the
    # (G, Ho_c, K) -> (M, K) collapse is a layout no-op; the sublane-offset ref
    # slices are plain offset loads (no vreg relayout).
    acc = jnp.dot(xs_ref[:, 0:ho_c, :].reshape(m, kdim), w_ref[0],
                  preferred_element_type=jnp.float32)
    for a in range(1, ka):
        acc = acc + jnp.dot(xs_ref[:, a:a + ho_c, :].reshape(m, kdim), w_ref[a],
                            preferred_element_type=jnp.float32)

    z = jnp.maximum(acc * scale_ref[...] + bias_ref[...], 0.0)       # BN + ReLU (f32)
    # 2x2 max-pool == max over the 4 phase column groups (static 128-lane slices).
    pooled = jnp.maximum(jnp.maximum(z[:, :npool], z[:, npool:2 * npool]),
                         jnp.maximum(z[:, 2 * npool:3 * npool], z[:, 3 * npool:]))
    o_ref[...] = pooled.reshape(g, ho_c, npool).astype(o_ref.dtype)


def fc_kernel(x_ref, w_ref, b_ref, o_ref):
    """Linear tile: out = x @ W + b (bf16 MXU inputs, f32 accumulation, N=128 dense)."""
    o_ref[...] = (jnp.dot(x_ref[...], w_ref[...], preferred_element_type=jnp.float32)
                  + b_ref[...])


# ----------------------------------------------------------------------------
# One-time host-side (numpy) parameter preparation
# ----------------------------------------------------------------------------
def _fold_bn(conv_b, gamma, beta, mean, var, eps=1e-5):
    scale = gamma / np.sqrt(var + eps)
    bias = (conv_b - mean) * scale + beta
    return scale, bias


def build_conv_layer_prep(w_pt, conv_b, gamma, beta, mean, var, *, h_in, w_in,
                          k=7, pad=3):
    """Build the banded space-to-depth conv weight with pool phases + output
    columns folded into the matmul N dimension, plus folded BN vectors."""
    w_np = np.asarray(w_pt, np.float32)
    cout, cin = w_np.shape[0], w_np.shape[1]
    ka = (k + 1) // 2                              # 4
    c4 = 4 * cin
    ho, wo = h_in // 2, w_in // 2
    ho_c, wo_c = _round_up(ho, 8), _round_up(wo, 8)
    assert wo_c * cout == 128, "pooled (width, channel) tile must be 128 lanes"
    hs = ho_c + ka - 1
    ws = wo_c + pad
    if 128 % c4 == 0:                              # make K = Ws*4*Cin a multiple of 128
        ws = _round_up(ws, 128 // c4)

    # Wr[a, b, q*cin+ci, p, co] = w[co, ci, 2a+qh-dh, 2b+qw-dw]   (0 outside [0,k))
    wr = np.zeros((ka, ka, c4, 4, cout), np.float32)
    for a in range(ka):
        for b in range(ka):
            for dh in range(2):
                for dw in range(2):
                    p = dh * 2 + dw
                    for qh in range(2):
                        for qw in range(2):
                            u, v = 2 * a + qh - dh, 2 * b + qw - dw
                            if 0 <= u < k and 0 <= v < k:
                                q = qh * 2 + qw
                                wr[a, b, q * cin:(q + 1) * cin, p, :] = w_np[:, :, u, v].T

    # Fold all Wo_c output columns + 4 pool phases into N (banded weight):
    # W2[a, b'*c4+qc, p*Wo_c*Cout + w*Cout + co] = Wr[a, b'-w, qc, p, co]
    w2 = np.zeros((ka, ws, c4, 4, wo_c, cout), np.float32)
    for w in range(wo_c):
        for b in range(ka):
            w2[:, w + b, :, :, w, :] = wr[:, b]
    w2 = w2.reshape(ka, ws * c4, 4 * wo_c * cout)

    scale, bias = _fold_bn(np.asarray(conv_b, np.float32), np.asarray(gamma, np.float32),
                           np.asarray(beta, np.float32), np.asarray(mean, np.float32),
                           np.asarray(var, np.float32))
    scale4 = np.tile(scale, 4 * wo_c)[None, :]     # order (phase, col, channel)
    bias4 = np.tile(bias, 4 * wo_c)[None, :]

    return dict(
        w2=jnp.asarray(w2, jnp.bfloat16),
        scale4=jnp.asarray(scale4, jnp.float32),
        bias4=jnp.asarray(bias4, jnp.float32),
        ho=ho, wo=wo, ho_c=ho_c, wo_c=wo_c, hs=hs, ws=ws, ka=ka, cout=cout, pad=pad,
    )


def build_fc_prep(fc_w, fc_b, *, ho, wo, ho_c, wo_c, cout, num_classes, ncls_pad=128):
    """FC weight permuted for the PyTorch NCHW flatten, padded to K=Ho_c*Wo_c*Cout
    (zeros on pool-padding junk rows/cols) and N=128 (zeros on classes >= num_classes)."""
    fc_np = np.asarray(fc_w, np.float32).reshape(num_classes, cout, ho, wo)
    wfc = np.zeros((ho_c, wo_c * cout, ncls_pad), np.float32)
    perm = fc_np.transpose(2, 3, 1, 0)             # (h, w, c, n)
    wfc[:ho, :wo * cout, :num_classes] = perm.reshape(ho, wo * cout, num_classes)
    wfc = wfc.reshape(ho_c * wo_c * cout, ncls_pad)
    bfc = np.zeros((1, ncls_pad), np.float32)
    bfc[0, :num_classes] = np.asarray(fc_b, np.float32)
    return dict(wfc=jnp.asarray(wfc, jnp.bfloat16), bfc=jnp.asarray(bfc, jnp.float32))


# ----------------------------------------------------------------------------
# Layer wrappers
# ----------------------------------------------------------------------------
def _space_to_depth_input(x_nhwc, *, pad, hs, ws):
    """Zero-pad for the 'same' conv, fold 2x2 spatial phases into channels, flatten
    (width, channels) into one lane dimension, and cast to bf16 for the MXU."""
    b, h, w, c = x_nhwc.shape
    bottom = 2 * hs - h - pad
    right = 2 * ws - w - pad
    xp = jnp.pad(x_nhwc, ((0, 0), (pad, bottom), (pad, right), (0, 0)))
    xs = xp.reshape(b, hs, 2, ws, 2, c).transpose(0, 1, 3, 2, 4, 5)
    return xs.reshape(b, hs, ws * 4 * c).astype(jnp.bfloat16)


def _batch_block(batch):
    """Images per grid step: whole batch when small (single step); otherwise >= 2
    multiple-of-8 blocks (megacore on v7x), capped so per-step VMEM stays small."""
    if batch <= 8:
        return batch
    return min(64, _round_up(-(-batch // 2), 8))


def conv_bn_relu_pool(x_nhwc, prep):
    """Conv(7x7,s1,p3) + folded BN + ReLU + MaxPool(2,2) in one Pallas kernel.
    Returns (B, Ho_c, Wo_c*Cout) bf16 (junk rows/cols from 8/128 padding included)."""
    B = x_nhwc.shape[0]
    ho_c, hs, ws, ka, pad = prep["ho_c"], prep["hs"], prep["ws"], prep["ka"], prep["pad"]
    npool = prep["wo_c"] * prep["cout"]

    xs = _space_to_depth_input(x_nhwc, pad=pad, hs=hs, ws=ws)      # (B, Hs, K) bf16
    kdim = xs.shape[2]
    n4 = prep["w2"].shape[2]

    g = _batch_block(B)
    bp = _round_up(B, g)
    if bp != B:
        xs = jnp.pad(xs, ((0, bp - B), (0, 0), (0, 0)))

    out = pl.pallas_call(
        functools.partial(conv_bn_relu_pool_kernel, ho_c=ho_c, ka=ka),
        out_shape=jax.ShapeDtypeStruct((bp, ho_c, npool), jnp.bfloat16),
        grid=(bp // g,),
        in_specs=[
            pl.BlockSpec((g, hs, kdim), lambda i: (i, 0, 0)),
            pl.BlockSpec((ka, kdim, n4), lambda i: (0, 0, 0)),     # resident weight
            pl.BlockSpec((1, n4), lambda i: (0, 0)),               # resident BN scale
            pl.BlockSpec((1, n4), lambda i: (0, 0)),               # resident BN bias
        ],
        out_specs=pl.BlockSpec((g, ho_c, npool), lambda i: (i, 0, 0)),
        compiler_params=pltpu.CompilerParams(dimension_semantics=("parallel",)),
    )(xs, prep["w2"], prep["scale4"], prep["bias4"])
    return out[:B]


def pooled_to_nhwc(out, prep):
    """Drop the junk pooled rows/columns and unpack the lane-dense layout to NHWC."""
    B = out.shape[0]
    out = out[:, :prep["ho"], :].reshape(B, prep["ho"], prep["wo_c"], prep["cout"])
    return out[:, :, :prep["wo"], :]


def linear(x2d_bf16, wfc, bfc):
    """out = x @ W + b, gridded over batch blocks; K and N are multiples of 128."""
    B, K = x2d_bf16.shape
    N = wfc.shape[1]
    g = _batch_block(B)
    bp = _round_up(B, g)
    if bp != B:
        x2d_bf16 = jnp.pad(x2d_bf16, ((0, bp - B), (0, 0)))
    out = pl.pallas_call(
        fc_kernel,
        out_shape=jax.ShapeDtypeStruct((bp, N), jnp.float32),
        grid=(bp // g,),
        in_specs=[
            pl.BlockSpec((g, K), lambda i: (i, 0)),
            pl.BlockSpec((K, N), lambda i: (0, 0)),
            pl.BlockSpec((1, N), lambda i: (0, 0)),
        ],
        out_specs=pl.BlockSpec((g, N), lambda i: (i, 0)),
        compiler_params=pltpu.CompilerParams(dimension_semantics=("parallel",)),
    )(x2d_bf16, wfc, bfc)
    return out[:B]


def convnet_forward(x_nchw, prep1, prep2, fc_prep, num_classes):
    x = jnp.transpose(x_nchw.astype(jnp.float32), (0, 2, 3, 1))    # NCHW -> NHWC

    # layer1: Conv(1->8,k7,p3) + BN + ReLU + MaxPool(2,2) + Dropout(eval: identity)
    # TODO(synk): nn.Dropout(0.5) is identity in eval mode; training-mode stochastic
    # dropout is not implemented.
    h1 = pooled_to_nhwc(conv_bn_relu_pool(x, prep1), prep1)        # (B,14,14,8) bf16

    # layer2: Conv(8->16,k7,p3) + BN + ReLU + MaxPool(2,2) + Dropout(eval: identity)
    # TODO(synk): the layer1->layer2 pad/space-to-depth glue is still a few tiny XLA
    # ops; a fully fused conv1+conv2 kernel would remove this HBM round trip.
    h2 = conv_bn_relu_pool(h1, prep2)                              # (B, 8, 128) bf16

    # FC: NCHW-flatten permutation + junk-row/col zeroing baked into the padded weight,
    # so the raw padded layer2 output feeds it with a single contiguous reshape.
    B = h2.shape[0]
    flat = h2.reshape(B, prep2["ho_c"] * prep2["wo_c"] * prep2["cout"])   # (B, 1024)
    logits = linear(flat, fc_prep["wfc"], fc_prep["bfc"])                  # (B, 128) f32
    return logits[:, :num_classes]


# ----------------------------------------------------------------------------
# Deterministic parameter init (shapes from ConvNet.__init__) + pure-XLA reference
# ----------------------------------------------------------------------------
def init_params(key, num_classes=10):
    ks = jax.random.split(key, 12)
    f32 = jnp.float32
    return {
        "conv1_w": 0.1 * jax.random.normal(ks[0], (8, 1, 7, 7), f32),
        "conv1_b": 0.1 * jax.random.normal(ks[1], (8,), f32),
        "bn1_gamma": 1.0 + 0.05 * jax.random.normal(ks[2], (8,), f32),
        "bn1_beta": 0.05 * jax.random.normal(ks[3], (8,), f32),
        "bn1_mean": 0.05 * jax.random.normal(ks[4], (8,), f32),
        "bn1_var": 1.0 + jnp.abs(0.05 * jax.random.normal(ks[5], (8,), f32)),
        "conv2_w": 0.05 * jax.random.normal(ks[6], (16, 8, 7, 7), f32),
        "conv2_b": 0.05 * jax.random.normal(ks[7], (16,), f32),
        "bn2_gamma": 1.0 + 0.05 * jax.random.normal(ks[8], (16,), f32),
        "bn2_beta": 0.05 * jax.random.normal(ks[9], (16,), f32),
        "bn2_mean": 0.05 * jax.random.normal(ks[10], (16,), f32),
        "bn2_var": 1.0 + jnp.abs(0.05 * jax.random.normal(ks[11], (16,), f32)),
        "fc_w": 0.05 * jax.random.normal(ks[0], (num_classes, 7 * 7 * 16), f32),
        "fc_b": 0.05 * jax.random.normal(ks[1], (num_classes,), f32),
    }


def reference_forward(x_nchw, p):
    """Pure-XLA float32 reference of the PyTorch forward (eval mode)."""
    def layer(x, w, b, gamma, beta, mean, var):
        y = jax.lax.conv_general_dilated(
            x, w, window_strides=(1, 1), padding=((3, 3), (3, 3)),
            dimension_numbers=("NCHW", "OIHW", "NCHW"))
        y = y + b[None, :, None, None]
        y = (y - mean[None, :, None, None]) * jax.lax.rsqrt(var[None, :, None, None] + 1e-5)
        y = y * gamma[None, :, None, None] + beta[None, :, None, None]
        y = jnp.maximum(y, 0.0)
        return jax.lax.reduce_window(y, -jnp.inf, jax.lax.max,
                                     (1, 1, 2, 2), (1, 1, 2, 2), "VALID")

    h = layer(x_nchw.astype(jnp.float32), p["conv1_w"], p["conv1_b"],
              p["bn1_gamma"], p["bn1_beta"], p["bn1_mean"], p["bn1_var"])
    h = layer(h, p["conv2_w"], p["conv2_b"],
              p["bn2_gamma"], p["bn2_beta"], p["bn2_mean"], p["bn2_var"])
    flat = h.reshape(h.shape[0], -1)
    return flat @ p["fc_w"].T + p["fc_b"]


if __name__ == "__main__":
    num_classes = 10
    key = jax.random.PRNGKey(0)
    pkey, xkey = jax.random.split(key)
    params = init_params(pkey, num_classes)

    # One-time, host-side weight preparation (stays out of the per-call jit path).
    prep1 = build_conv_layer_prep(params["conv1_w"], params["conv1_b"],
                                  params["bn1_gamma"], params["bn1_beta"],
                                  params["bn1_mean"], params["bn1_var"],
                                  h_in=28, w_in=28)
    prep2 = build_conv_layer_prep(params["conv2_w"], params["conv2_b"],
                                  params["bn2_gamma"], params["bn2_beta"],
                                  params["bn2_mean"], params["bn2_var"],
                                  h_in=14, w_in=14)
    fc_prep = build_fc_prep(params["fc_w"], params["fc_b"],
                            ho=prep2["ho"], wo=prep2["wo"], ho_c=prep2["ho_c"],
                            wo_c=prep2["wo_c"], cout=prep2["cout"],
                            num_classes=num_classes)

    # MNIST geometry: (B, 1, 28, 28) so the flatten hits 7*7*16 = 784.
    x = jax.random.normal(xkey, (2, 1, 28, 28), jnp.float32)

    fwd = jax.jit(lambda xx: convnet_forward(xx, prep1, prep2, fc_prep, num_classes))
    out = jax.block_until_ready(fwd(x))

    assert out.shape == (2, num_classes), out.shape
    assert out.dtype == jnp.float32
    assert bool(jnp.all(jnp.isfinite(out)))

    # Numerics check vs a pure-XLA f32 reference (bf16 MXU inputs -> ~1e-2 diffs expected).
    ref = jax.block_until_ready(reference_forward(x, params))
    np.testing.assert_allclose(np.asarray(out), np.asarray(ref), rtol=0.1, atol=0.1)

    print("KERNEL_OK")
</pallas_src>

<mosaic_0001>
module attributes {stable_mosaic.version = 11 : i64} {
  func.func @conv_bn_relu_pool_kernel(%arg0: i32, %arg1: memref<2x19x128xbf16, #tpu.memory_space<vmem>>, %arg2: memref<4x128x512xbf16, #tpu.memory_space<vmem>>, %arg3: memref<1x512xf32, #tpu.memory_space<vmem>>, %arg4: memref<1x512xf32, #tpu.memory_space<vmem>>, %arg5: memref<2x16x128xbf16, #tpu.memory_space<vmem>>) attributes {dimension_semantics = [#tpu.dimension_semantics<parallel>], iteration_bounds = array<i64: 1>, scalar_prefetch = 0 : i64, scratch_operands = 0 : i64, tpu.core_type = #tpu.core_type<tc>, window_params = [{transform_indices = @transform_0, window_bounds = array<i64: 2, 19, 128>}, {pipeline_mode = #tpu.pipeline_mode<synchronous>, transform_indices = @transform_1, window_bounds = array<i64: 4, 128, 512>}, {pipeline_mode = #tpu.pipeline_mode<synchronous>, transform_indices = @transform_2, window_bounds = array<i64: 1, 512>}, {pipeline_mode = #tpu.pipeline_mode<synchronous>, transform_indices = @transform_3, window_bounds = array<i64: 1, 512>}, {transform_indices = @transform_4, window_bounds = array<i64: 2, 16, 128>}]} {
    %c0 = arith.constant 0 : index
    %c0_0 = arith.constant 0 : index
    %c0_1 = arith.constant 0 : index
    %0 = vector.load %arg1[%c0, %c0_0, %c0_1] : memref<2x19x128xbf16, #tpu.memory_space<vmem>>, vector<2x16x128xbf16>
    %1 = vector.shape_cast %0 : vector<2x16x128xbf16> to vector<32x128xbf16>
    %c0_2 = arith.constant 0 : index
    %c0_3 = arith.constant 0 : index
    %c0_4 = arith.constant 0 : index
    %2 = vector.load %arg2[%c0_2, %c0_3, %c0_4] : memref<4x128x512xbf16, #tpu.memory_space<vmem>>, vector<1x128x512xbf16>
    %3 = vector.shape_cast %2 : vector<1x128x512xbf16> to vector<128x512xbf16>
    %cst = arith.constant dense<0.000000e+00> : vector<32x512xf32>
    %4 = tpu.matmul %1, %3, %cst {dimension_numbers = #tpu.dot_dimension_numbers<[1], [0], [0], [1], [0, 0, 1, 1], [], []>} : vector<32x128xbf16>, vector<128x512xbf16>, vector<32x512xf32> -> vector<32x512xf32>
    %c0_5 = arith.constant 0 : index
    %c1 = arith.constant 1 : index
    %c0_6 = arith.constant 0 : index
    %5 = vector.load %arg1[%c0_5, %c1, %c0_6] : memref<2x19x128xbf16, #tpu.memory_space<vmem>>, vector<2x16x128xbf16>
    %6 = vector.shape_cast %5 : vector<2x16x128xbf16> to vector<32x128xbf16>
    %c1_7 = arith.constant 1 : index
    %c0_8 = arith.constant 0 : index
    %c0_9 = arith.constant 0 : index
    %7 = vector.load %arg2[%c1_7, %c0_8, %c0_9] : memref<4x128x512xbf16, #tpu.memory_space<vmem>>, vector<1x128x512xbf16>
    %8 = vector.shape_cast %7 : vector<1x128x512xbf16> to vector<128x512xbf16>
    %cst_10 = arith.constant dense<0.000000e+00> : vector<32x512xf32>
    %9 = tpu.matmul %6, %8, %cst_10 {dimension_numbers = #tpu.dot_dimension_numbers<[1], [0], [0], [1], [0, 0, 1, 1], [], []>} : vector<32x128xbf16>, vector<128x512xbf16>, vector<32x512xf32> -> vector<32x512xf32>
    %10 = arith.addf %4, %9 : vector<32x512xf32>
    %c0_11 = arith.constant 0 : index
    %c2 = arith.constant 2 : index
    %c0_12 = arith.constant 0 : index
    %11 = vector.load %arg1[%c0_11, %c2, %c0_12] : memref<2x19x128xbf16, #tpu.memory_space<vmem>>, vector<2x16x128xbf16>
    %12 = vector.shape_cast %11 : vector<2x16x128xbf16> to vector<32x128xbf16>
    %c2_13 = arith.constant 2 : index
    %c0_14 = arith.constant 0 : index
    %c0_15 = arith.constant 0 : index
    %13 = vector.load %arg2[%c2_13, %c0_14, %c0_15] : memref<4x128x512xbf16, #tpu.memory_space<vmem>>, vector<1x128x512xbf16>
    %14 = vector.shape_cast %13 : vector<1x128x512xbf16> to vector<128x512xbf16>
    %cst_16 = arith.constant dense<0.000000e+00> : vector<32x512xf32>
    %15 = tpu.matmul %12, %14, %cst_16 {dimension_numbers = #tpu.dot_dimension_numbers<[1], [0], [0], [1], [0, 0, 1, 1], [], []>} : vector<32x128xbf16>, vector<128x512xbf16>, vector<32x512xf32> -> vector<32x512xf32>
    %16 = arith.addf %10, %15 : vector<32x512xf32>
    %c0_17 = arith.constant 0 : index
    %c3 = arith.constant 3 : index
    %c0_18 = arith.constant 0 : index
    %17 = vector.load %arg1[%c0_17, %c3, %c0_18] : memref<2x19x128xbf16, #tpu.memory_space<vmem>>, vector<2x16x128xbf16>
    %18 = vector.shape_cast %17 : vector<2x16x128xbf16> to vector<32x128xbf16>
    %c3_19 = arith.constant 3 : index
    %c0_20 = arith.constant 0 : index
    %c0_21 = arith.constant 0 : index
    %19 = vector.load %arg2[%c3_19, %c0_20, %c0_21] : memref<4x128x512xbf16, #tpu.memory_space<vmem>>, vector<1x128x512xbf16>
    %20 = vector.shape_cast %19 : vector<1x128x512xbf16> to vector<128x512xbf16>
    %cst_22 = arith.constant dense<0.000000e+00> : vector<32x512xf32>
    %21 = tpu.matmul %18, %20, %cst_22 {dimension_numbers = #tpu.dot_dimension_numbers<[1], [0], [0], [1], [0, 0, 1, 1], [], []>} : vector<32x128xbf16>, vector<128x512xbf16>, vector<32x512xf32> -> vector<32x512xf32>
    %22 = arith.addf %16, %21 : vector<32x512xf32>
    %c0_23 = arith.constant 0 : index
    %c0_24 = arith.constant 0 : index
    %23 = vector.load %arg3[%c0_23, %c0_24] : memref<1x512xf32, #tpu.memory_space<vmem>>, vector<1x512xf32>
    %24 = vector.broadcast %23 : vector<1x512xf32> to vector<32x512xf32>
    %25 = arith.mulf %22, %24 : vector<32x512xf32>
    %c0_25 = arith.constant 0 : index
    %c0_26 = arith.constant 0 : index
    %26 = vector.load %arg4[%c0_25, %c0_26] : memref<1x512xf32, #tpu.memory_space<vmem>>, vector<1x512xf32>
    %27 = vector.broadcast %26 : vector<1x512xf32> to vector<32x512xf32>
    %28 = arith.addf %25, %27 : vector<32x512xf32>
    %cst_27 = arith.constant 0.000000e+00 : f32
    %29 = vector.broadcast %cst_27 : f32 to vector<32x512xf32>
    %30 = arith.maximumf %28, %29 : vector<32x512xf32>
    %31 = vector.extract_strided_slice %30 {offsets = [0, 0], sizes = [32, 128], strides = [1, 1]} : vector<32x512xf32> to vector<32x128xf32>
    %32 = vector.extract_strided_slice %30 {offsets = [0, 128], sizes = [32, 128], strides = [1, 1]} : vector<32x512xf32> to vector<32x128xf32>
    %33 = arith.maximumf %31, %32 : vector<32x128xf32>
    %34 = vector.extract_strided_slice %30 {offsets = [0, 256], sizes = [32, 128], strides = [1, 1]} : vector<32x512xf32> to vector<32x128xf32>
    %35 = vector.extract_strided_slice %30 {offsets = [0, 384], sizes = [32, 128], strides = [1, 1]} : vector<32x512xf32> to vector<32x128xf32>
    %36 = arith.maximumf %34, %35 : vector<32x128xf32>
    %37 = arith.maximumf %33, %36 : vector<32x128xf32>
    %38 = vector.shape_cast %37 : vector<32x128xf32> to vector<2x16x128xf32>
    %39 = arith.truncf %38 : vector<2x16x128xf32> to vector<2x16x128xbf16>
    %c0_28 = arith.constant 0 : index
    %c0_29 = arith.constant 0 : index
    %c0_30 = arith.constant 0 : index
    %40 = vector.load %arg5[%c0_28, %c0_29, %c0_30] : memref<2x16x128xbf16, #tpu.memory_space<vmem>>, vector<2x16x128xbf16>
    tpu.vector_store %arg5[%c0_28, %c0_29, %c0_30], %39 {strides = array<i32>} : memref<2x16x128xbf16, #tpu.memory_space<vmem>>, vector<2x16x128xbf16>,
    return
  }
  func.func @transform_0(%arg0: i32) -> (i32, i32, i32) {
    %c0_i32 = arith.constant 0 : i32
    %c0_i32_0 = arith.constant 0 : i32
    %c0_i32_1 = arith.constant 0 : i32
    return %arg0, %c0_i32, %c0_i32_0 : i32, i32, i32
  }
  func.func @transform_1(%arg0: i32) -> (i32, i32, i32) {
    %c0_i32 = arith.constant 0 : i32
    %c0_i32_0 = arith.constant 0 : i32
    %c0_i32_1 = arith.constant 0 : i32
    %c0_i32_2 = arith.constant 0 : i32
    return %c0_i32, %c0_i32_0, %c0_i32_1 : i32, i32, i32
  }
  func.func @transform_2(%arg0: i32) -> (i32, i32) {
    %c0_i32 = arith.constant 0 : i32
    %c0_i32_0 = arith.constant 0 : i32
    %c0_i32_1 = arith.constant 0 : i32
    return %c0_i32, %c0_i32_0 : i32, i32
  }
  func.func @transform_3(%arg0: i32) -> (i32, i32) {
    %c0_i32 = arith.constant 0 : i32
    %c0_i32_0 = arith.constant 0 : i32
    %c0_i32_1 = arith.constant 0 : i32
    return %c0_i32, %c0_i32_0 : i32, i32
  }
  func.func @transform_4(%arg0: i32) -> (i32, i32, i32) {
    %c0_i32 = arith.constant 0 : i32
    %c0_i32_0 = arith.constant 0 : i32
    %c0_i32_1 = arith.constant 0 : i32
    return %arg0, %c0_i32, %c0_i32_0 : i32, i32, i32
  }
}

module attributes {stable_mosaic.version = 11 : i64} {
  func.func @conv_bn_relu_pool_kernel(%arg0: i32, %arg1: memref<2x11x384xbf16, #tpu.memory_space<vmem>>, %arg2: memref<4x384x512xbf16, #tpu.memory_space<vmem>>, %arg3: memref<1x512xf32, #tpu.memory_space<vmem>>, %arg4: memref<1x512xf32, #tpu.memory_space<vmem>>, %arg5: memref<2x8x128xbf16, #tpu.memory_space<vmem>>) attributes {dimension_semantics = [#tpu.dimension_semantics<parallel>], iteration_bounds = array<i64: 1>, scalar_prefetch = 0 : i64, scratch_operands = 0 : i64, tpu.core_type = #tpu.core_type<tc>, window_params = [{transform_indices = @transform_0, window_bounds = array<i64: 2, 11, 384>}, {pipeline_mode = #tpu.pipeline_mode<synchronous>, transform_indices = @transform_1, window_bounds = array<i64: 4, 384, 512>}, {pipeline_mode = #tpu.pipeline_mode<synchronous>, transform_indices = @transform_2, window_bounds = array<i64: 1, 512>}, {pipeline_mode = #tpu.pipeline_mode<synchronous>, transform_indices = @transform_3, window_bounds = array<i64: 1, 512>}, {transform_indices = @transform_4, window_bounds = array<i64: 2, 8, 128>}]} {
    %c0 = arith.constant 0 : index
    %c0_0 = arith.constant 0 : index
    %c0_1 = arith.constant 0 : index
    %0 = vector.load %arg1[%c0, %c0_0, %c0_1] : memref<2x11x384xbf16, #tpu.memory_space<vmem>>, vector<2x8x384xbf16>
    %1 = vector.shape_cast %0 : vector<2x8x384xbf16> to vector<16x384xbf16>
    %c0_2 = arith.constant 0 : index
    %c0_3 = arith.constant 0 : index
    %c0_4 = arith.constant 0 : index
    %2 = vector.load %arg2[%c0_2, %c0_3, %c0_4] : memref<4x384x512xbf16, #tpu.memory_space<vmem>>, vector<1x384x512xbf16>
    %3 = vector.shape_cast %2 : vector<1x384x512xbf16> to vector<384x512xbf16>
    %cst = arith.constant dense<0.000000e+00> : vector<16x512xf32>
    %4 = tpu.matmul %1, %3, %cst {dimension_numbers = #tpu.dot_dimension_numbers<[1], [0], [0], [1], [0, 0, 1, 1], [], []>} : vector<16x384xbf16>, vector<384x512xbf16>, vector<16x512xf32> -> vector<16x512xf32>
    %c0_5 = arith.constant 0 : index
    %c1 = arith.constant 1 : index
    %c0_6 = arith.constant 0 : index
    %5 = vector.load %arg1[%c0_5, %c1, %c0_6] : memref<2x11x384xbf16, #tpu.memory_space<vmem>>, vector<2x8x384xbf16>
    %6 = vector.shape_cast %5 : vector<2x8x384xbf16> to vector<16x384xbf16>
    %c1_7 = arith.constant 1 : index
    %c0_8 = arith.constant 0 : index
    %c0_9 = arith.constant 0 : index
    %7 = vector.load %arg2[%c1_7, %c0_8, %c0_9] : memref<4x384x512xbf16, #tpu.memory_space<vmem>>, vector<1x384x512xbf16>
    %8 = vector.shape_cast %7 : vector<1x384x512xbf16> to vector<384x512xbf16>
    %cst_10 = arith.constant dense<0.000000e+00> : vector<16x512xf32>
    %9 = tpu.matmul %6, %8, %cst_10 {dimension_numbers = #tpu.dot_dimension_numbers<[1], [0], [0], [1], [0, 0, 1, 1], [], []>} : vector<16x384xbf16>, vector<384x512xbf16>, vector<16x512xf32> -> vector<16x512xf32>
    %10 = arith.addf %4, %9 : vector<16x512xf32>
    %c0_11 = arith.constant 0 : index
    %c2 = arith.constant 2 : index
    %c0_12 = arith.constant 0 : index
    %11 = vector.load %arg1[%c0_11, %c2, %c0_12] : memref<2x11x384xbf16, #tpu.memory_space<vmem>>, vector<2x8x384xbf16>
    %12 = vector.shape_cast %11 : vector<2x8x384xbf16> to vector<16x384xbf16>
    %c2_13 = arith.constant 2 : index
    %c0_14 = arith.constant 0 : index
    %c0_15 = arith.constant 0 : index
    %13 = vector.load %arg2[%c2_13, %c0_14, %c0_15] : memref<4x384x512xbf16, #tpu.memory_space<vmem>>, vector<1x384x512xbf16>
    %14 = vector.shape_cast %13 : vector<1x384x512xbf16> to vector<384x512xbf16>
    %cst_16 = arith.constant dense<0.000000e+00> : vector<16x512xf32>
    %15 = tpu.matmul %12, %14, %cst_16 {dimension_numbers = #tpu.dot_dimension_numbers<[1], [0], [0], [1], [0, 0, 1, 1], [], []>} : vector<16x384xbf16>, vector<384x512xbf16>, vector<16x512xf32> -> vector<16x512xf32>
    %16 = arith.addf %10, %15 : vector<16x512xf32>
    %c0_17 = arith.constant 0 : index
    %c3 = arith.constant 3 : index
    %c0_18 = arith.constant 0 : index
    %17 = vector.load %arg1[%c0_17, %c3, %c0_18] : memref<2x11x384xbf16, #tpu.memory_space<vmem>>, vector<2x8x384xbf16>
    %18 = vector.shape_cast %17 : vector<2x8x384xbf16> to vector<16x384xbf16>
    %c3_19 = arith.constant 3 : index
    %c0_20 = arith.constant 0 : index
    %c0_21 = arith.constant 0 : index
    %19 = vector.load %arg2[%c3_19, %c0_20, %c0_21] : memref<4x384x512xbf16, #tpu.memory_space<vmem>>, vector<1x384x512xbf16>
    %20 = vector.shape_cast %19 : vector<1x384x512xbf16> to vector<384x512xbf16>
    %cst_22 = arith.constant dense<0.000000e+00> : vector<16x512xf32>
    %21 = tpu.matmul %18, %20, %cst_22 {dimension_numbers = #tpu.dot_dimension_numbers<[1], [0], [0], [1], [0, 0, 1, 1], [], []>} : vector<16x384xbf16>, vector<384x512xbf16>, vector<16x512xf32> -> vector<16x512xf32>
    %22 = arith.addf %16, %21 : vector<16x512xf32>
    %c0_23 = arith.constant 0 : index
    %c0_24 = arith.constant 0 : index
    %23 = vector.load %arg3[%c0_23, %c0_24] : memref<1x512xf32, #tpu.memory_space<vmem>>, vector<1x512xf32>
    %24 = vector.broadcast %23 : vector<1x512xf32> to vector<16x512xf32>
    %25 = arith.mulf %22, %24 : vector<16x512xf32>
    %c0_25 = arith.constant 0 : index
    %c0_26 = arith.constant 0 : index
    %26 = vector.load %arg4[%c0_25, %c0_26] : memref<1x512xf32, #tpu.memory_space<vmem>>, vector<1x512xf32>
    %27 = vector.broadcast %26 : vector<1x512xf32> to vector<16x512xf32>
    %28 = arith.addf %25, %27 : vector<16x512xf32>
    %cst_27 = arith.constant 0.000000e+00 : f32
    %29 = vector.broadcast %cst_27 : f32 to vector<16x512xf32>
    %30 = arith.maximumf %28, %29 : vector<16x512xf32>
    %31 = vector.extract_strided_slice %30 {offsets = [0, 0], sizes = [16, 128], strides = [1, 1]} : vector<16x512xf32> to vector<16x128xf32>
    %32 = vector.extract_strided_slice %30 {offsets = [0, 128], sizes = [16, 128], strides = [1, 1]} : vector<16x512xf32> to vector<16x128xf32>
    %33 = arith.maximumf %31, %32 : vector<16x128xf32>
    %34 = vector.extract_strided_slice %30 {offsets = [0, 256], sizes = [16, 128], strides = [1, 1]} : vector<16x512xf32> to vector<16x128xf32>
    %35 = vector.extract_strided_slice %30 {offsets = [0, 384], sizes = [16, 128], strides = [1, 1]} : vector<16x512xf32> to vector<16x128xf32>
    %36 = arith.maximumf %34, %35 : vector<16x128xf32>
    %37 = arith.maximumf %33, %36 : vector<16x128xf32>
    %38 = vector.shape_cast %37 : vector<16x128xf32> to vector<2x8x128xf32>
    %39 = arith.truncf %38 : vector<2x8x128xf32> to vector<2x8x128xbf16>
    %c0_28 = arith.constant 0 : index
    %c0_29 = arith.constant 0 : index
    %c0_30 = arith.constant 0 : index
    %40 = vector.load %arg5[%c0_28, %c0_29, %c0_30] : memref<2x8x128xbf16, #tpu.memory_space<vmem>>, vector<2x8x128xbf16>
    tpu.vector_store %arg5[%c0_28, %c0_29, %c0_30], %39 {strides = array<i32>} : memref<2x8x128xbf16, #tpu.memory_space<vmem>>, vector<2x8x128xbf16>,
    return
  }
  func.func @transform_0(%arg0: i32) -> (i32, i32, i32) {
    %c0_i32 = arith.constant 0 : i32
    %c0_i32_0 = arith.constant 0 : i32
    %c0_i32_1 = arith.constant 0 : i32
    return %arg0, %c0_i32, %c0_i32_0 : i32, i32, i32
  }
  func.func @transform_1(%arg0: i32) -> (i32, i32, i32) {
    %c0_i32 = arith.constant 0 : i32
    %c0_i32_0 = arith.constant 0 : i32
    %c0_i32_1 = arith.constant 0 : i32
    %c0_i32_2 = arith.constant 0 : i32
    return %c0_i32, %c0_i32_0, %c0_i32_1 : i32, i32, i32
  }
  func.func @transform_2(%arg0: i32) -> (i32, i32) {
    %c0_i32 = arith.constant 0 : i32
    %c0_i32_0 = arith.constant 0 : i32
    %c0_i32_1 = arith.constant 0 : i32
    return %c0_i32, %c0_i32_0 : i32, i32
  }
  func.func @transform_3(%arg0: i32) -> (i32, i32) {
    %c0_i32 = arith.constant 0 : i32
    %c0_i32_0 = arith.constant 0 : i32
    %c0_i32_1 = arith.constant 0 : i32
    return %c0_i32, %c0_i32_0 : i32, i32
  }
  func.func @transform_4(%arg0: i32) -> (i32, i32, i32) {
    %c0_i32 = arith.constant 0 : i32
    %c0_i32_0 = arith.constant 0 : i32
    %c0_i32_1 = arith.constant 0 : i32
    return %arg0, %c0_i32, %c0_i32_0 : i32, i32, i32
  }
}

module attributes {stable_mosaic.version = 11 : i64} {
  func.func @fc_kernel(%arg0: i32, %arg1: memref<2x1024xbf16, #tpu.memory_space<vmem>>, %arg2: memref<1024x128xbf16, #tpu.memory_space<vmem>>, %arg3: memref<1x128xf32, #tpu.memory_space<vmem>>, %arg4: memref<2x128xf32, #tpu.memory_space<vmem>>) attributes {dimension_semantics = [#tpu.dimension_semantics<parallel>], iteration_bounds = array<i64: 1>, scalar_prefetch = 0 : i64, scratch_operands = 0 : i64, tpu.core_type = #tpu.core_type<tc>, window_params = [{transform_indices = @transform_0, window_bounds = array<i64: 2, 1024>}, {pipeline_mode = #tpu.pipeline_mode<synchronous>, transform_indices = @transform_1, window_bounds = array<i64: 1024, 128>}, {pipeline_mode = #tpu.pipeline_mode<synchronous>, transform_indices = @transform_2, window_bounds = array<i64: 1, 128>}, {transform_indices = @transform_3, window_bounds = array<i64: 2, 128>}]} {
    %c0 = arith.constant 0 : index
    %c0_0 = arith.constant 0 : index
    %0 = vector.load %arg1[%c0, %c0_0] : memref<2x1024xbf16, #tpu.memory_space<vmem>>, vector<2x1024xbf16>
    %c0_1 = arith.constant 0 : index
    %c0_2 = arith.constant 0 : index
    %1 = vector.load %arg2[%c0_1, %c0_2] : memref<1024x128xbf16, #tpu.memory_space<vmem>>, vector<1024x128xbf16>
    %cst = arith.constant dense<0.000000e+00> : vector<2x128xf32>
    %2 = tpu.matmul %0, %1, %cst {dimension_numbers = #tpu.dot_dimension_numbers<[1], [0], [0], [1], [0, 0, 1, 1], [], []>} : vector<2x1024xbf16>, vector<1024x128xbf16>, vector<2x128xf32> -> vector<2x128xf32>
    %c0_3 = arith.constant 0 : index
    %c0_4 = arith.constant 0 : index
    %3 = vector.load %arg3[%c0_3, %c0_4] : memref<1x128xf32, #tpu.memory_space<vmem>>, vector<1x128xf32>
    %4 = vector.broadcast %3 : vector<1x128xf32> to vector<2x128xf32>
    %5 = arith.addf %2, %4 : vector<2x128xf32>
    %c0_5 = arith.constant 0 : index
    %c0_6 = arith.constant 0 : index
    %6 = vector.load %arg4[%c0_5, %c0_6] : memref<2x128xf32, #tpu.memory_space<vmem>>, vector<2x128xf32>
    tpu.vector_store %arg4[%c0_5, %c0_6], %5 {strides = array<i32>} : memref<2x128xf32, #tpu.memory_space<vmem>>, vector<2x128xf32>,
    return
  }
  func.func @transform_0(%arg0: i32) -> (i32, i32) {
    %c0_i32 = arith.constant 0 : i32
    %c0_i32_0 = arith.constant 0 : i32
    return %arg0, %c0_i32 : i32, i32
  }
  func.func @transform_1(%arg0: i32) -> (i32, i32) {
    %c0_i32 = arith.constant 0 : i32
    %c0_i32_0 = arith.constant 0 : i32
    %c0_i32_1 = arith.constant 0 : i32
    return %c0_i32, %c0_i32_0 : i32, i32
  }
  func.func @transform_2(%arg0: i32) -> (i32, i32) {
    %c0_i32 = arith.constant 0 : i32
    %c0_i32_0 = arith.constant 0 : i32
    %c0_i32_1 = arith.constant 0 : i32
    return %c0_i32, %c0_i32_0 : i32, i32
  }
  func.func @transform_3(%arg0: i32) -> (i32, i32) {
    %c0_i32 = arith.constant 0 : i32
    %c0_i32_0 = arith.constant 0 : i32
    return %arg0, %c0_i32 : i32, i32
  }
}

</mosaic_0001>

<bundles_post_ra>
// kernel: _lambda_.3
= control target key start
LH: loop header
LB: loop body
LE: loop exit
PB: predicated region body
PF: predicated region fallthrough
CT: control target
= control target key end

     0   :  { %v1988_v1 = vmov 0   ;;  %vm56_vm0 = vsmask.f32 3328  ;;  %vm57_vm1 = vsmask.f32 7440  ;;  %vm698_vm2 = vcmask 1042432   ;;  %s2644_s1 = inlined_call_operand.vmem [shape: bf16[4,128,512], index: 1, kind: input, shape index: {}]   ;;  %s2645_s0 = inlined_call_operand.vmem [shape: bf16[2,19,128], index: 0, kind: input, shape index: {}]   ;;  %s2646_s2 = inlined_call_operand.vmem [shape: f32[1,512], index: 2, kind: input, shape index: {}]   ;;  %s2647_s3 = inlined_call_operand.vmem [shape: f32[1,512], index: 3, kind: input, shape index: {}]   ;;  %s2648_s4 = inlined_call_operand.vmem [shape: bf16[2,16,128], index: 4, kind: output, shape index: {}]  }
   0x1   :  { %v1794_v0 = vld [vmem:[%s2644_s1 + $0x1e4] ss:$16 sps:$4 sm:$0xff]   ;;  %340 = vmatprep.mubr.bf16.mxu0 %v1988_v1  ;;  %393 = vmatprep.mubr.bf16.mxu1 %v1988_v1  ;;  %v1796_v2 = vld [vmem:[%s2644_s1 + $0x1ec] ss:$16 sps:$4 sm:$0xff]   ;;  %v1798_v3 = vld [vmem:[%s2644_s1 + $0x1e0] ss:$16 sps:$4 sm:$0xff]  }
   0x2   :  { %308 = vmatprep.subr.bf16.mxu0 %v1794_v0  ;;  %v1799_v4 = vld [vmem:[%s2644_s1 + $0x1e8] ss:$16 sps:$4 sm:$0xff]   ;;  %361 = vmatprep.subr.bf16.mxu1 %v1796_v2  ;;  %v1800_v5 = vld [vmem:[%s2644_s1 + $0x1c4] ss:$16 sps:$4 sm:$0xff]   ;;  %v1802_v6 = vld [vmem:[%s2644_s1 + $0x1cc] ss:$16 sps:$4 sm:$0xff]  }
   0x3   :  { %309 = vmatpush1.bf16.msra.mxu0 %v1798_v3  ;;  %362 = vmatpush1.bf16.msra.mxu1 %v1799_v4  ;;  %v1804_v7 = vld [vmem:[%s2644_s1 + $0x1c0] ss:$16 sps:$4 sm:$0xff]   ;;  %v1805_v8 = vld [vmem:[%s2644_s1 + $0x1c8] ss:$16 sps:$4 sm:$0xff]   ;;  %v1806_v9 = vld [vmem:[%s2644_s1 + $0x1a4] ss:$16 sps:$4 sm:$0xff]  }
   0x4   :  { %310 = vmatprep.subr.bf16.mxu0 %v1800_v5  ;;  %363 = vmatprep.subr.bf16.mxu1 %v1802_v6  ;;  %v1808_v10 = vld [vmem:[%s2644_s1 + $0x1ac] ss:$16 sps:$4 sm:$0xff]   ;;  %v1810_v11 = vld [vmem:[%s2644_s1 + $0x1a0] ss:$16 sps:$4 sm:$0xff]   ;;  %v1811_v12 = vld [vmem:[%s2644_s1 + $0x1a8] ss:$16 sps:$4 sm:$0xff]  }
   0x5   :  { %v1812_v13 = vld [vmem:[%s2644_s1 + $0x184] ss:$16 sps:$4 sm:$0xff]   ;;  %v1814_v14 = vld [vmem:[%s2644_s1 + $0x18c] ss:$16 sps:$4 sm:$0xff]   ;;  %v1816_v15 = vld [vmem:[%s2644_s1 + $0x180] ss:$16 sps:$4 sm:$0xff]  }
   0x6   :  { %v1817_v16 = vld [vmem:[%s2644_s1 + $0x188] ss:$16 sps:$4 sm:$0xff]   ;;  %v1818_v17 = vld [vmem:[%s2644_s1 + $0x164] ss:$16 sps:$4 sm:$0xff]   ;;  %v1820_v18 = vld [vmem:[%s2644_s1 + $0x16c] ss:$16 sps:$4 sm:$0xff]  }
   0x7   :  { %311 = vmatpush1.bf16.msra.mxu0 %v1804_v7  ;;  %364 = vmatpush1.bf16.msra.mxu1 %v1805_v8  ;;  %v1822_v19 = vld [vmem:[%s2644_s1 + $0x160] ss:$16 sps:$4 sm:$0xff]   ;;  %v1823_v20 = vld [vmem:[%s2644_s1 + $0x168] ss:$16 sps:$4 sm:$0xff]   ;;  %v1824_v21 = vld [vmem:[%s2644_s1 + $0x144] ss:$16 sps:$4 sm:$0xff]  }
   0x8   :  { %312 = vmatprep.subr.bf16.mxu0 %v1806_v9  ;;  %365 = vmatprep.subr.bf16.mxu1 %v1808_v10  ;;  %v1826_v22 = vld [vmem:[%s2644_s1 + $0x14c] ss:$16 sps:$4 sm:$0xff]   ;;  %v1828_v23 = vld [vmem:[%s2644_s1 + $0x140] ss:$16 sps:$4 sm:$0xff]   ;;  %v1829_v24 = vld [vmem:[%s2644_s1 + $0x148] ss:$16 sps:$4 sm:$0xff]  }
   0x9   :  { %v1830_v25 = vld [vmem:[%s2644_s1 + $0x124] ss:$16 sps:$4 sm:$0xff]   ;;  %v1832_v26 = vld [vmem:[%s2644_s1 + $0x12c] ss:$16 sps:$4 sm:$0xff]   ;;  %v2097_v27 = vld [vmem:[%s2645_s0] sm:$0xf] }
   0xa   :  { %v2102_v28 = vld [vmem:[%s2645_s0 + $0x4] sm:$0xf]  ;;  %v1834_v29 = vld [vmem:[%s2644_s1 + $0x120] ss:$16 sps:$4 sm:$0xff]   ;;  %v1835_v30 = vld [vmem:[%s2644_s1 + $0x128] ss:$16 sps:$4 sm:$0xff]  }
   0xb   :  { %313 = vmatpush1.bf16.msra.mxu0 %v1810_v11  ;;  %366 = vmatpush1.bf16.msra.mxu1 %v1811_v12  ;;  %v54_v31 = vld [vmem:[%s2645_s0 + $0x8] sm:$0x1]  ;;  %v60_v32 = vshrl.u32 %v2097_v27, 16  ;;  %v63_v33 = vshll.u32 %v2097_v27, 16  ;;  %v69_v34 = vshll.u32 %v2102_v28, 16  ;;  %v73_v35 = vshrl.u32 %v2102_v28, 16  ;;  %vm2132_vm4 = vmor %vm56_vm0, %vm57_vm1 }
   0xc   :  { %314 = vmatprep.subr.bf16.mxu0 %v1812_v13  ;;  %367 = vmatprep.subr.bf16.mxu1 %v1814_v14  ;;  %v1836_v36 = vld [vmem:[%s2644_s1 + $0x104] ss:$16 sps:$4 sm:$0xff]   ;;  %v79_v37 = vshll.u32 %v54_v31, 16  ;;  %v1838_v38 = vld [vmem:[%s2644_s1 + $0x10c] ss:$16 sps:$4 sm:$0xff]   ;;  %vm699_vm3 = vcmask 1046532  }
   0xd   :  { %v62_v39 = vrot.slane %v60_v32, 4  ;;  %v65_v40 = vrot.slane %v63_v33, 5  ;;  %v71_v41 = vrot.slane %v69_v34, 5  ;;  %v75_v42 = vrot.slane %v73_v35, 4  ;;  %v1840_v45 = vld [vmem:[%s2644_s1 + $0x100] ss:$16 sps:$4 sm:$0xff]   ;;  %vm2139_vm5 = vmor %vm698_vm2, %vm699_vm3 }
   0xe   :  { %v1052_v43 = vrot.slane %v73_v35, 5  ;;  %v1053_v44 = vrot.slane %v69_v34, 6  ;;  %v81_v48 = vrot.slane %v79_v37, 5  ;;  %v703_v49 = vrot.slane %v2102_v28, 5  ;;  %v1841_v50 = vld [vmem:[%s2644_s1 + $0x108] ss:$16 sps:$4 sm:$0xff]  }
   0xf   :  { %315 = vmatpush1.bf16.msra.mxu0 %v1816_v15  ;;  %368 = vmatpush1.bf16.msra.mxu1 %v1817_v16  ;;  %v66_v46 = vor.u32 %v65_v40, %v62_v39  ;;  %v76_v47 = vor.u32 %v75_v42, %v71_v41  ;;  %v706_v52 = vrot.slane %v54_v31, 5  ;;  %v1844_v57 = vld [vmem:[%s2644_s1 + $0xe4] ss:$16 sps:$4 sm:$0xff]   ;;  %v1847_v58 = vld [vmem:[%s2644_s1 + $0xec] ss:$16 sps:$4 sm:$0xff]  }
  0x10   :  { %316 = vmatprep.subr.bf16.mxu0 %v1818_v17  ;;  %369 = vmatprep.subr.bf16.mxu1 %v1820_v18  ;;  %v2136_v53 = vor.u32 %v1053_v44, %v1052_v43  ;;  %v705_v59 = vrot.slane %v703_v49, 4  ;;  %v1842_v63 = vld [vmem:[%s2644_s1 + $0xe0] ss:$16 sps:$4 sm:$0xff]   ;;  %v1845_v2 = vld [vmem:[%s2644_s1 + $0xe8] ss:$16 sps:$4 sm:$0xff]  }
  0x11   :  { %v67_v54 = vrot.slane %v66_v46, 4  ;;  %v77_v55 = vrot.slane %v76_v47, 4  ;;  %v1850_v3 = vld [vmem:[%s2644_s1 + $0xc4] ss:$16 sps:$4 sm:$0xff]   ;;  %v1853_v4 = vld [vmem:[%s2644_s1 + $0xcc] ss:$16 sps:$4 sm:$0xff]  }
  0x12   :  { %v2160_v0 = vsel %vm2139_vm5, %v705_v59, %v706_v52  ;;  %v1848_v5 = vld [vmem:[%s2644_s1 + $0xc0] ss:$16 sps:$4 sm:$0xff]   ;;  %v1851_v6 = vld [vmem:[%s2644_s1 + $0xc8] ss:$16 sps:$4 sm:$0xff]   ;;  %v1856_v7 = vld [vmem:[%s2644_s1 + $0xa4] ss:$16 sps:$4 sm:$0xff]  }
  0x13   :  { %317 = vmatpush1.bf16.msra.mxu0 %v1822_v19  ;;  %370 = vmatpush1.bf16.msra.mxu1 %v1823_v20  ;;  %v72_v60 = vsel %vm2132_vm4, %v67_v54, %v71_v41  ;;  %v82_v61 = vsel %vm2132_vm4, %v77_v55, %v81_v48  ;;  %v1859_v8 = vld [vmem:[%s2644_s1 + $0xac] ss:$16 sps:$4 sm:$0xff]   ;;  %v2191_v10 = vld [vmem:[%s2645_s0 + $0x10] sm:$0xf]  ;;  %v2196_v11 = vld [vmem:[%s2645_s0 + $0x14] sm:$0x1] }
  0x14   :  { %318 = vmatprep.subr.bf16.mxu0 %v1824_v21  ;;  %371 = vmatprep.subr.bf16.mxu1 %v1826_v22  ;;  %v1572_v62 = vcombine.low %v72_v60, %v82_v61  ;;  %v2186_v9 = vld [vmem:[%s2645_s0 + $0xc] sm:$0xf]  ;;  %v93_v14 = vshll.u32 %v2191_v10, 16  ;;  %v97_v15 = vshrl.u32 %v2191_v10, 16  ;;  %v1854_v16 = vld [vmem:[%s2644_s1 + $0xa0] ss:$16 sps:$4 sm:$0xff]   ;;  %v1606_v61 = vcombine.low %v2097_v27, %v2102_v28 }
  0x15   :  { %v84_v12 = vshrl.u32 %v2186_v9, 16  ;;  %v87_v13 = vshll.u32 %v2186_v9, 16  ;;  %v1857_v17 = vld [vmem:[%s2644_s1 + $0xa8] ss:$16 sps:$4 sm:$0xff]   ;;  %v103_v18 = vshll.u32 %v2196_v11, 16 }
  0x16   :  { %v95_v21 = vrot.slane %v93_v14, 5  ;;  %v99_v22 = vrot.slane %v97_v15, 4  ;;  %v1863_v31 = vld [vmem:[%s2644_s1 + $0x88] ss:$16 sps:$4 sm:$0xff]   ;;  %v1868_v32 = vld [vmem:[%s2644_s1 + $0x64] ss:$16 sps:$4 sm:$0xff]  }
  0x17   :  { %319 = vmatpush1.bf16.msra.mxu0 %v1828_v23  ;;  %372 = vmatpush1.bf16.msra.mxu1 %v1829_v24  ;;  %v86_v19 = vrot.slane %v84_v12, 4  ;;  %v89_v20 = vrot.slane %v87_v13, 5  ;;  %v1862_v23 = vld [vmem:[%s2644_s1 + $0x84] ss:$16 sps:$4 sm:$0xff]   ;;  %v1865_v24 = vld [vmem:[%s2644_s1 + $0x8c] ss:$16 sps:$4 sm:$0xff]   ;;  %v1607_v12 = vcombine.low %v2186_v9, %v2191_v10 }
  0x18   :  { %320 = vmatprep.subr.bf16.mxu0 %v1830_v25  ;;  %373 = vmatprep.subr.bf16.mxu1 %v1832_v26  ;;  %v100_v26 = vor.u32 %v99_v22, %v95_v21  ;;  %v1871_v35 = vld [vmem:[%s2644_s1 + $0x6c] ss:$16 sps:$4 sm:$0xff]   ;;  %v1076_v39 = vrot.slane %v93_v14, 6  ;;  %v1866_v40 = vld [vmem:[%s2644_s1 + $0x60] ss:$16 sps:$4 sm:$0xff]  }
  0x19   :  { %v90_v25 = vor.u32 %v89_v20, %v86_v19  ;;  %v1869_v41 = vld [vmem:[%s2644_s1 + $0x68] ss:$16 sps:$4 sm:$0xff]   ;;  %v1874_v43 = vld [vmem:[%s2644_s1 + $0x44] ss:$16 sps:$4 sm:$0xff]   ;;  %v1872_v46 = vld [vmem:[%s2644_s1 + $0x40] ss:$16 sps:$4 sm:$0xff]  }
  0x1a   :  { %v101_v34 = vrot.slane %v100_v26, 4  ;;  %v1875_v47 = vld [vmem:[%s2644_s1 + $0x48] ss:$16 sps:$4 sm:$0xff]   ;;  %v1880_v48 = vld [vmem:[%s2644_s1 + $0x24] ss:$16 sps:$4 sm:$0xff]  }
  0x1b   :  { %321 = vmatpush1.bf16.msra.mxu0 %v1834_v29  ;;  %374 = vmatpush1.bf16.msra.mxu1 %v1835_v30  ;;  %v105_v29 = vrot.slane %v103_v18, 5  ;;  %v1860_v30 = vld [vmem:[%s2644_s1 + $0x80] ss:$16 sps:$4 sm:$0xff]   ;;  %v91_v33 = vrot.slane %v90_v25, 4  ;;  %v1881_v52 = vld [vmem:[%s2644_s1 + $0x28] ss:$16 sps:$4 sm:$0xff]  }
  0x1c   :  { %322 = vmatprep.subr.bf16.mxu0 %v1836_v36  ;;  %375 = vmatprep.subr.bf16.mxu1 %v1838_v38  ;;  %v1075_v36 = vrot.slane %v97_v15, 5  ;;  %v1878_v51 = vld [vmem:[%s2644_s1 + $0x20] ss:$16 sps:$4 sm:$0xff]   ;;  %v1886_v54 = vld [vmem:[%s2644_s1 + $0x4] ss:$16 sps:$4 sm:$0xff]  }
  0x1d   :  { %v96_v37 = vsel %vm2132_vm4, %v91_v33, %v95_v21  ;;  %v106_v38 = vsel %vm2132_vm4, %v101_v34, %v105_v29  ;;  %v1889_v55 = vld [vmem:[%s2644_s1 + $0xc] ss:$16 sps:$4 sm:$0xff]   ;;  %v1893_v59 = vld [vmem:[%s2644_s1 + $0x2e4] ss:$16 sps:$4 sm:$0xff]   ;;  %v1904_v13 = vld [vmem:[%s2644_s1 + $0x2a0] ss:$16 sps:$4 sm:$0xff]  }
  0x1e   :  { %v1573_v42 = vcombine.low %v96_v37, %v106_v38  ;;  %v2242_v44 = vor.u32 %v1076_v39, %v1075_v36  ;;  %v1896_v60 = vld [vmem:[%s2644_s1 + $0x2ec] ss:$16 sps:$4 sm:$0xff]   ;;  %v1907_v15 = vld [vmem:[%s2644_s1 + $0x2a8] ss:$16 sps:$4 sm:$0xff]   ;;  %v1912_v9 = vld [vmem:[%s2644_s1 + $0x284] ss:$16 sps:$4 sm:$0xff]  }
  0x1f   :  { %323 = vmatpush1.bf16.msra.mxu0 %v1840_v45  ;;  %376 = vmatpush1.bf16.msra.mxu1 %v1841_v50  ;;  %v1877_v45 = vld [vmem:[%s2644_s1 + $0x4c] ss:$16 sps:$4 sm:$0xff]   ;;  %v1916_v19 = vld [vmem:[%s2644_s1 + $0x260] ss:$16 sps:$4 sm:$0xff]   ;;  %v1919_v20 = vld [vmem:[%s2644_s1 + $0x268] ss:$16 sps:$4 sm:$0xff]  }
  0x20   :  { %586 = vmatprep.subr.bf16.mxu0 %v1844_v57  ;;  %639 = vmatprep.subr.bf16.mxu1 %v1847_v58  ;;  %v1883_v50 = vld [vmem:[%s2644_s1 + $0x2c] ss:$16 sps:$4 sm:$0xff]   ;;  %v1884_v57 = vld [vmem:[%s2644_s1] ss:$16 sps:$4 sm:$0xff]   ;;  %v1887_v58 = vld [vmem:[%s2644_s1 + $0x8] ss:$16 sps:$4 sm:$0xff]  }
  0x21   :  { %v1902_v27 = vld [vmem:[%s2644_s1 + $0x2cc] ss:$16 sps:$4 sm:$0xff]   ;;  %v1924_v21 = vld [vmem:[%s2644_s1 + $0x244] ss:$16 sps:$4 sm:$0xff]   ;;  %v1928_v29 = vld [vmem:[%s2644_s1 + $0x220] ss:$16 sps:$4 sm:$0xff]  }
  0x22   :  { %341 = vmatmul.mubr.bf16.vlgmr.msra.gmra.mxu0 %v1572_v62  ;;  %394 = vmatmul.mubr.bf16.vlgmr.msra.gmra.mxu1 %v1572_v62  ;;  %v1891_v62 = vld [vmem:[%s2644_s1 + $0x2e0] ss:$16 sps:$4 sm:$0xff]   ;;  %v1915_v28 = vld [vmem:[%s2644_s1 + $0x28c] ss:$16 sps:$4 sm:$0xff]   ;;  %v1930_v25 = vld [vmem:[%s2644_s1 + $0x224] ss:$16 sps:$4 sm:$0xff]  }
  0x23   :  { %587 = vmatpush1.bf16.msra.mxu0 %v1842_v63  ;;  %640 = vmatpush1.bf16.msra.mxu1 %v1845_v2  ;;  %v1894_v63 = vld [vmem:[%s2644_s1 + $0x2e8] ss:$16 sps:$4 sm:$0xff]   ;;  %v1899_v2 = vld [vmem:[%s2644_s1 + $0x2c4] ss:$16 sps:$4 sm:$0xff]   ;;  %v1921_v18 = vld [vmem:[%s2644_s1 + $0x26c] ss:$16 sps:$4 sm:$0xff]  }
  0x24   :  { %588 = vmatprep.subr.bf16.mxu0 %v1850_v3  ;;  %641 = vmatprep.subr.bf16.mxu1 %v1853_v4  ;;  %v1897_v3 = vld [vmem:[%s2644_s1 + $0x2c0] ss:$16 sps:$4 sm:$0xff]   ;;  %v1900_v4 = vld [vmem:[%s2644_s1 + $0x2c8] ss:$16 sps:$4 sm:$0xff]   ;;  %v1927_v22 = vld [vmem:[%s2644_s1 + $0x24c] ss:$16 sps:$4 sm:$0xff]  }
  0x25   :  { %350 = vmatprep.mubr.bf16.mxu0 %v1988_v1  ;;  %403 = vmatprep.mubr.bf16.mxu1 %v1988_v1  ;;  %v1933_v26 = vld [vmem:[%s2644_s1 + $0x22c] ss:$16 sps:$4 sm:$0xff]   ;;  %v1934_v33 = vld [vmem:[%s2644_s1 + $0x200] ss:$16 sps:$4 sm:$0xff]   ;;  %v1937_v34 = vld [vmem:[%s2644_s1 + $0x208] ss:$16 sps:$4 sm:$0xff]  }
  0x26   :  { %v1942_v36 = vld [vmem:[%s2644_s1 + $0x3e4] ss:$16 sps:$4 sm:$0xff]   ;;  %v1945_v37 = vld [vmem:[%s2644_s1 + $0x3ec] ss:$16 sps:$4 sm:$0xff]   ;;  %v713_v39 = vrot.slane %v2196_v11, 5 }
  0x27   :  { %589 = vmatpush1.bf16.msra.mxu0 %v1848_v5  ;;  %642 = vmatpush1.bf16.msra.mxu1 %v1851_v6  ;;  %v2308_v5 = vld [vmem:[%s2645_s0] sm:$0xe]  ;;  %v1906_v6 = vld [vmem:[%s2644_s1 + $0x2a4] ss:$16 sps:$4 sm:$0xff]   ;;  %v2404_v38 = vld [vmem:[%s2645_s0 + $0xc] sm:$0xe] }
  0x28   :  { %590 = vmatprep.subr.bf16.mxu0 %v1856_v7  ;;  %643 = vmatprep.subr.bf16.mxu1 %v1859_v8  ;;  %v1909_v7 = vld [vmem:[%s2644_s1 + $0x2ac] ss:$16 sps:$4 sm:$0xff]   ;;  %v1640_v8 = vrot.slane %v2308_v5, 9  ;;  %v1952_v56 = vld [vmem:[%s2644_s1 + $0x3a0] ss:$16 sps:$4 sm:$0xff]  }
  0x29   :  { %v1951_v11 = vld [vmem:[%s2644_s1 + $0x3cc] ss:$16 sps:$4 sm:$0xff]   ;;  %vm1040_vm6 = vsmask.f32 2304  ;;  %vm1041_vm7 = vsmask.f32 6416 }
  0x2a   :  { %351 = vmatmul.mubr.bf16.gmra.mxu0 %v1573_v42  ;;  %404 = vmatmul.mubr.bf16.gmra.mxu1 %v1573_v42  ;;  %v704_v14 = vsel %vm2139_vm5, %v1640_v8, %v703_v49  ;;  %v1910_v49 = vld [vmem:[%s2644_s1 + $0x280] ss:$16 sps:$4 sm:$0xff]   ;;  %v1972_v8 = vld [vmem:[%s2644_s1 + $0x344] ss:$16 sps:$4 sm:$0xff]   ;;  %vm2507_vm8 = vmor %vm1040_vm6, %vm1041_vm7 }
  0x2b   :  { %591 = vmatpush1.bf16.msra.mxu0 %v1854_v16  ;;  %644 = vmatpush1.bf16.msra.mxu1 %v1857_v17  ;;  %v1674_v16 = vcombine.low %v704_v14, %v2160_v0  ;;  %v1913_v0 = vld [vmem:[%s2644_s1 + $0x288] ss:$16 sps:$4 sm:$0xff]   ;;  %v1918_v17 = vld [vmem:[%s2644_s1 + $0x264] ss:$16 sps:$4 sm:$0xff]   ;;  %v1067_v14 = vshrl.u32 %v2404_v38, 16 }
  0x2c   :  { %592 = vmatprep.subr.bf16.mxu0 %v1862_v23  ;;  %645 = vmatprep.subr.bf16.mxu1 %v1865_v24  ;;  %v1922_v23 = vld [vmem:[%s2644_s1 + $0x240] ss:$16 sps:$4 sm:$0xff]   ;;  %v1925_v24 = vld [vmem:[%s2644_s1 + $0x248] ss:$16 sps:$4 sm:$0xff]  }
  0x2d   :  { %618 = vmatprep.mubr.bf16.mxu0 %v1988_v1  ;;  %671 = vmatprep.mubr.bf16.mxu1 %v1988_v1 }
  0x2f   :  { %593 = vmatpush1.bf16.msra.mxu0 %v1860_v30  ;;  %646 = vmatpush1.bf16.msra.mxu1 %v1863_v31  ;;  %v1931_v30 = vld [vmem:[%s2644_s1 + $0x228] ss:$16 sps:$4 sm:$0xff]   ;;  %v1936_v31 = vld [vmem:[%s2644_s1 + $0x204] ss:$16 sps:$4 sm:$0xff]  }
  0x30   :  { %594 = vmatprep.subr.bf16.mxu0 %v1868_v32  ;;  %647 = vmatprep.subr.bf16.mxu1 %v1871_v35  ;;  %v1939_v32 = vld [vmem:[%s2644_s1 + $0x20c] ss:$16 sps:$4 sm:$0xff]   ;;  %v710_v35 = vrot.slane %v2191_v10, 5  ;;  %v1940_v10 = vld [vmem:[%s2644_s1 + $0x3e0] ss:$16 sps:$4 sm:$0xff]  }
  0x32   :  { %v712_v42 = vrot.slane %v710_v35, 4 }
  0x33   :  { %595 = vmatpush1.bf16.msra.mxu0 %v1866_v40  ;;  %648 = vmatpush1.bf16.msra.mxu1 %v1869_v41  ;;  %v1943_v40 = vld [vmem:[%s2644_s1 + $0x3e8] ss:$16 sps:$4 sm:$0xff]   ;;  %v1641_v41 = vrot.slane %v2404_v38, 9 }
  0x34   :  { %596 = vmatprep.subr.bf16.mxu0 %v1874_v43  ;;  %649 = vmatprep.subr.bf16.mxu1 %v1877_v45  ;;  %v1948_v43 = vld [vmem:[%s2644_s1 + $0x3c4] ss:$16 sps:$4 sm:$0xff]   ;;  %v1946_v45 = vld [vmem:[%s2644_s1 + $0x3c0] ss:$16 sps:$4 sm:$0xff]  }
  0x37   :  { %597 = vmatpush1.bf16.msra.mxu0 %v1872_v46  ;;  %650 = vmatpush1.bf16.msra.mxu1 %v1875_v47  ;;  %v1949_v46 = vld [vmem:[%s2644_s1 + $0x3c8] ss:$16 sps:$4 sm:$0xff]   ;;  %v711_v47 = vsel %vm2139_vm5, %v1641_v41, %v710_v35 }
  0x38   :  { %598 = vmatprep.subr.bf16.mxu0 %v1880_v48  ;;  %651 = vmatprep.subr.bf16.mxu1 %v1883_v50  ;;  %v714_v48 = vsel %vm2139_vm5, %v712_v42, %v713_v39  ;;  %v1954_v50 = vld [vmem:[%s2644_s1 + $0x3a4] ss:$16 sps:$4 sm:$0xff]   ;;  %v1985_v35 = vld [vmem:[%s2644_s1 + $0x308] ss:$16 sps:$4 sm:$0xff]  }
  0x3b   :  { %599 = vmatpush1.bf16.msra.mxu0 %v1878_v51  ;;  %652 = vmatpush1.bf16.msra.mxu1 %v1881_v52  ;;  %v1957_v51 = vld [vmem:[%s2644_s1 + $0x3ac] ss:$16 sps:$4 sm:$0xff]   ;;  %v1675_v52 = vcombine.low %v711_v47, %v714_v48 }
  0x3c   :  { %600 = vmatprep.subr.bf16.mxu0 %v1886_v54  ;;  %653 = vmatprep.subr.bf16.mxu1 %v1889_v55  ;;  %v1955_v54 = vld [vmem:[%s2644_s1 + $0x3a8] ss:$16 sps:$4 sm:$0xff]   ;;  %v1960_v55 = vld [vmem:[%s2644_s1 + $0x384] ss:$16 sps:$4 sm:$0xff]  }
  0x3f   :  { %601 = vmatpush1.bf16.msra.mxu0 %v1884_v57  ;;  %654 = vmatpush1.bf16.msra.mxu1 %v1887_v58  ;;  %v1963_v57 = vld [vmem:[%s2644_s1 + $0x38c] ss:$16 sps:$4 sm:$0xff]   ;;  %v1044_v58 = vshrl.u32 %v2308_v5, 16 }
  0x40   :  { %916 = vmatprep.subr.bf16.mxu0 %v1893_v59  ;;  %969 = vmatprep.subr.bf16.mxu1 %v1896_v60  ;;  %v1047_v59 = vshll.u32 %v2308_v5, 16  ;;  %v1958_v60 = vld [vmem:[%s2644_s1 + $0x380] ss:$16 sps:$4 sm:$0xff]   ;;  %v1967_v5 = vld [vmem:[%s2644_s1 + $0x368] ss:$16 sps:$4 sm:$0xff]  }
  0x42   :  { %619 = vmatmul.mubr.bf16.vlgmr.msra.gmra.mxu0 %v1606_v61  ;;  %672 = vmatmul.mubr.bf16.vlgmr.msra.gmra.mxu1 %v1606_v61  ;;  %v1961_v61 = vld [vmem:[%s2644_s1 + $0x388] ss:$16 sps:$4 sm:$0xff]  }
  0x43   :  { %917 = vmatpush1.bf16.msra.mxu0 %v1891_v62  ;;  %970 = vmatpush1.bf16.msra.mxu1 %v1894_v63  ;;  %v1966_v62 = vld [vmem:[%s2644_s1 + $0x364] ss:$16 sps:$4 sm:$0xff]   ;;  %v1969_v63 = vld [vmem:[%s2644_s1 + $0x36c] ss:$16 sps:$4 sm:$0xff]  }
  0x44   :  { %918 = vmatprep.subr.bf16.mxu0 %v1899_v2  ;;  %971 = vmatprep.subr.bf16.mxu1 %v1902_v27  ;;  %v1038_v2 = vld [vmem:[%s2645_s0 + $0x8] sm:$0x3]  ;;  %v1046_v27 = vrot.slane %v1044_v58, 5 }
  0x45   :  { %628 = vmatprep.mubr.bf16.mxu0 %v1988_v1  ;;  %681 = vmatprep.mubr.bf16.mxu1 %v1988_v1 }
  0x47   :  { %919 = vmatpush1.bf16.msra.mxu0 %v1897_v3  ;;  %972 = vmatpush1.bf16.msra.mxu1 %v1900_v4  ;;  %v1049_v3 = vrot.slane %v1047_v59, 6  ;;  %v1964_v4 = vld [vmem:[%s2644_s1 + $0x360] ss:$16 sps:$4 sm:$0xff]  }
  0x48   :  { %920 = vmatprep.subr.bf16.mxu0 %v1906_v6  ;;  %973 = vmatprep.subr.bf16.mxu1 %v1909_v7  ;;  %v1058_v6 = vshrl.u32 %v1038_v2, 16  ;;  %v1061_v7 = vshll.u32 %v1038_v2, 16 }
  0x4a   :  { %629 = vmatmul.mubr.bf16.gmra.mxu0 %v1607_v12  ;;  %682 = vmatmul.mubr.bf16.gmra.mxu1 %v1607_v12  ;;  %v1975_v12 = vld [vmem:[%s2644_s1 + $0x34c] ss:$16 sps:$4 sm:$0xff]  }
  0x4b   :  { %921 = vmatpush1.bf16.msra.mxu0 %v1904_v13  ;;  %974 = vmatpush1.bf16.msra.mxu1 %v1907_v15  ;;  %v1050_v13 = vor.u32 %v1049_v3, %v1046_v27  ;;  %v1070_v15 = vshll.u32 %v2404_v38, 16 }
  0x4c   :  { %922 = vmatprep.subr.bf16.mxu0 %v1912_v9  ;;  %975 = vmatprep.subr.bf16.mxu1 %v1915_v28  ;;  %v1973_v9 = vld [vmem:[%s2644_s1 + $0x348] ss:$16 sps:$4 sm:$0xff]   ;;  %v1060_v28 = vrot.slane %v1058_v6, 5 }
  0x4d   :  { %948 = vmatprep.mubr.bf16.mxu0 %v1988_v1  ;;  %1001 = vmatprep.mubr.bf16.mxu1 %v1988_v1 }
  0x4f   :  { %923 = vmatpush1.bf16.msra.mxu0 %v1910_v49  ;;  %976 = vmatpush1.bf16.msra.mxu1 %v1913_v0  ;;  %v1063_v49 = vrot.slane %v1061_v7, 6  ;;  %v1978_v0 = vld [vmem:[%s2644_s1 + $0x324] ss:$16 sps:$4 sm:$0xff]  }
  0x50   :  { %924 = vmatprep.subr.bf16.mxu0 %v1918_v17  ;;  %977 = vmatprep.subr.bf16.mxu1 %v1921_v18  ;;  %v1981_v17 = vld [vmem:[%s2644_s1 + $0x32c] ss:$16 sps:$4 sm:$0xff]   ;;  %v1039_v18 = vld [vmem:[%s2645_s0 + $0x14] sm:$0x3] }
  0x53   :  { %925 = vmatpush1.bf16.msra.mxu0 %v1916_v19  ;;  %978 = vmatpush1.bf16.msra.mxu1 %v1919_v20  ;;  %v1051_v19 = vrot.slane %v1050_v13, 4  ;;  %v1056_v20 = vrot.slane %v2136_v53, 4 }
  0x54   :  { %926 = vmatprep.subr.bf16.mxu0 %v1924_v21  ;;  %979 = vmatprep.subr.bf16.mxu1 %v1927_v22  ;;  %v1069_v21 = vrot.slane %v1067_v14, 5  ;;  %v1072_v22 = vrot.slane %v1070_v15, 6 }
  0x57   :  { %927 = vmatpush1.bf16.msra.mxu0 %v1922_v23  ;;  %980 = vmatpush1.bf16.msra.mxu1 %v1925_v24  ;;  %v1976_v23 = vld [vmem:[%s2644_s1 + $0x320] ss:$16 sps:$4 sm:$0xff]   ;;  %v1979_v24 = vld [vmem:[%s2644_s1 + $0x328] ss:$16 sps:$4 sm:$0xff]  }
  0x58   :  { %928 = vmatprep.subr.bf16.mxu0 %v1930_v25  ;;  %981 = vmatprep.subr.bf16.mxu1 %v1933_v26  ;;  %v1064_v26 = vor.u32 %v1063_v49, %v1060_v28 }
  0x5b   :  { %929 = vmatpush1.bf16.msra.mxu0 %v1928_v29  ;;  %982 = vmatpush1.bf16.msra.mxu1 %v1931_v30  ;;  %v1081_v29 = vshrl.u32 %v1039_v18, 16  ;;  %v1084_v30 = vshll.u32 %v1039_v18, 16 }
  0x5c   :  { %930 = vmatprep.subr.bf16.mxu0 %v1936_v31  ;;  %983 = vmatprep.subr.bf16.mxu1 %v1939_v32  ;;  %v1984_v31 = vld [vmem:[%s2644_s1 + $0x304] ss:$16 sps:$4 sm:$0xff]   ;;  %v1987_v32 = vld [vmem:[%s2644_s1 + $0x30c] ss:$16 sps:$4 sm:$0xff]  }
  0x5d   :  { %v1083_v38 = vrot.slane %v1081_v29, 5  ;;  %v1086_v39 = vrot.slane %v1084_v30, 6  ;;  %v1412_v30 = vld [vmem:[%s2646_s2] sm:$0xf] }
  0x5f   :  { %931 = vmatpush1.bf16.msra.mxu0 %v1934_v33  ;;  %984 = vmatpush1.bf16.msra.mxu1 %v1937_v34  ;;  %v1055_v33 = vsel %vm2507_vm8, %v1051_v19, %v2136_v53  ;;  %v1982_v34 = vld [vmem:[%s2644_s1 + $0x300] ss:$16 sps:$4 sm:$0xff]   ;;  %v1087_v41 = vor.u32 %v1086_v39, %v1083_v38 }
  0x60   :  { %1290 = vmatprep.subr.bf16.mxu0 %v1942_v36  ;;  %1343 = vmatprep.subr.bf16.mxu1 %v1945_v37  ;;  %v1065_v36 = vsel %vm2507_vm8, %v1056_v20, %v1064_v26  ;;  %v1073_v37 = vor.u32 %v1072_v22, %v1069_v21  ;;  %v1414_v21 = vlaneseq }
  0x62   :  { %949 = vmatmul.mubr.bf16.vlgmr.msra.gmra.mxu0 %v1674_v16  ;;  %1002 = vmatmul.mubr.bf16.vlgmr.msra.gmra.mxu1 %v1674_v16  ;;  %v1970_v16 = vld [vmem:[%s2644_s1 + $0x340] ss:$16 sps:$4 sm:$0xff]   ;;  %v1074_v53 = vrot.slane %v1073_v37, 4 }
  0x63   :  { %1291 = vmatpush1.bf16.msra.mxu0 %v1940_v10  ;;  %1344 = vmatpush1.bf16.msra.mxu1 %v1943_v40  ;;  %v1740_v10 = vcombine.low %v1055_v33, %v1065_v36  ;;  %v1079_v40 = vrot.slane %v2242_v44, 4  ;;  %v1450_v33 = vld [vmem:[%s2647_s3] sm:$0xf] }
  0x64   :  { %1292 = vmatprep.subr.bf16.mxu0 %v1948_v43  ;;  %1345 = vmatprep.subr.bf16.mxu1 %v1951_v11  ;;  %v1078_v42 = vsel %vm2507_vm8, %v1074_v53, %v2242_v44 }
  0x65   :  { %958 = vmatprep.mubr.bf16.mxu0 %v1988_v1  ;;  %1011 = vmatprep.mubr.bf16.mxu1 %v1988_v1  ;;  %v1088_v43 = vsel %vm2507_vm8, %v1079_v40, %v1087_v41 }
  0x66   :  { %v1741_v11 = vcombine.low %v1078_v42, %v1088_v43 }
  0x67   :  { %1293 = vmatpush1.bf16.msra.mxu0 %v1946_v45  ;;  %1346 = vmatpush1.bf16.msra.mxu1 %v1949_v46 }
  0x68   :  { %1294 = vmatprep.subr.bf16.mxu0 %v1954_v50  ;;  %1347 = vmatprep.subr.bf16.mxu1 %v1957_v51 }
  0x6a   :  { %959 = vmatmul.mubr.bf16.gmra.mxu0 %v1675_v52  ;;  %1012 = vmatmul.mubr.bf16.gmra.mxu1 %v1675_v52 }
  0x6b   :  { %1295 = vmatpush1.bf16.msra.mxu0 %v1952_v56  ;;  %1348 = vmatpush1.bf16.msra.mxu1 %v1955_v54 }
  0x6c   :  { %1296 = vmatprep.subr.bf16.mxu0 %v1960_v55  ;;  %1349 = vmatprep.subr.bf16.mxu1 %v1963_v57 }
  0x6d   :  { %1322 = vmatprep.mubr.bf16.mxu0 %v1988_v1  ;;  %1375 = vmatprep.mubr.bf16.mxu1 %v1988_v1 }
  0x6f   :  { %1297 = vmatpush1.bf16.msra.mxu0 %v1958_v60  ;;  %1350 = vmatpush1.bf16.msra.mxu1 %v1961_v61 }
  0x70   :  { %1298 = vmatprep.subr.bf16.mxu0 %v1966_v62  ;;  %1351 = vmatprep.subr.bf16.mxu1 %v1969_v63 }
  0x73   :  { %1299 = vmatpush1.bf16.msra.mxu0 %v1964_v4  ;;  %1352 = vmatpush1.bf16.msra.mxu1 %v1967_v5 }
  0x74   :  { %1300 = vmatprep.subr.bf16.mxu0 %v1972_v8  ;;  %1353 = vmatprep.subr.bf16.mxu1 %v1975_v12 }
  0x77   :  { %1301 = vmatpush1.bf16.msra.mxu0 %v1970_v16  ;;  %1354 = vmatpush1.bf16.msra.mxu1 %v1973_v9 }
  0x78   :  { %1302 = vmatprep.subr.bf16.mxu0 %v1978_v0  ;;  %1355 = vmatprep.subr.bf16.mxu1 %v1981_v17 }
  0x7b   :  { %1303 = vmatpush1.bf16.msra.mxu0 %v1976_v23  ;;  %1356 = vmatpush1.bf16.msra.mxu1 %v1979_v24  ;;  %v1415_v24 = vshrl.u32 %v1414_v21, 7 }
  0x7c   :  { %1304 = vmatprep.subr.bf16.mxu0 %v1984_v31  ;;  %1357 = vmatprep.subr.bf16.mxu1 %v1987_v32 }
  0x7d   :  { %v1416_v29 = vsub.s32 0, %v1415_v24  ;;  %v1424_v31 = vsub.s32 2, %v1415_v24  ;;  %v1420_v32 = vsub.s32 1, %v1415_v24 }
  0x7f   :  { %1305 = vmatpush1.bf16.msra.mxu0 %v1982_v34  ;;  %1358 = vmatpush1.bf16.msra.mxu1 %v1985_v35  ;;  %v1428_v34 = vsub.s32 3, %v1415_v24  ;;  %v2572_v37 = vrot.slane %v1412_v30, %v1416_v29  ;;  %v2574_v38 = vrot.slane %v1450_v33, %v1416_v29  ;;  %v2576_v39 = vrot.slane %v1412_v30, %v1424_v31 }
  0x80   :  { %v2580_v53 = vrot.slane %v1412_v30, %v1420_v32  ;;  %v2582_v41 = vrot.slane %v1450_v33, %v1420_v32 }
  0x81   :  { %v2584_v42 = vrot.slane %v1412_v30, %v1428_v34  ;;  %v2586_v43 = vrot.slane %v1450_v33, %v1428_v34 }
  0x82   :  { %1323 = vmatmul.mubr.bf16.vlgmr.msra.gmra.mxu0 %v1740_v10  ;;  %1376 = vmatmul.mubr.bf16.vlgmr.msra.gmra.mxu1 %v1740_v10  ;;  %v2578_v10 = vrot.slane %v1450_v33, %v1424_v31 }
  0x83   :  { %1332 = vmatprep.mubr.bf16.mxu0 %v1988_v1  ;;  %1385 = vmatprep.mubr.bf16.mxu1 %v1988_v1 }
  0x84   :  { %2656 = vst [vmem:[#allocation2_spill] sm:$0xff] %v2578_v10 }
  0x8a   :  { %1333 = vmatmul.mubr.bf16.gmra.mxu0 %v1741_v11  ;;  %1386 = vmatmul.mubr.bf16.gmra.mxu1 %v1741_v11 }
  0xe2   :  { %v342_v45 = vpop.f32.mrf.mxu0  ;;  %v2536_v46 = vpop.f32.mrf.mxu1 }
  0xe4   :  { %v2538_v47 = vpop.f32.mrf.mxu0  ;;  %v2540_v48 = vpop.f32.mrf.mxu1 }
  0xe6   :  { %v2542_v50 = vpop.f32.mrf.mxu0  ;;  %v2544_v1 = vpop.f32.mrf.mxu1 }
  0xe8   :  { %v2546_v51 = vpop.f32.mrf.mxu0  ;;  %v2548_v44 = vpop.f32.mrf.mxu1 }
  0xea   :  { %v2550_v52 = vpop.f32.mrf.mxu0  ;;  %v2552_v56 = vpop.f32.mrf.mxu1 }
  0xec   :  { %v2554_v54 = vpop.f32.mrf.mxu0  ;;  %v2556_v55 = vpop.f32.mrf.mxu1 }
  0xee   :  { %v2558_v57 = vpop.f32.mrf.mxu0  ;;  %v2560_v58 = vpop.f32.mrf.mxu1 }
  0xf0   :  { %v2562_v59 = vpop.f32.mrf.mxu0  ;;  %v2564_v60 = vpop.f32.mrf.mxu1 }
 0x102   :  { %v620_v61 = vpop.f32.mrf.mxu0  ;;  %v673_v62 = vpop.f32.mrf.mxu1 }
 0x103   :  { %v621_v40 = vadd.f32 %v620_v61, %v342_v45  ;;  %v674_v11 = vadd.f32 %v673_v62, %v2536_v46 }
 0x104   :  { %v622_v63 = vpop.f32.mrf.mxu0  ;;  %v675_v2 = vpop.f32.mrf.mxu1 }
 0x105   :  { %v623_v21 = vadd.f32 %v622_v63, %v2538_v47  ;;  %v676_v24 = vadd.f32 %v675_v2, %v2540_v48 }
 0x106   :  { %v624_v27 = vpop.f32.mrf.mxu0  ;;  %v677_v3 = vpop.f32.mrf.mxu1 }
 0x107   :  { %v625_v29 = vadd.f32 %v624_v27, %v2542_v50  ;;  %v678_v31 = vadd.f32 %v677_v3, %v2544_v1 }
 0x108   :  { %v626_v4 = vpop.f32.mrf.mxu0  ;;  %v679_v5 = vpop.f32.mrf.mxu1 }
 0x109   :  { %v627_v10 = vadd.f32 %v626_v4, %v2546_v51  ;;  %v680_v45 = vadd.f32 %v679_v5, %v2548_v44 }
 0x10a   :  { %v630_v6 = vpop.f32.mrf.mxu0  ;;  %v683_v7 = vpop.f32.mrf.mxu1 }
 0x10b   :  { %v631_v61 = vadd.f32 %v630_v6, %v2550_v52  ;;  %v684_v33 = vadd.f32 %v683_v7, %v2552_v56 }
 0x10c   :  { %v632_v8 = vpop.f32.mrf.mxu0  ;;  %v685_v12 = vpop.f32.mrf.mxu1 }
 0x10d   :  { %v633_v46 = vadd.f32 %v632_v8, %v2554_v54  ;;  %v686_v48 = vadd.f32 %v685_v12, %v2556_v55 }
 0x10e   :  { %v634_v13 = vpop.f32.mrf.mxu0  ;;  %v687_v14 = vpop.f32.mrf.mxu1 }
 0x10f   :  { %v635_v50 = vadd.f32 %v634_v13, %v2558_v57  ;;  %v688_v1 = vadd.f32 %v687_v14, %v2560_v58 }
 0x110   :  { %v636_v15 = vpop.f32.mrf.mxu0  ;;  %v689_v16 = vpop.f32.mrf.mxu1 }
 0x111   :  { %v637_v51 = vadd.f32 %v636_v15, %v2562_v59  ;;  %v690_v56 = vadd.f32 %v689_v16, %v2564_v60 }
 0x122   :  { %v950_v9 = vpop.f32.mrf.mxu0  ;;  %v1003_v28 = vpop.f32.mrf.mxu1 }
 0x123   :  { %v1022_v47 = vadd.f32 %v950_v9, %v621_v40  ;;  %v1024_v62 = vadd.f32 %v1003_v28, %v674_v11 }
 0x124   :  { %v952_v49 = vpop.f32.mrf.mxu0  ;;  %v1005_v0 = vpop.f32.mrf.mxu1 }
 0x125   :  { %v1023_v52 = vadd.f32 %v952_v49, %v623_v21  ;;  %v1025_v2 = vadd.f32 %v1005_v0, %v676_v24 }
 0x126   :  { %v954_v17 = vpop.f32.mrf.mxu0  ;;  %v1007_v18 = vpop.f32.mrf.mxu1 }
 0x127   :  { %v1026_v4 = vadd.f32 %v954_v17, %v625_v29  ;;  %v1028_v54 = vadd.f32 %v1007_v18, %v678_v31 }
 0x128   :  { %v956_v19 = vpop.f32.mrf.mxu0  ;;  %v1009_v20 = vpop.f32.mrf.mxu1 }
 0x129   :  { %v1027_v5 = vadd.f32 %v956_v19, %v627_v10  ;;  %v1029_v59 = vadd.f32 %v1009_v20, %v680_v45  ;;  %v2657_v20 = vld [vmem:[#allocation2_spill] sm:$0xff] }
 0x12a   :  { %v960_v22 = vpop.f32.mrf.mxu0  ;;  %v1013_v23 = vpop.f32.mrf.mxu1 }
 0x12b   :  { %v1030_v12 = vadd.f32 %v960_v22, %v631_v61  ;;  %v1032_v13 = vadd.f32 %v1013_v23, %v684_v33 }
 0x12c   :  { %v962_v25 = vpop.f32.mrf.mxu0  ;;  %v1015_v26 = vpop.f32.mrf.mxu1 }
 0x12d   :  { %v1031_v14 = vadd.f32 %v962_v25, %v633_v46  ;;  %v1033_v28 = vadd.f32 %v1015_v26, %v686_v48 }
 0x12e   :  { %v964_v35 = vpop.f32.mrf.mxu0  ;;  %v1017_v36 = vpop.f32.mrf.mxu1 }
 0x12f   :  { %v1034_v0 = vadd.f32 %v964_v35, %v635_v50  ;;  %v1036_v17 = vadd.f32 %v1017_v36, %v688_v1 }
 0x130   :  { %v966_v30 = vpop.f32.mrf.mxu0  ;;  %v2596_v32 = vpop.f32.mrf.mxu1 }
 0x131   :  { %v1035_v1 = vadd.f32 %v966_v30, %v637_v51 }
 0x142   :  { %v1324_v44 = vpop.f32.mrf.mxu0  ;;  %v1377_v63 = vpop.f32.mrf.mxu1 }
 0x143   :  { %v1396_v27 = vadd.f32 %v1324_v44, %v1022_v47  ;;  %v1398_v3 = vadd.f32 %v1377_v63, %v1024_v62 }
 0x144   :  { %v1326_v6 = vpop.f32.mrf.mxu0  ;;  %v1379_v7 = vpop.f32.mrf.mxu1 }
 0x145   :  { %v1434_v55 = vmul.f32 %v2572_v37, %v1396_v27  ;;  %v1436_v57 = vmul.f32 %v2576_v39, %v1398_v3  ;;  %v1397_v58 = vadd.f32 %v1326_v6, %v1023_v52  ;;  %v1399_v8 = vadd.f32 %v1379_v7, %v1025_v2 }
 0x146   :  { %v1328_v15 = vpop.f32.mrf.mxu0  ;;  %v1381_v9 = vpop.f32.mrf.mxu1  ;;  %v1037_v2 = vadd.f32 %v2596_v32, %v690_v56 }
 0x147   :  { %v1472_v60 = vadd.f32 %v2574_v38, %v1434_v55  ;;  %v1435_v16 = vmul.f32 %v2580_v53, %v1397_v58  ;;  %v1437_v49 = vmul.f32 %v2584_v42, %v1399_v8  ;;  %v1400_v18 = vadd.f32 %v1328_v15, %v1026_v4 }
 0x148   :  { %v1402_v19 = vadd.f32 %v1381_v9, %v1028_v54  ;;  %v1330_v34 = vpop.f32.mrf.mxu0  ;;  %v1383_v10 = vpop.f32.mrf.mxu1  ;;  %v1474_v22 = vadd.f32 %v2657_v20, %v1436_v57 }
 0x149   :  { %v1488_v40 = vmax.f32 %v1472_v60, 0.0  ;;  %v1473_v23 = vadd.f32 %v2582_v41, %v1435_v16  ;;  %v1475_v25 = vadd.f32 %v2586_v43, %v1437_v49  ;;  %v1438_v26 = vmul.f32 %v2572_v37, %v1400_v18 }
 0x14a   :  { %v1440_v11 = vmul.f32 %v2576_v39, %v1402_v19  ;;  %v1401_v21 = vadd.f32 %v1330_v34, %v1027_v5  ;;  %v1403_v24 = vadd.f32 %v1383_v10, %v1029_v59  ;;  %v1334_v29 = vpop.f32.mrf.mxu0  ;;  %v1387_v35 = vpop.f32.mrf.mxu1  ;;  %v1490_v44 = vmax.f32 %v1474_v22, 0.0 }
 0x14b   :  { %v1489_v36 = vmax.f32 %v1473_v23, 0.0  ;;  %v1491_v31 = vmax.f32 %v1475_v25, 0.0  ;;  %v1404_v45 = vadd.f32 %v1334_v29, %v1030_v12  ;;  %v1406_v61 = vadd.f32 %v1387_v35, %v1032_v13 }
 0x14c   :  { %v1476_v33 = vadd.f32 %v2574_v38, %v1438_v26  ;;  %v1478_v46 = vadd.f32 %v2657_v20, %v1440_v11  ;;  %v1439_v47 = vmul.f32 %v2580_v53, %v1401_v21  ;;  %v1441_v62 = vmul.f32 %v2584_v42, %v1403_v24  ;;  %v1336_v48 = vpop.f32.mrf.mxu0  ;;  %v1389_v50 = vpop.f32.mrf.mxu1 }
 0x14d   :  { %v1442_v63 = vmul.f32 %v2572_v37, %v1404_v45  ;;  %v1444_v52 = vmul.f32 %v2576_v39, %v1406_v61  ;;  %v1504_v27 = vmax.f32 %v1488_v40, %v1489_v36  ;;  %v1508_v6 = vmax.f32 %v1490_v44, %v1491_v31 }
 0x14e   :  { %v1477_v3 = vadd.f32 %v2582_v41, %v1439_v47  ;;  %v1479_v4 = vadd.f32 %v2586_v43, %v1441_v62  ;;  %v1338_v54 = vpop.f32.mrf.mxu0  ;;  %v1391_v5 = vpop.f32.mrf.mxu1  ;;  %v1492_v7 = vmax.f32 %v1476_v33, 0.0  ;;  %v1494_v55 = vmax.f32 %v1478_v46, 0.0 }
 0x14f   :  { %v1405_v57 = vadd.f32 %v1336_v48, %v1031_v14  ;;  %v1407_v51 = vadd.f32 %v1389_v50, %v1033_v28  ;;  %v1408_v8 = vadd.f32 %v1338_v54, %v1034_v0  ;;  %v1480_v13 = vadd.f32 %v2574_v38, %v1442_v63 }
 0x150   :  { %v1493_v58 = vmax.f32 %v1477_v3, 0.0  ;;  %v1495_v30 = vmax.f32 %v1479_v4, 0.0  ;;  %v1340_v59 = vpop.f32.mrf.mxu0  ;;  %v1393_v12 = vpop.f32.mrf.mxu1  ;;  %v1482_v32 = vadd.f32 %v2657_v20, %v1444_v52  ;;  %v1410_v15 = vadd.f32 %v1391_v5, %v1036_v17 }
 0x151   :  { %v1443_v56 = vmul.f32 %v2580_v53, %v1405_v57  ;;  %v1445_v16 = vmul.f32 %v2584_v42, %v1407_v51  ;;  %v1446_v49 = vmul.f32 %v2572_v37, %v1408_v8  ;;  %v1409_v0 = vadd.f32 %v1340_v59, %v1035_v1 }
 0x152   :  { %v1505_v9 = vmax.f32 %v1492_v7, %v1493_v58  ;;  %v1509_v60 = vmax.f32 %v1494_v55, %v1495_v30  ;;  %v1448_v28 = vmul.f32 %v2576_v39, %v1410_v15  ;;  %v1411_v18 = vadd.f32 %v1393_v12, %v1037_v2 }
 0x153   :  { %v1481_v14 = vadd.f32 %v2582_v41, %v1443_v56  ;;  %v1512_v19 = vmax.f32 %v1504_v27, %v1508_v6  ;;  %v1483_v10 = vadd.f32 %v2586_v43, %v1445_v16  ;;  %v1484_v40 = vadd.f32 %v2574_v38, %v1446_v49 }
 0x154   :  { %v1513_v34 = vmax.f32 %v1505_v9, %v1509_v60  ;;  %v1486_v17 = vadd.f32 %v2657_v20, %v1448_v28  ;;  %v1447_v23 = vmul.f32 %v2580_v53, %v1409_v0  ;;  %v1449_v25 = vmul.f32 %v2584_v42, %v1411_v18 }
 0x155   :  { %v1497_v22 = vmax.f32 %v1481_v14, 0.0  ;;  %v1496_v26 = vmax.f32 %v1480_v13, 0.0  ;;  %v1499_v11 = vmax.f32 %v1483_v10, 0.0  ;;  %v1498_v21 = vmax.f32 %v1482_v32, 0.0 }
 0x156   :  { %v1785_v37 = vpack.c.bf16 %v1513_v34, %v1512_v19  ;;  %v1485_v39 = vadd.f32 %v2582_v41, %v1447_v23  ;;  %v1487_v24 = vadd.f32 %v2586_v43, %v1449_v25  ;;  %v1500_v29 = vmax.f32 %v1484_v40, 0.0 }
 0x157   :  { %v1506_v38 = vmax.f32 %v1496_v26, %v1497_v22  ;;  %v1510_v35 = vmax.f32 %v1498_v21, %v1499_v11  ;;  %v1502_v20 = vmax.f32 %v1486_v17, 0.0 }
 0x158   :  { %1786 = vst [vmem:[%s2648_s4] sm:$0xff] %v1785_v37   ;;  %v1501_v36 = vmax.f32 %v1485_v39, 0.0  ;;  %v1503_v53 = vmax.f32 %v1487_v24, 0.0 }
 0x159   :  { %v1514_v45 = vmax.f32 %v1506_v38, %v1510_v35 }
 0x15a   :  { %v1507_v31 = vmax.f32 %v1500_v29, %v1501_v36  ;;  %v1511_v42 = vmax.f32 %v1502_v20, %v1503_v53 }
 0x15c   :  { %v1515_v61 = vmax.f32 %v1507_v31, %v1511_v42 }
 0x15e   :  { %v1790_v33 = vpack.c.bf16 %v1515_v61, %v1514_v45 }
 0x160   :  { %1792 = vst [vmem:[%s2648_s4 + $0x8] sm:$0xff] %v1790_v33  }

// kernel: _lambda_.4
= control target key start
LH: loop header
LB: loop body
LE: loop exit
PB: predicated region body
PF: predicated region fallthrough
CT: control target
= control target key end

     0   :  { %v4617_v1 = vmov 0   ;;  %vm122_vm0 = vsmask.f32 3328  ;;  %vm123_vm1 = vsmask.f32 7440  ;;  %vm1622_vm3 = vcmask 1042432   ;;  %s6015_s1 = inlined_call_operand.vmem [shape: bf16[4,384,512], index: 1, kind: input, shape index: {}]   ;;  %s6016_s0 = inlined_call_operand.vmem [shape: bf16[2,11,384], index: 0, kind: input, shape index: {}]   ;;  %s6017_s2 = inlined_call_operand.vmem [shape: f32[1,512], index: 2, kind: input, shape index: {}]   ;;  %s6018_s3 = inlined_call_operand.vmem [shape: f32[1,512], index: 3, kind: input, shape index: {}]   ;;  %s6019_s4 = inlined_call_operand.vmem [shape: bf16[2,8,128], index: 4, kind: output, shape index: {}]  }
   0x1   :  { %v4034_v0 = vld [vmem:[%s6015_s1 + $0x3e4] ss:$16 sps:$4 sm:$0xff]   ;;  %845 = vmatprep.mubr.bf16.mxu1 %v4617_v1  ;;  %v4038_v3 = vld [vmem:[%s6015_s1 + $0x3e0] ss:$16 sps:$4 sm:$0xff]   ;;  %v19_v29 = vld [vmem:[%s6016_s0 + $0x8] sm:$0xf] }
   0x2   :  { %v4036_v2 = vld [vmem:[%s6015_s1 + $0x5e4] ss:$16 sps:$4 sm:$0xff]   ;;  %770 = vmatprep.subr.bf16.mxu0 %v4034_v0  ;;  %v4039_v4 = vld [vmem:[%s6015_s1 + $0x5e0] ss:$16 sps:$4 sm:$0xff]   ;;  %v121_v32 = vld [vmem:[%s6016_s0 + $0x2c] sm:$0x1] }
   0x3   :  { %813 = vmatprep.subr.bf16.mxu1 %v4036_v2  ;;  %v4040_v5 = vld [vmem:[%s6015_s1 + $0x3c4] ss:$16 sps:$4 sm:$0xff]   ;;  %771 = vmatpush1.bf16.msra.mxu0 %v4038_v3  ;;  %v4044_v7 = vld [vmem:[%s6015_s1 + $0x3c0] ss:$16 sps:$4 sm:$0xff]   ;;  %v140_v33 = vshrl.u32 %v19_v29, 16  ;;  %v143_v34 = vshll.u32 %v19_v29, 16  ;;  %vm4756_vm2 = vmor %vm122_vm0, %vm123_vm1 }
   0x4   :  { %814 = vmatpush1.bf16.msra.mxu1 %v4039_v4  ;;  %v4042_v6 = vld [vmem:[%s6015_s1 + $0x5c4] ss:$16 sps:$4 sm:$0xff]   ;;  %772 = vmatprep.subr.bf16.mxu0 %v4040_v5  ;;  %v4045_v8 = vld [vmem:[%s6015_s1 + $0x5c0] ss:$16 sps:$4 sm:$0xff]   ;;  %v177_v39 = vshll.u32 %v121_v32, 16  ;;  %vm1623_vm4 = vcmask 1046532  }
   0x5   :  { %815 = vmatprep.subr.bf16.mxu1 %v4042_v6  ;;  %v4046_v9 = vld [vmem:[%s6015_s1 + $0x3a4] ss:$16 sps:$4 sm:$0xff]   ;;  %v4050_v11 = vld [vmem:[%s6015_s1 + $0x3a0] ss:$16 sps:$4 sm:$0xff]   ;;  %v142_v42 = vrot.slane %v140_v33, 4  ;;  %v145_v43 = vrot.slane %v143_v34, 5  ;;  %vm5216_vm5 = vmor %vm1622_vm3, %vm1623_vm4 }
   0x6   :  { %v4048_v10 = vld [vmem:[%s6015_s1 + $0x5a4] ss:$16 sps:$4 sm:$0xff]   ;;  %v4051_v12 = vld [vmem:[%s6015_s1 + $0x5a0] ss:$16 sps:$4 sm:$0xff]   ;;  %v179_v52 = vrot.slane %v177_v39, 5 }
   0x7   :  { %773 = vmatpush1.bf16.msra.mxu0 %v4044_v7  ;;  %v4052_v13 = vld [vmem:[%s6015_s1 + $0x384] ss:$16 sps:$4 sm:$0xff]   ;;  %v4056_v15 = vld [vmem:[%s6015_s1 + $0x380] ss:$16 sps:$4 sm:$0xff]   ;;  %v146_v48 = vor.u32 %v145_v43, %v142_v42  ;;  %v4086_v55 = vld [vmem:[%s6015_s1 + $0x3ec] ss:$16 sps:$4 sm:$0xff]  }
   0x8   :  { %816 = vmatpush1.bf16.msra.mxu1 %v4045_v8  ;;  %774 = vmatprep.subr.bf16.mxu0 %v4046_v9  ;;  %v4054_v14 = vld [vmem:[%s6015_s1 + $0x584] ss:$16 sps:$4 sm:$0xff]   ;;  %v4057_v16 = vld [vmem:[%s6015_s1 + $0x580] ss:$16 sps:$4 sm:$0xff]   ;;  %v4084_v58 = vld [vmem:[%s6015_s1 + $0x3e8] ss:$16 sps:$4 sm:$0xff]  }
   0x9   :  { %817 = vmatprep.subr.bf16.mxu1 %v4048_v10  ;;  %v4058_v17 = vld [vmem:[%s6015_s1 + $0x364] ss:$16 sps:$4 sm:$0xff]   ;;  %v4062_v19 = vld [vmem:[%s6015_s1 + $0x360] ss:$16 sps:$4 sm:$0xff]   ;;  %v147_v54 = vrot.slane %v146_v48, 4 }
   0xa   :  { %v4060_v18 = vld [vmem:[%s6015_s1 + $0x564] ss:$16 sps:$4 sm:$0xff]   ;;  %v4063_v20 = vld [vmem:[%s6015_s1 + $0x560] ss:$16 sps:$4 sm:$0xff]   ;;  %v4092_v63 = vld [vmem:[%s6015_s1 + $0x3cc] ss:$16 sps:$4 sm:$0xff]  }
   0xb   :  { %775 = vmatpush1.bf16.msra.mxu0 %v4050_v11  ;;  %v4064_v21 = vld [vmem:[%s6015_s1 + $0x344] ss:$16 sps:$4 sm:$0xff]   ;;  %v4068_v23 = vld [vmem:[%s6015_s1 + $0x340] ss:$16 sps:$4 sm:$0xff]   ;;  %v4090_v0 = vld [vmem:[%s6015_s1 + $0x3c8] ss:$16 sps:$4 sm:$0xff]  }
   0xc   :  { %818 = vmatpush1.bf16.msra.mxu1 %v4051_v12  ;;  %776 = vmatprep.subr.bf16.mxu0 %v4052_v13  ;;  %v4066_v22 = vld [vmem:[%s6015_s1 + $0x544] ss:$16 sps:$4 sm:$0xff]   ;;  %v4069_v24 = vld [vmem:[%s6015_s1 + $0x540] ss:$16 sps:$4 sm:$0xff]   ;;  %v4098_v4 = vld [vmem:[%s6015_s1 + $0x3ac] ss:$16 sps:$4 sm:$0xff]  }
   0xd   :  { %819 = vmatprep.subr.bf16.mxu1 %v4054_v14  ;;  %v4070_v25 = vld [vmem:[%s6015_s1 + $0x324] ss:$16 sps:$4 sm:$0xff]   ;;  %v4074_v27 = vld [vmem:[%s6015_s1 + $0x320] ss:$16 sps:$4 sm:$0xff]   ;;  %v4096_v5 = vld [vmem:[%s6015_s1 + $0x3a8] ss:$16 sps:$4 sm:$0xff]  }
   0xe   :  { %v4072_v26 = vld [vmem:[%s6015_s1 + $0x524] ss:$16 sps:$4 sm:$0xff]   ;;  %v4075_v28 = vld [vmem:[%s6015_s1 + $0x520] ss:$16 sps:$4 sm:$0xff]   ;;  %v4104_v8 = vld [vmem:[%s6015_s1 + $0x38c] ss:$16 sps:$4 sm:$0xff]  }
   0xf   :  { %777 = vmatpush1.bf16.msra.mxu0 %v4056_v15  ;;  %v21_v30 = vld [vmem:[%s6016_s0 + $0x20] sm:$0xf]  ;;  %v119_v31 = vld [vmem:[%s6016_s0 + $0x14] sm:$0x1]  ;;  %v4102_v9 = vld [vmem:[%s6015_s1 + $0x388] ss:$16 sps:$4 sm:$0xff]  }
  0x10   :  { %820 = vmatpush1.bf16.msra.mxu1 %v4057_v16  ;;  %778 = vmatprep.subr.bf16.mxu0 %v4058_v17  ;;  %v4740_v35 = vcombine.low %v19_v29, %v21_v30  ;;  %v149_v36 = vshll.u32 %v119_v31, 16  ;;  %v168_v37 = vshrl.u32 %v21_v30, 16  ;;  %v171_v38 = vshll.u32 %v21_v30, 16  ;;  %v4076_v40 = vld [vmem:[%s6015_s1 + $0x304] ss:$16 sps:$4 sm:$0xff]   ;;  %v4835_v16 = vld [vmem:[%s6016_s0 + $0x18] sm:$0xff] }
  0x11   :  { %821 = vmatprep.subr.bf16.mxu1 %v4060_v18  ;;  %v4078_v41 = vld [vmem:[%s6015_s1 + $0x504] ss:$16 sps:$4 sm:$0xff]   ;;  %v4080_v44 = vld [vmem:[%s6015_s1 + $0x300] ss:$16 sps:$4 sm:$0xff]   ;;  %v4110_v12 = vld [vmem:[%s6015_s1 + $0x36c] ss:$16 sps:$4 sm:$0xff]  }
  0x12   :  { %v170_v45 = vrot.slane %v168_v37, 4  ;;  %v173_v46 = vrot.slane %v171_v38, 5  ;;  %v4081_v47 = vld [vmem:[%s6015_s1 + $0x500] ss:$16 sps:$4 sm:$0xff]   ;;  %v151_v49 = vrot.slane %v149_v36, 5 }
  0x13   :  { %779 = vmatpush1.bf16.msra.mxu0 %v4062_v19  ;;  %v4082_v53 = vld [vmem:[%s6015_s1 + $0x4e4] ss:$16 sps:$4 sm:$0xff]   ;;  %v4087_v60 = vld [vmem:[%s6015_s1 + $0x4e0] ss:$16 sps:$4 sm:$0xff]   ;;  %v4108_v13 = vld [vmem:[%s6015_s1 + $0x368] ss:$16 sps:$4 sm:$0xff]  }
  0x14   :  { %822 = vmatpush1.bf16.msra.mxu1 %v4063_v20  ;;  %780 = vmatprep.subr.bf16.mxu0 %v4064_v21  ;;  %v174_v51 = vor.u32 %v173_v46, %v170_v45  ;;  %v152_v57 = vsel %vm4756_vm2, %v147_v54, %v151_v49  ;;  %v4088_v61 = vld [vmem:[%s6015_s1 + $0x4c4] ss:$16 sps:$4 sm:$0xff]   ;;  %v4093_v2 = vld [vmem:[%s6015_s1 + $0x4c0] ss:$16 sps:$4 sm:$0xff]   ;;  %v4114_v34 = vld [vmem:[%s6015_s1 + $0x348] ss:$16 sps:$4 sm:$0xff]  }
  0x15   :  { %823 = vmatprep.subr.bf16.mxu1 %v4066_v22  ;;  %v4094_v3 = vld [vmem:[%s6015_s1 + $0x4a4] ss:$16 sps:$4 sm:$0xff]   ;;  %v4099_v6 = vld [vmem:[%s6015_s1 + $0x4a0] ss:$16 sps:$4 sm:$0xff]   ;;  %v154_v22 = vshrl.u32 %v4835_v16, 16 }
  0x16   :  { %v175_v56 = vrot.slane %v174_v51, 4  ;;  %v4100_v7 = vld [vmem:[%s6015_s1 + $0x484] ss:$16 sps:$4 sm:$0xff]   ;;  %v4105_v10 = vld [vmem:[%s6015_s1 + $0x480] ss:$16 sps:$4 sm:$0xff]  }
  0x17   :  { %781 = vmatpush1.bf16.msra.mxu0 %v4068_v23  ;;  %v4106_v11 = vld [vmem:[%s6015_s1 + $0x464] ss:$16 sps:$4 sm:$0xff]   ;;  %v4111_v14 = vld [vmem:[%s6015_s1 + $0x460] ss:$16 sps:$4 sm:$0xff]   ;;  %v156_v30 = vrot.slane %v154_v22, 4 }
  0x18   :  { %824 = vmatpush1.bf16.msra.mxu1 %v4069_v24  ;;  %782 = vmatprep.subr.bf16.mxu0 %v4070_v25  ;;  %v180_v59 = vsel %vm4756_vm2, %v175_v56, %v179_v52  ;;  %v4830_v15 = vld [vmem:[%s6016_s0] sm:$0xff]  ;;  %v118_v17 = vld [vmem:[%s6016_s0 + $0xc] sm:$0x11]  ;;  %v157_v24 = vshll.u32 %v4835_v16, 16  ;;  %v4126_v50 = vld [vmem:[%s6015_s1 + $0x308] ss:$16 sps:$4 sm:$0xff]  }
  0x19   :  { %825 = vmatprep.subr.bf16.mxu1 %v4072_v26  ;;  %v4779_v62 = vcombine.low %v152_v57, %v180_v59  ;;  %v120_v18 = vld [vmem:[%s6016_s0 + $0x24] sm:$0x11]  ;;  %v126_v19 = vshrl.u32 %v4830_v15, 16  ;;  %v129_v20 = vshll.u32 %v4830_v15, 16  ;;  %v135_v21 = vshll.u32 %v118_v17, 16 }
  0x1a   :  { %v4112_v23 = vld [vmem:[%s6015_s1 + $0x444] ss:$16 sps:$4 sm:$0xff]   ;;  %v163_v25 = vshll.u32 %v120_v18, 16  ;;  %v4852_v26 = vcombine.low %v4830_v15, %v4835_v16  ;;  %v159_v31 = vrot.slane %v157_v24, 5  ;;  %v4117_v36 = vld [vmem:[%s6015_s1 + $0x440] ss:$16 sps:$4 sm:$0xff]  }
  0x1b   :  { %783 = vmatpush1.bf16.msra.mxu0 %v4074_v27  ;;  %v4116_v27 = vld [vmem:[%s6015_s1 + $0x34c] ss:$16 sps:$4 sm:$0xff]   ;;  %v131_v29 = vrot.slane %v129_v20, 5  ;;  %v137_v33 = vrot.slane %v135_v21, 5  ;;  %v4118_v39 = vld [vmem:[%s6015_s1 + $0x424] ss:$16 sps:$4 sm:$0xff]  }
  0x1c   :  { %826 = vmatpush1.bf16.msra.mxu1 %v4075_v28  ;;  %784 = vmatprep.subr.bf16.mxu0 %v4076_v40  ;;  %v128_v28 = vrot.slane %v126_v19, 4  ;;  %v160_v37 = vor.u32 %v159_v31, %v156_v30  ;;  %v165_v38 = vrot.slane %v163_v25, 5  ;;  %v4122_v40 = vld [vmem:[%s6015_s1 + $0x32c] ss:$16 sps:$4 sm:$0xff]   ;;  %v4123_v45 = vld [vmem:[%s6015_s1 + $0x420] ss:$16 sps:$4 sm:$0xff]  }
  0x1d   :  { %827 = vmatprep.subr.bf16.mxu1 %v4078_v41  ;;  %v4128_v48 = vld [vmem:[%s6015_s1 + $0x30c] ss:$16 sps:$4 sm:$0xff]   ;;  %v4129_v51 = vld [vmem:[%s6015_s1 + $0x400] ss:$16 sps:$4 sm:$0xff]   ;;  %v4133_v56 = vld [vmem:[%s6015_s1 + $0x5e8] ss:$16 sps:$4 sm:$0xff]  }
  0x1e   :  { %v132_v32 = vor.u32 %v131_v29, %v128_v28  ;;  %v161_v42 = vrot.slane %v160_v37, 4  ;;  %v4132_v52 = vld [vmem:[%s6015_s1 + $0x4ec] ss:$16 sps:$4 sm:$0xff]   ;;  %v4136_v59 = vld [vmem:[%s6015_s1 + $0x4c8] ss:$16 sps:$4 sm:$0xff]  }
  0x1f   :  { %785 = vmatpush1.bf16.msra.mxu0 %v4080_v44  ;;  %v4120_v44 = vld [vmem:[%s6015_s1 + $0x328] ss:$16 sps:$4 sm:$0xff]   ;;  %v4138_v57 = vld [vmem:[%s6015_s1 + $0x4cc] ss:$16 sps:$4 sm:$0xff]   ;;  %v4180_v25 = vld [vmem:[%s6015_s1 + $0xe4] ss:$16 sps:$4 sm:$0xff]  }
  0x20   :  { %828 = vmatpush1.bf16.msra.mxu1 %v4081_v47  ;;  %786 = vmatprep.subr.bf16.mxu0 %v4082_v53  ;;  %v133_v41 = vrot.slane %v132_v32, 4  ;;  %v166_v46 = vsel %vm4756_vm2, %v161_v42, %v165_v38  ;;  %v4124_v47 = vld [vmem:[%s6015_s1 + $0x404] ss:$16 sps:$4 sm:$0xff]   ;;  %v4135_v53 = vld [vmem:[%s6015_s1 + $0x5ec] ss:$16 sps:$4 sm:$0xff]   ;;  %v5011_v32 = vcombine.high %v4830_v15, %v4835_v16 }
  0x21   :  { %856 = vmatprep.subr.bf16.mxu1 %v4086_v55  ;;  %v4130_v55 = vld [vmem:[%s6015_s1 + $0x4e8] ss:$16 sps:$4 sm:$0xff]   ;;  %v4168_v17 = vld [vmem:[%s6015_s1 + $0x42c] ss:$16 sps:$4 sm:$0xff]   ;;  %v4178_v28 = vld [vmem:[%s6015_s1 + $0xe0] ss:$16 sps:$4 sm:$0xff]  }
  0x22   :  { %v138_v43 = vsel %vm4756_vm2, %v133_v41, %v137_v33  ;;  %v4171_v18 = vld [vmem:[%s6015_s1 + $0x52c] ss:$16 sps:$4 sm:$0xff]   ;;  %v4166_v19 = vld [vmem:[%s6015_s1 + $0x428] ss:$16 sps:$4 sm:$0xff]   ;;  %v4181_v29 = vld [vmem:[%s6015_s1 + $0x2e0] ss:$16 sps:$4 sm:$0xff]  }
  0x23   :  { %846 = vmatmul.mubr.bf16.vlgmr.msra.gmra.mxu1 %v4779_v62  ;;  %787 = vmatpush2.bf16.msra.mxu0 %v4087_v60  ;;  %v3437_v49 = vcombine.high %v138_v43, %v166_v46  ;;  %v4897_v54 = vcombine.low %v138_v43, %v166_v46  ;;  %v4139_v60 = vld [vmem:[%s6015_s1 + $0x5c8] ss:$16 sps:$4 sm:$0xff]   ;;  %v4174_v21 = vld [vmem:[%s6015_s1 + $0x40c] ss:$16 sps:$4 sm:$0xff]   ;;  %v4186_v30 = vld [vmem:[%s6015_s1 + $0xc4] ss:$16 sps:$4 sm:$0xff]  }
  0x24   :  { %857 = vmatpush1.bf16.msra.mxu1 %v4084_v58  ;;  %788 = vmatprep.subr.bf16.mxu0 %v4088_v61  ;;  %v4141_v58 = vld [vmem:[%s6015_s1 + $0x5cc] ss:$16 sps:$4 sm:$0xff]   ;;  %v4169_v20 = vld [vmem:[%s6015_s1 + $0x528] ss:$16 sps:$4 sm:$0xff]   ;;  %v4189_v31 = vld [vmem:[%s6015_s1 + $0x2c4] ss:$16 sps:$4 sm:$0xff]  }
  0x25   :  { %858 = vmatprep.subr.bf16.mxu1 %v4092_v63  ;;  %802 = vmatprep.mubr.bf16.mxu0 %v3437_v49  ;;  %v4144_v61 = vld [vmem:[%s6015_s1 + $0x4ac] ss:$16 sps:$4 sm:$0xff]   ;;  %v4175_v24 = vld [vmem:[%s6015_s1 + $0x508] ss:$16 sps:$4 sm:$0xff]   ;;  %v4184_v33 = vld [vmem:[%s6015_s1 + $0xc0] ss:$16 sps:$4 sm:$0xff]  }
  0x26   :  { %888 = vmatprep.mubr.bf16.mxu1 %v3437_v49  ;;  %v4147_v63 = vld [vmem:[%s6015_s1 + $0x5ac] ss:$16 sps:$4 sm:$0xff]   ;;  %v4192_v15 = vld [vmem:[%s6015_s1 + $0xa4] ss:$16 sps:$4 sm:$0xff]   ;;  %v4190_v16 = vld [vmem:[%s6015_s1 + $0xa0] ss:$16 sps:$4 sm:$0xff]  }
  0x27   :  { %789 = vmatpush2.bf16.msra.mxu0 %v4093_v2  ;;  %v4145_v2 = vld [vmem:[%s6015_s1 + $0x5a8] ss:$16 sps:$4 sm:$0xff]   ;;  %v4177_v22 = vld [vmem:[%s6015_s1 + $0x50c] ss:$16 sps:$4 sm:$0xff]   ;;  %v4198_v37 = vld [vmem:[%s6015_s1 + $0x84] ss:$16 sps:$4 sm:$0xff]  }
  0x28   :  { %859 = vmatpush1.bf16.msra.mxu1 %v4090_v0  ;;  %790 = vmatprep.subr.bf16.mxu0 %v4094_v3  ;;  %v4142_v0 = vld [vmem:[%s6015_s1 + $0x4a8] ss:$16 sps:$4 sm:$0xff]   ;;  %v4150_v3 = vld [vmem:[%s6015_s1 + $0x48c] ss:$16 sps:$4 sm:$0xff]   ;;  %v4201_v38 = vld [vmem:[%s6015_s1 + $0x284] ss:$16 sps:$4 sm:$0xff]  }
  0x29   :  { %860 = vmatprep.subr.bf16.mxu1 %v4098_v4  ;;  %v4153_v4 = vld [vmem:[%s6015_s1 + $0x58c] ss:$16 sps:$4 sm:$0xff]   ;;  %v4204_v41 = vld [vmem:[%s6015_s1 + $0x64] ss:$16 sps:$4 sm:$0xff]   ;;  %v4202_v43 = vld [vmem:[%s6015_s1 + $0x60] ss:$16 sps:$4 sm:$0xff]  }
  0x2a   :  { %v4207_v42 = vld [vmem:[%s6015_s1 + $0x264] ss:$16 sps:$4 sm:$0xff]   ;;  %vm2414_vm6 = vsmask.f32 2304  ;;  %vm2415_vm7 = vsmask.f32 6416 }
  0x2b   :  { %791 = vmatpush2.bf16.msra.mxu0 %v4099_v6  ;;  %v4151_v6 = vld [vmem:[%s6015_s1 + $0x588] ss:$16 sps:$4 sm:$0xff]   ;;  %v4213_v46 = vld [vmem:[%s6015_s1 + $0x244] ss:$16 sps:$4 sm:$0xff]   ;;  %vm5480_vm8 = vmor %vm2414_vm6, %vm2415_vm7 }
  0x2c   :  { %861 = vmatpush1.bf16.msra.mxu1 %v4096_v5  ;;  %792 = vmatprep.subr.bf16.mxu0 %v4100_v7  ;;  %v4148_v5 = vld [vmem:[%s6015_s1 + $0x488] ss:$16 sps:$4 sm:$0xff]   ;;  %v4156_v7 = vld [vmem:[%s6015_s1 + $0x46c] ss:$16 sps:$4 sm:$0xff]   ;;  %v4216_v49 = vld [vmem:[%s6015_s1 + $0x24] ss:$16 sps:$4 sm:$0xff]  }
  0x2d   :  { %862 = vmatprep.subr.bf16.mxu1 %v4104_v8  ;;  %v4159_v8 = vld [vmem:[%s6015_s1 + $0x56c] ss:$16 sps:$4 sm:$0xff]  }
  0x2f   :  { %793 = vmatpush2.bf16.msra.mxu0 %v4105_v10  ;;  %v4157_v10 = vld [vmem:[%s6015_s1 + $0x568] ss:$16 sps:$4 sm:$0xff]  }
  0x30   :  { %863 = vmatpush1.bf16.msra.mxu1 %v4102_v9  ;;  %794 = vmatprep.subr.bf16.mxu0 %v4106_v11  ;;  %v4154_v9 = vld [vmem:[%s6015_s1 + $0x468] ss:$16 sps:$4 sm:$0xff]   ;;  %v4162_v11 = vld [vmem:[%s6015_s1 + $0x44c] ss:$16 sps:$4 sm:$0xff]  }
  0x31   :  { %864 = vmatprep.subr.bf16.mxu1 %v4110_v12  ;;  %v4165_v12 = vld [vmem:[%s6015_s1 + $0x54c] ss:$16 sps:$4 sm:$0xff]  }
  0x33   :  { %795 = vmatpush2.bf16.msra.mxu0 %v4111_v14  ;;  %v4163_v14 = vld [vmem:[%s6015_s1 + $0x548] ss:$16 sps:$4 sm:$0xff]  }
  0x34   :  { %865 = vmatpush1.bf16.msra.mxu1 %v4108_v13  ;;  %796 = vmatprep.subr.bf16.mxu0 %v4112_v23  ;;  %v4160_v13 = vld [vmem:[%s6015_s1 + $0x448] ss:$16 sps:$4 sm:$0xff]  }
  0x35   :  { %866 = vmatprep.subr.bf16.mxu1 %v4116_v27  ;;  %v4172_v23 = vld [vmem:[%s6015_s1 + $0x408] ss:$16 sps:$4 sm:$0xff]   ;;  %v4183_v27 = vld [vmem:[%s6015_s1 + $0x2e4] ss:$16 sps:$4 sm:$0xff]  }
  0x37   :  { %797 = vmatpush2.bf16.msra.mxu0 %v4117_v36  ;;  %v4193_v36 = vld [vmem:[%s6015_s1 + $0x2a0] ss:$16 sps:$4 sm:$0xff]  }
  0x38   :  { %867 = vmatpush1.bf16.msra.mxu1 %v4114_v34  ;;  %798 = vmatprep.subr.bf16.mxu0 %v4118_v39  ;;  %v4187_v34 = vld [vmem:[%s6015_s1 + $0x2c0] ss:$16 sps:$4 sm:$0xff]  }
  0x39   :  { %868 = vmatprep.subr.bf16.mxu1 %v4122_v40  ;;  %v4196_v39 = vld [vmem:[%s6015_s1 + $0x80] ss:$16 sps:$4 sm:$0xff]  }
  0x3a   :  { %v4199_v40 = vld [vmem:[%s6015_s1 + $0x280] ss:$16 sps:$4 sm:$0xff]  }
  0x3b   :  { %799 = vmatpush2.bf16.msra.mxu0 %v4123_v45  ;;  %v4210_v45 = vld [vmem:[%s6015_s1 + $0x44] ss:$16 sps:$4 sm:$0xff]  }
  0x3c   :  { %869 = vmatpush1.bf16.msra.mxu1 %v4120_v44  ;;  %800 = vmatprep.subr.bf16.mxu0 %v4124_v47  ;;  %v4205_v44 = vld [vmem:[%s6015_s1 + $0x260] ss:$16 sps:$4 sm:$0xff]  }
  0x3d   :  { %870 = vmatprep.subr.bf16.mxu1 %v4128_v48  ;;  %v4208_v47 = vld [vmem:[%s6015_s1 + $0x40] ss:$16 sps:$4 sm:$0xff]  }
  0x3e   :  { %v4211_v48 = vld [vmem:[%s6015_s1 + $0x240] ss:$16 sps:$4 sm:$0xff]  }
  0x3f   :  { %801 = vmatpush2.bf16.msra.mxu0 %v4129_v51  ;;  %v4214_v51 = vld [vmem:[%s6015_s1 + $0x20] ss:$16 sps:$4 sm:$0xff]  }
  0x40   :  { %871 = vmatpush1.bf16.msra.mxu1 %v4126_v50  ;;  %899 = vmatprep.subr.bf16.mxu0 %v4135_v53  ;;  %v4219_v50 = vld [vmem:[%s6015_s1 + $0x224] ss:$16 sps:$4 sm:$0xff]  }
  0x41   :  { %872 = vmatprep.subr.bf16.mxu1 %v4132_v52  ;;  %v4217_v52 = vld [vmem:[%s6015_s1 + $0x220] ss:$16 sps:$4 sm:$0xff]   ;;  %v4222_v53 = vld [vmem:[%s6015_s1 + $0x4] ss:$16 sps:$4 sm:$0xff]  }
  0x42   :  { %803 = vmatmul.mubr.bf16.vlgmr.msra.gmra.mxu0 %v4897_v54 }
  0x43   :  { %900 = vmatpush1.bf16.msra.mxu0 %v4133_v56  ;;  %931 = vmatprep.mubr.bf16.mxu0 %v4617_v1  ;;  %v4223_v56 = vld [vmem:[%s6015_s1 + $0x200] ss:$16 sps:$4 sm:$0xff]  }
  0x44   :  { %873 = vmatpush2.bf16.msra.mxu1 %v4130_v55  ;;  %901 = vmatprep.subr.bf16.mxu0 %v4141_v58  ;;  %v4220_v55 = vld [vmem:[%s6015_s1] ss:$16 sps:$4 sm:$0xff]   ;;  %v4232_v58 = vld [vmem:[%s6015_s1 + $0xec] ss:$16 sps:$4 sm:$0xff]  }
  0x45   :  { %874 = vmatprep.subr.bf16.mxu1 %v4138_v57  ;;  %v4228_v57 = vld [vmem:[%s6015_s1 + $0x1e4] ss:$16 sps:$4 sm:$0xff]  }
  0x47   :  { %902 = vmatpush1.bf16.msra.mxu0 %v4139_v60  ;;  %v4230_v60 = vld [vmem:[%s6015_s1 + $0xe8] ss:$16 sps:$4 sm:$0xff]  }
  0x48   :  { %875 = vmatpush2.bf16.msra.mxu1 %v4136_v59  ;;  %903 = vmatprep.subr.bf16.mxu0 %v4147_v63  ;;  %v4226_v59 = vld [vmem:[%s6015_s1 + $0x1e0] ss:$16 sps:$4 sm:$0xff]   ;;  %v4238_v63 = vld [vmem:[%s6015_s1 + $0xcc] ss:$16 sps:$4 sm:$0xff]  }
  0x49   :  { %876 = vmatprep.subr.bf16.mxu1 %v4144_v61  ;;  %v4235_v61 = vld [vmem:[%s6015_s1 + $0x1c4] ss:$16 sps:$4 sm:$0xff]  }
  0x4b   :  { %904 = vmatpush1.bf16.msra.mxu0 %v4145_v2  ;;  %v4236_v2 = vld [vmem:[%s6015_s1 + $0xc8] ss:$16 sps:$4 sm:$0xff]  }
  0x4c   :  { %877 = vmatpush2.bf16.msra.mxu1 %v4142_v0  ;;  %905 = vmatprep.subr.bf16.mxu0 %v4153_v4  ;;  %v4233_v0 = vld [vmem:[%s6015_s1 + $0x1c0] ss:$16 sps:$4 sm:$0xff]   ;;  %v4244_v4 = vld [vmem:[%s6015_s1 + $0xac] ss:$16 sps:$4 sm:$0xff]  }
  0x4d   :  { %878 = vmatprep.subr.bf16.mxu1 %v4150_v3  ;;  %v4241_v3 = vld [vmem:[%s6015_s1 + $0x1a4] ss:$16 sps:$4 sm:$0xff]  }
  0x4f   :  { %906 = vmatpush1.bf16.msra.mxu0 %v4151_v6  ;;  %v4242_v6 = vld [vmem:[%s6015_s1 + $0xa8] ss:$16 sps:$4 sm:$0xff]  }
  0x50   :  { %879 = vmatpush2.bf16.msra.mxu1 %v4148_v5  ;;  %907 = vmatprep.subr.bf16.mxu0 %v4159_v8  ;;  %v4239_v5 = vld [vmem:[%s6015_s1 + $0x1a0] ss:$16 sps:$4 sm:$0xff]   ;;  %v4250_v8 = vld [vmem:[%s6015_s1 + $0x8c] ss:$16 sps:$4 sm:$0xff]  }
  0x51   :  { %880 = vmatprep.subr.bf16.mxu1 %v4156_v7  ;;  %v4247_v7 = vld [vmem:[%s6015_s1 + $0x184] ss:$16 sps:$4 sm:$0xff]  }
  0x53   :  { %908 = vmatpush1.bf16.msra.mxu0 %v4157_v10  ;;  %v4248_v10 = vld [vmem:[%s6015_s1 + $0x88] ss:$16 sps:$4 sm:$0xff]  }
  0x54   :  { %881 = vmatpush2.bf16.msra.mxu1 %v4154_v9  ;;  %909 = vmatprep.subr.bf16.mxu0 %v4165_v12  ;;  %v4245_v9 = vld [vmem:[%s6015_s1 + $0x180] ss:$16 sps:$4 sm:$0xff]   ;;  %v4256_v12 = vld [vmem:[%s6015_s1 + $0x6c] ss:$16 sps:$4 sm:$0xff]  }
  0x55   :  { %882 = vmatprep.subr.bf16.mxu1 %v4162_v11  ;;  %v4253_v11 = vld [vmem:[%s6015_s1 + $0x164] ss:$16 sps:$4 sm:$0xff]  }
  0x57   :  { %910 = vmatpush1.bf16.msra.mxu0 %v4163_v14  ;;  %v4254_v14 = vld [vmem:[%s6015_s1 + $0x68] ss:$16 sps:$4 sm:$0xff]  }
  0x58   :  { %883 = vmatpush2.bf16.msra.mxu1 %v4160_v13  ;;  %911 = vmatprep.subr.bf16.mxu0 %v4171_v18  ;;  %v4251_v13 = vld [vmem:[%s6015_s1 + $0x160] ss:$16 sps:$4 sm:$0xff]   ;;  %v4262_v18 = vld [vmem:[%s6015_s1 + $0x4c] ss:$16 sps:$4 sm:$0xff]  }
  0x59   :  { %884 = vmatprep.subr.bf16.mxu1 %v4168_v17  ;;  %v4259_v17 = vld [vmem:[%s6015_s1 + $0x144] ss:$16 sps:$4 sm:$0xff]  }
  0x5b   :  { %912 = vmatpush1.bf16.msra.mxu0 %v4169_v20  ;;  %v4260_v20 = vld [vmem:[%s6015_s1 + $0x48] ss:$16 sps:$4 sm:$0xff]  }
  0x5c   :  { %885 = vmatpush2.bf16.msra.mxu1 %v4166_v19  ;;  %913 = vmatprep.subr.bf16.mxu0 %v4177_v22  ;;  %v4257_v19 = vld [vmem:[%s6015_s1 + $0x140] ss:$16 sps:$4 sm:$0xff]   ;;  %v4268_v22 = vld [vmem:[%s6015_s1 + $0x2c] ss:$16 sps:$4 sm:$0xff]  }
  0x5d   :  { %886 = vmatprep.subr.bf16.mxu1 %v4174_v21  ;;  %v4265_v21 = vld [vmem:[%s6015_s1 + $0x124] ss:$16 sps:$4 sm:$0xff]  }
  0x5f   :  { %914 = vmatpush1.bf16.msra.mxu0 %v4175_v24  ;;  %v4266_v24 = vld [vmem:[%s6015_s1 + $0x28] ss:$16 sps:$4 sm:$0xff]  }
  0x60   :  { %887 = vmatpush2.bf16.msra.mxu1 %v4172_v23  ;;  %1438 = vmatprep.subr.bf16.mxu0 %v4180_v25  ;;  %v4263_v23 = vld [vmem:[%s6015_s1 + $0x120] ss:$16 sps:$4 sm:$0xff]   ;;  %v4271_v25 = vld [vmem:[%s6015_s1 + $0x104] ss:$16 sps:$4 sm:$0xff]  }
  0x61   :  { %1481 = vmatprep.subr.bf16.mxu1 %v4183_v27  ;;  %v4274_v27 = vld [vmem:[%s6015_s1 + $0xc] ss:$16 sps:$4 sm:$0xff]  }
  0x62   :  { %932 = vmatmul.mubr.bf16.vlgmr.msra.gmra.mxu0 %v4779_v62  ;;  %v4195_v62 = vld [vmem:[%s6015_s1 + $0x2a4] ss:$16 sps:$4 sm:$0xff]  }
  0x63   :  { %889 = vmatmul.mubr.bf16.vlgmr.msra.gmra.mxu1 %v4897_v54  ;;  %1439 = vmatpush1.bf16.msra.mxu0 %v4178_v28  ;;  %v4225_v54 = vld [vmem:[%s6015_s1 + $0x204] ss:$16 sps:$4 sm:$0xff]   ;;  %v4269_v28 = vld [vmem:[%s6015_s1 + $0x100] ss:$16 sps:$4 sm:$0xff]  }
  0x64   :  { %1482 = vmatpush1.bf16.msra.mxu1 %v4181_v29  ;;  %1440 = vmatprep.subr.bf16.mxu0 %v4186_v30  ;;  %v4613_v29 = vld [vmem:[%s6016_s0 + $0x14] sm:$0x1] }
  0x65   :  { %1483 = vmatprep.subr.bf16.mxu1 %v4189_v31  ;;  %1513 = vmatprep.mubr.bf16.mxu1 %v4617_v1  ;;  %v1631_v30 = vrot.slane %v4613_v29, 5  ;;  %v4614_v31 = vld [vmem:[%s6016_s0 + $0x2c] sm:$0x1] }
  0x66   :  { %1470 = vmatprep.mubr.bf16.mxu0 %v5011_v32 }
  0x67   :  { %1441 = vmatpush1.bf16.msra.mxu0 %v4184_v33  ;;  %v4272_v33 = vld [vmem:[%s6015_s1 + $0x8] ss:$16 sps:$4 sm:$0xff]  }
  0x68   :  { %1484 = vmatpush1.bf16.msra.mxu1 %v4187_v34  ;;  %1442 = vmatprep.subr.bf16.mxu0 %v4192_v15  ;;  %v4279_v34 = vld [vmem:[%s6015_s1 + $0x1ec] ss:$16 sps:$4 sm:$0xff]  }
  0x69   :  { %1485 = vmatprep.subr.bf16.mxu1 %v4195_v62  ;;  %v4282_v15 = vld [vmem:[%s6015_s1 + $0x2ec] ss:$16 sps:$4 sm:$0xff]   ;;  %v5208_v62 = vld [vmem:[%s6016_s0 + $0x8] sm:$0xe] }
  0x6b   :  { %1443 = vmatpush1.bf16.msra.mxu0 %v4190_v16  ;;  %v5213_v16 = vld [vmem:[%s6016_s0 + $0x20] sm:$0xe] }
  0x6c   :  { %1486 = vmatpush1.bf16.msra.mxu1 %v4193_v36  ;;  %1444 = vmatprep.subr.bf16.mxu0 %v4198_v37  ;;  %v3635_v37 = vrot.slane %v5208_v62, 9  ;;  %v4343_v36 = vld [vmem:[%s6015_s1 + $0x680] ss:$16 sps:$4 sm:$0xff]  }
  0x6d   :  { %1487 = vmatprep.subr.bf16.mxu1 %v4201_v38  ;;  %v3637_v38 = vrot.slane %v5213_v16, 9 }
  0x6f   :  { %1445 = vmatpush1.bf16.msra.mxu0 %v4196_v39  ;;  %v4277_v39 = vld [vmem:[%s6015_s1 + $0x1e8] ss:$16 sps:$4 sm:$0xff]  }
  0x70   :  { %1488 = vmatpush1.bf16.msra.mxu1 %v4199_v40  ;;  %1446 = vmatprep.subr.bf16.mxu0 %v4204_v41  ;;  %v1632_v40 = vsel %vm5216_vm5, %v3635_v37, %v1631_v30  ;;  %v4280_v41 = vld [vmem:[%s6015_s1 + $0x2e8] ss:$16 sps:$4 sm:$0xff]   ;;  %v4331_v30 = vld [vmem:[%s6015_s1 + $0x6c0] ss:$16 sps:$4 sm:$0xff]  }
  0x71   :  { %1489 = vmatprep.subr.bf16.mxu1 %v4207_v42  ;;  %v4346_v37 = vld [vmem:[%s6015_s1 + $0x880] ss:$16 sps:$4 sm:$0xff]  }
  0x73   :  { %1447 = vmatpush1.bf16.msra.mxu0 %v4202_v43  ;;  %v4285_v43 = vld [vmem:[%s6015_s1 + $0x1cc] ss:$16 sps:$4 sm:$0xff]  }
  0x74   :  { %1490 = vmatpush1.bf16.msra.mxu1 %v4205_v44  ;;  %1448 = vmatprep.subr.bf16.mxu0 %v4210_v45  ;;  %v4288_v44 = vld [vmem:[%s6015_s1 + $0x2cc] ss:$16 sps:$4 sm:$0xff]  }
  0x75   :  { %1491 = vmatprep.subr.bf16.mxu1 %v4213_v46  ;;  %v4283_v46 = vld [vmem:[%s6015_s1 + $0x1c8] ss:$16 sps:$4 sm:$0xff]  }
  0x77   :  { %1449 = vmatpush1.bf16.msra.mxu0 %v4208_v47  ;;  %v4286_v47 = vld [vmem:[%s6015_s1 + $0x2c8] ss:$16 sps:$4 sm:$0xff]  }
  0x78   :  { %1492 = vmatpush1.bf16.msra.mxu1 %v4211_v48  ;;  %1450 = vmatprep.subr.bf16.mxu0 %v4216_v49  ;;  %v4291_v48 = vld [vmem:[%s6015_s1 + $0x1ac] ss:$16 sps:$4 sm:$0xff]  }
  0x79   :  { %1493 = vmatprep.subr.bf16.mxu1 %v4219_v50  ;;  %v4294_v49 = vld [vmem:[%s6015_s1 + $0x2ac] ss:$16 sps:$4 sm:$0xff]   ;;  %v4289_v50 = vld [vmem:[%s6015_s1 + $0x1a8] ss:$16 sps:$4 sm:$0xff]  }
  0x7b   :  { %1451 = vmatpush1.bf16.msra.mxu0 %v4214_v51  ;;  %v4292_v51 = vld [vmem:[%s6015_s1 + $0x2a8] ss:$16 sps:$4 sm:$0xff]  }
  0x7c   :  { %1494 = vmatpush1.bf16.msra.mxu1 %v4217_v52  ;;  %1452 = vmatprep.subr.bf16.mxu0 %v4222_v53  ;;  %v4297_v52 = vld [vmem:[%s6015_s1 + $0x18c] ss:$16 sps:$4 sm:$0xff]  }
  0x7d   :  { %1495 = vmatprep.subr.bf16.mxu1 %v4225_v54  ;;  %v4300_v53 = vld [vmem:[%s6015_s1 + $0x28c] ss:$16 sps:$4 sm:$0xff]   ;;  %v4295_v54 = vld [vmem:[%s6015_s1 + $0x188] ss:$16 sps:$4 sm:$0xff]  }
  0x7f   :  { %1453 = vmatpush1.bf16.msra.mxu0 %v4220_v55  ;;  %v4298_v55 = vld [vmem:[%s6015_s1 + $0x288] ss:$16 sps:$4 sm:$0xff]  }
  0x80   :  { %1496 = vmatpush1.bf16.msra.mxu1 %v4223_v56  ;;  %1454 = vmatprep.subr.bf16.mxu0 %v4228_v57  ;;  %v4303_v56 = vld [vmem:[%s6015_s1 + $0x16c] ss:$16 sps:$4 sm:$0xff]  }
  0x81   :  { %1524 = vmatprep.subr.bf16.mxu1 %v4232_v58  ;;  %v4306_v57 = vld [vmem:[%s6015_s1 + $0x26c] ss:$16 sps:$4 sm:$0xff]   ;;  %v4301_v58 = vld [vmem:[%s6015_s1 + $0x168] ss:$16 sps:$4 sm:$0xff]  }
  0x83   :  { %1514 = vmatmul.mubr.bf16.vlgmr.msra.gmra.mxu1 %v4740_v35  ;;  %1455 = vmatpush2.bf16.msra.mxu0 %v4226_v59  ;;  %v4304_v59 = vld [vmem:[%s6015_s1 + $0x268] ss:$16 sps:$4 sm:$0xff]  }
  0x84   :  { %1525 = vmatpush1.bf16.msra.mxu1 %v4230_v60  ;;  %1456 = vmatprep.subr.bf16.mxu0 %v4235_v61  ;;  %v4309_v60 = vld [vmem:[%s6015_s1 + $0x14c] ss:$16 sps:$4 sm:$0xff]  }
  0x85   :  { %1526 = vmatprep.subr.bf16.mxu1 %v4238_v63  ;;  %1556 = vmatprep.mubr.bf16.mxu1 %v5011_v32  ;;  %v1639_v32 = vrot.slane %v4614_v31, 5  ;;  %v4312_v61 = vld [vmem:[%s6015_s1 + $0x24c] ss:$16 sps:$4 sm:$0xff]   ;;  %v4307_v63 = vld [vmem:[%s6015_s1 + $0x148] ss:$16 sps:$4 sm:$0xff]  }
  0x86   :  { %v4334_v31 = vld [vmem:[%s6015_s1 + $0x8c0] ss:$16 sps:$4 sm:$0xff]  }
  0x87   :  { %1457 = vmatpush2.bf16.msra.mxu0 %v4233_v0  ;;  %v1640_v42 = vsel %vm5216_vm5, %v3637_v38, %v1639_v32  ;;  %v4310_v0 = vld [vmem:[%s6015_s1 + $0x248] ss:$16 sps:$4 sm:$0xff]   ;;  %v4339_v32 = vld [vmem:[%s6015_s1 + $0x6a4] ss:$16 sps:$4 sm:$0xff]  }
  0x88   :  { %1527 = vmatpush1.bf16.msra.mxu1 %v4236_v2  ;;  %1458 = vmatprep.subr.bf16.mxu0 %v4241_v3  ;;  %v5238_v45 = vcombine.low %v1632_v40, %v1640_v42  ;;  %v4315_v2 = vld [vmem:[%s6015_s1 + $0x12c] ss:$16 sps:$4 sm:$0xff]   ;;  %v4351_v38 = vld [vmem:[%s6015_s1 + $0x664] ss:$16 sps:$4 sm:$0xff]   ;;  %v4349_v40 = vld [vmem:[%s6015_s1 + $0x660] ss:$16 sps:$4 sm:$0xff]  }
  0x89   :  { %1528 = vmatprep.subr.bf16.mxu1 %v4244_v4  ;;  %v4318_v3 = vld [vmem:[%s6015_s1 + $0x22c] ss:$16 sps:$4 sm:$0xff]   ;;  %v4313_v4 = vld [vmem:[%s6015_s1 + $0x128] ss:$16 sps:$4 sm:$0xff]   ;;  %v4357_v42 = vld [vmem:[%s6015_s1 + $0x644] ss:$16 sps:$4 sm:$0xff]  }
  0x8b   :  { %1459 = vmatpush2.bf16.msra.mxu0 %v4239_v5  ;;  %v4316_v5 = vld [vmem:[%s6015_s1 + $0x228] ss:$16 sps:$4 sm:$0xff]  }
  0x8c   :  { %1529 = vmatpush1.bf16.msra.mxu1 %v4242_v6  ;;  %1460 = vmatprep.subr.bf16.mxu0 %v4247_v7  ;;  %v4321_v6 = vld [vmem:[%s6015_s1 + $0x10c] ss:$16 sps:$4 sm:$0xff]   ;;  %v5314_v7 = vld [vmem:[%s6016_s0] sm:$0xee] }
  0x8d   :  { %1530 = vmatprep.subr.bf16.mxu1 %v4250_v8  ;;  %v5319_v8 = vld [vmem:[%s6016_s0 + $0x18] sm:$0xee] }
  0x8f   :  { %1461 = vmatpush2.bf16.msra.mxu0 %v4245_v9  ;;  %v4324_v9 = vld [vmem:[%s6015_s1 + $0x20c] ss:$16 sps:$4 sm:$0xff]  }
  0x90   :  { %1531 = vmatpush1.bf16.msra.mxu1 %v4248_v10  ;;  %1462 = vmatprep.subr.bf16.mxu0 %v4253_v11  ;;  %v4615_v10 = vld [vmem:[%s6016_s0 + $0xc] sm:$0x11] }
  0x91   :  { %1532 = vmatprep.subr.bf16.mxu1 %v4256_v12  ;;  %v1627_v11 = vrot.slane %v4615_v10, 5  ;;  %v4319_v12 = vld [vmem:[%s6015_s1 + $0x108] ss:$16 sps:$4 sm:$0xff]  }
  0x93   :  { %1463 = vmatpush2.bf16.msra.mxu0 %v4251_v13  ;;  %v3634_v13 = vrot.slane %v5314_v7, 9 }
  0x94   :  { %1533 = vmatpush1.bf16.msra.mxu1 %v4254_v14  ;;  %1464 = vmatprep.subr.bf16.mxu0 %v4259_v17  ;;  %v3636_v14 = vrot.slane %v5319_v8, 9  ;;  %v4616_v17 = vld [vmem:[%s6016_s0 + $0x24] sm:$0x11] }
  0x95   :  { %1534 = vmatprep.subr.bf16.mxu1 %v4262_v18  ;;  %v1635_v18 = vrot.slane %v4616_v17, 5 }
  0x97   :  { %1465 = vmatpush2.bf16.msra.mxu0 %v4257_v19  ;;  %v4322_v19 = vld [vmem:[%s6015_s1 + $0x208] ss:$16 sps:$4 sm:$0xff]  }
  0x98   :  { %1535 = vmatpush1.bf16.msra.mxu1 %v4260_v20  ;;  %1466 = vmatprep.subr.bf16.mxu0 %v4265_v21  ;;  %v4327_v20 = vld [vmem:[%s6015_s1 + $0x6e4] ss:$16 sps:$4 sm:$0xff]  }
  0x99   :  { %1536 = vmatprep.subr.bf16.mxu1 %v4268_v22  ;;  %v4330_v21 = vld [vmem:[%s6015_s1 + $0x8e4] ss:$16 sps:$4 sm:$0xff]   ;;  %v4325_v22 = vld [vmem:[%s6015_s1 + $0x6e0] ss:$16 sps:$4 sm:$0xff]  }
  0x9b   :  { %1467 = vmatpush2.bf16.msra.mxu0 %v4263_v23  ;;  %v5349_v23 = vsel %vm5216_vm5, %v3634_v13, %v1627_v11 }
  0x9c   :  { %1537 = vmatpush1.bf16.msra.mxu1 %v4266_v24  ;;  %1468 = vmatprep.subr.bf16.mxu0 %v4271_v25  ;;  %v5353_v24 = vsel %vm5216_vm5, %v3636_v14, %v1635_v18  ;;  %v4328_v25 = vld [vmem:[%s6015_s1 + $0x8e0] ss:$16 sps:$4 sm:$0xff]   ;;  %v4384_v14 = vld [vmem:[%s6015_s1 + $0x6cc] ss:$16 sps:$4 sm:$0xff]  }
  0x9d   :  { %1538 = vmatprep.subr.bf16.mxu1 %v4274_v27  ;;  %v4333_v27 = vld [vmem:[%s6015_s1 + $0x6c4] ss:$16 sps:$4 sm:$0xff]   ;;  %v5366_v29 = vcombine.high %v5349_v23, %v5353_v24 }
  0x9f   :  { %1469 = vmatpush2.bf16.msra.mxu0 %v4269_v28  ;;  %v4336_v28 = vld [vmem:[%s6015_s1 + $0x8c4] ss:$16 sps:$4 sm:$0xff]  }
  0xa0   :  { %1539 = vmatpush1.bf16.msra.mxu1 %v4272_v33  ;;  %1567 = vmatprep.subr.bf16.mxu0 %v4282_v15  ;;  %v4340_v33 = vld [vmem:[%s6015_s1 + $0x8a0] ss:$16 sps:$4 sm:$0xff]   ;;  %v4348_v15 = vld [vmem:[%s6015_s1 + $0x884] ss:$16 sps:$4 sm:$0xff]  }
  0xa1   :  { %1540 = vmatprep.subr.bf16.mxu1 %v4279_v34  ;;  %v4345_v34 = vld [vmem:[%s6015_s1 + $0x684] ss:$16 sps:$4 sm:$0xff]  }
  0xa2   :  { %1471 = vmatmul.mubr.bf16.vlgmr.msra.gmra.mxu0 %v4852_v26 }
  0xa3   :  { %1568 = vmatpush1.bf16.msra.mxu0 %v4280_v41  ;;  %1599 = vmatprep.mubr.bf16.mxu0 %v4617_v1  ;;  %v4352_v41 = vld [vmem:[%s6015_s1 + $0x860] ss:$16 sps:$4 sm:$0xff]  }
  0xa4   :  { %1541 = vmatpush2.bf16.msra.mxu1 %v4277_v39  ;;  %1569 = vmatprep.subr.bf16.mxu0 %v4288_v44  ;;  %v4354_v39 = vld [vmem:[%s6015_s1 + $0x864] ss:$16 sps:$4 sm:$0xff]   ;;  %v4355_v44 = vld [vmem:[%s6015_s1 + $0x640] ss:$16 sps:$4 sm:$0xff]  }
  0xa5   :  { %1542 = vmatprep.subr.bf16.mxu1 %v4285_v43  ;;  %v4360_v43 = vld [vmem:[%s6015_s1 + $0x844] ss:$16 sps:$4 sm:$0xff]  }
  0xa7   :  { %1570 = vmatpush1.bf16.msra.mxu0 %v4286_v47  ;;  %v4363_v47 = vld [vmem:[%s6015_s1 + $0x624] ss:$16 sps:$4 sm:$0xff]  }
  0xa8   :  { %1543 = vmatpush2.bf16.msra.mxu1 %v4283_v46  ;;  %1571 = vmatprep.subr.bf16.mxu0 %v4294_v49  ;;  %v4358_v46 = vld [vmem:[%s6015_s1 + $0x840] ss:$16 sps:$4 sm:$0xff]   ;;  %v2439_v49 = vshll.u32 %v5208_v62, 16 }
  0xa9   :  { %1544 = vmatprep.subr.bf16.mxu1 %v4291_v48  ;;  %v2436_v48 = vshrl.u32 %v5208_v62, 16  ;;  %v4369_v62 = vld [vmem:[%s6015_s1 + $0x604] ss:$16 sps:$4 sm:$0xff]  }
  0xab   :  { %1572 = vmatpush1.bf16.msra.mxu0 %v4292_v51  ;;  %v2475_v51 = vshll.u32 %v5213_v16, 16 }
  0xac   :  { %1545 = vmatpush2.bf16.msra.mxu1 %v4289_v50  ;;  %1573 = vmatprep.subr.bf16.mxu0 %v4300_v53  ;;  %v2472_v50 = vshrl.u32 %v5213_v16, 16  ;;  %v4361_v53 = vld [vmem:[%s6015_s1 + $0x620] ss:$16 sps:$4 sm:$0xff]   ;;  %v2438_v16 = vrot.slane %v2436_v48, 5 }
  0xad   :  { %1546 = vmatprep.subr.bf16.mxu1 %v4297_v52  ;;  %v4366_v52 = vld [vmem:[%s6015_s1 + $0x824] ss:$16 sps:$4 sm:$0xff]  }
  0xaf   :  { %1574 = vmatpush1.bf16.msra.mxu0 %v4298_v55  ;;  %v2441_v55 = vrot.slane %v2439_v49, 6 }
  0xb0   :  { %1547 = vmatpush2.bf16.msra.mxu1 %v4295_v54  ;;  %1575 = vmatprep.subr.bf16.mxu0 %v4306_v57  ;;  %v4364_v54 = vld [vmem:[%s6015_s1 + $0x820] ss:$16 sps:$4 sm:$0xff]   ;;  %v2477_v57 = vrot.slane %v2475_v51, 6  ;;  %v4405_v51 = vld [vmem:[%s6015_s1 + $0x744] ss:$16 sps:$4 sm:$0xff]  }
  0xb1   :  { %1548 = vmatprep.subr.bf16.mxu1 %v4303_v56  ;;  %v2474_v56 = vrot.slane %v2472_v50, 5  ;;  %v4400_v50 = vld [vmem:[%s6015_s1 + $0x668] ss:$16 sps:$4 sm:$0xff]  }
  0xb3   :  { %1576 = vmatpush1.bf16.msra.mxu0 %v4304_v59  ;;  %v4367_v59 = vld [vmem:[%s6015_s1 + $0x600] ss:$16 sps:$4 sm:$0xff]  }
  0xb4   :  { %1549 = vmatpush2.bf16.msra.mxu1 %v4301_v58  ;;  %1577 = vmatprep.subr.bf16.mxu0 %v4312_v61  ;;  %v4372_v58 = vld [vmem:[%s6015_s1 + $0x804] ss:$16 sps:$4 sm:$0xff]  }
  0xb5   :  { %1550 = vmatprep.subr.bf16.mxu1 %v4309_v60  ;;  %v4370_v60 = vld [vmem:[%s6015_s1 + $0x800] ss:$16 sps:$4 sm:$0xff]   ;;  %v4375_v61 = vld [vmem:[%s6015_s1 + $0x7e4] ss:$16 sps:$4 sm:$0xff]  }
  0xb7   :  { %1578 = vmatpush1.bf16.msra.mxu0 %v4310_v0  ;;  %v2478_v0 = vor.u32 %v2477_v57, %v2474_v56  ;;  %v2412_v56 = vld [vmem:[%s6016_s0 + $0x24] sm:$0x33] }
  0xb8   :  { %1551 = vmatpush2.bf16.msra.mxu1 %v4307_v63  ;;  %1579 = vmatprep.subr.bf16.mxu0 %v4318_v3  ;;  %v2442_v63 = vor.u32 %v2441_v55, %v2438_v16  ;;  %v4373_v3 = vld [vmem:[%s6015_s1 + $0x7e0] ss:$16 sps:$4 sm:$0xff]  }
  0xb9   :  { %1552 = vmatprep.subr.bf16.mxu1 %v4315_v2  ;;  %v4378_v2 = vld [vmem:[%s6015_s1 + $0x6ec] ss:$16 sps:$4 sm:$0xff]   ;;  %v2479_v18 = vrot.slane %v2478_v0, 4 }
  0xba   :  { %v2443_v17 = vrot.slane %v2442_v63, 4  ;;  %v2410_v16 = vld [vmem:[%s6016_s0 + $0xc] sm:$0x33]  ;;  %v2466_v63 = vshll.u32 %v2412_v56, 16 }
  0xbb   :  { %1580 = vmatpush1.bf16.msra.mxu0 %v4316_v5  ;;  %v2411_v5 = vld [vmem:[%s6016_s0 + $0x14] sm:$0x3]  ;;  %v2427_v57 = vshrl.u32 %v2410_v16, 16 }
  0xbc   :  { %1553 = vmatpush2.bf16.msra.mxu1 %v4313_v4  ;;  %1581 = vmatprep.subr.bf16.mxu0 %v4324_v9  ;;  %v4376_v4 = vld [vmem:[%s6015_s1 + $0x6e8] ss:$16 sps:$4 sm:$0xff]   ;;  %v4381_v9 = vld [vmem:[%s6015_s1 + $0x7c4] ss:$16 sps:$4 sm:$0xff]   ;;  %v2445_v10 = vshrl.u32 %v2411_v5, 16  ;;  %v2448_v11 = vshll.u32 %v2411_v5, 16 }
  0xbd   :  { %1554 = vmatprep.subr.bf16.mxu1 %v4321_v6  ;;  %v2413_v6 = vld [vmem:[%s6016_s0 + $0x2c] sm:$0x3] }
  0xbe   :  { %v2484_v13 = vshll.u32 %v2413_v6, 16 }
  0xbf   :  { %1582 = vmatpush1.bf16.msra.mxu0 %v4322_v19  ;;  %v2447_v19 = vrot.slane %v2445_v10, 5  ;;  %v4412_v10 = vld [vmem:[%s6015_s1 + $0x628] ss:$16 sps:$4 sm:$0xff]  }
  0xc0   :  { %1555 = vmatpush2.bf16.msra.mxu1 %v4319_v12  ;;  %2230 = vmatprep.subr.bf16.mxu0 %v4327_v20  ;;  %v2481_v12 = vshrl.u32 %v2413_v6, 16  ;;  %v2450_v20 = vrot.slane %v2448_v11, 6  ;;  %v2468_v6 = vrot.slane %v2466_v63, 6  ;;  %v4481_v63 = vld [vmem:[%s6015_s1 + $0x9a0] ss:$16 sps:$4 sm:$0xff]  }
  0xc1   :  { %2273 = vmatprep.subr.bf16.mxu1 %v4330_v21 }
  0xc2   :  { %1600 = vmatmul.mubr.bf16.vlgmr.msra.gmra.mxu0 %v4740_v35  ;;  %v4342_v35 = vld [vmem:[%s6015_s1 + $0x8a4] ss:$16 sps:$4 sm:$0xff]   ;;  %v2483_v21 = vrot.slane %v2481_v12, 5 }
  0xc3   :  { %1557 = vmatmul.mubr.bf16.vlgmr.msra.gmra.mxu1 %v4852_v26  ;;  %2231 = vmatpush1.bf16.msra.mxu0 %v4325_v22  ;;  %v4337_v26 = vld [vmem:[%s6015_s1 + $0x6a0] ss:$16 sps:$4 sm:$0xff]   ;;  %v2486_v22 = vrot.slane %v2484_v13, 6  ;;  %v4417_v12 = vld [vmem:[%s6015_s1 + $0x704] ss:$16 sps:$4 sm:$0xff]  }
  0xc4   :  { %2274 = vmatpush1.bf16.msra.mxu1 %v4328_v25  ;;  %2232 = vmatprep.subr.bf16.mxu0 %v4333_v27  ;;  %v4379_v27 = vld [vmem:[%s6015_s1 + $0x7c0] ss:$16 sps:$4 sm:$0xff]   ;;  %v4420_v13 = vld [vmem:[%s6015_s1 + $0x60c] ss:$16 sps:$4 sm:$0xff]  }
  0xc5   :  { %2275 = vmatprep.subr.bf16.mxu1 %v4336_v28  ;;  %2305 = vmatprep.mubr.bf16.mxu1 %v4617_v1  ;;  %v2451_v28 = vor.u32 %v2450_v20, %v2447_v19  ;;  %v4415_v19 = vld [vmem:[%s6015_s1 + $0x700] ss:$16 sps:$4 sm:$0xff]   ;;  %v4418_v20 = vld [vmem:[%s6015_s1 + $0x608] ss:$16 sps:$4 sm:$0xff]   ;;  %v4423_v25 = vld [vmem:[%s6015_s1 + $0x7ec] ss:$16 sps:$4 sm:$0xff]  }
  0xc6   :  { %2262 = vmatprep.mubr.bf16.mxu0 %v5366_v29 }
  0xc7   :  { %2233 = vmatpush1.bf16.msra.mxu0 %v4331_v30  ;;  %v2487_v30 = vor.u32 %v2486_v22, %v2483_v21 }
  0xc8   :  { %2276 = vmatpush1.bf16.msra.mxu1 %v4334_v31  ;;  %2234 = vmatprep.subr.bf16.mxu0 %v4339_v32  ;;  %v4382_v31 = vld [vmem:[%s6015_s1 + $0x6c8] ss:$16 sps:$4 sm:$0xff]   ;;  %v4387_v32 = vld [vmem:[%s6015_s1 + $0x7a4] ss:$16 sps:$4 sm:$0xff]  }
  0xc9   :  { %2277 = vmatprep.subr.bf16.mxu1 %v4342_v35  ;;  %v4390_v35 = vld [vmem:[%s6015_s1 + $0x6ac] ss:$16 sps:$4 sm:$0xff]  }
  0xcb   :  { %2235 = vmatpush1.bf16.msra.mxu0 %v4337_v26  ;;  %v2452_v26 = vsel %vm5480_vm8, %v2443_v17, %v2451_v28  ;;  %v5596_v28 = vcombine.low %v5349_v23, %v5353_v24  ;;  %v4432_v23 = vld [vmem:[%s6015_s1 + $0x8cc] ss:$16 sps:$4 sm:$0xff]   ;;  %v4427_v24 = vld [vmem:[%s6015_s1 + $0x7c8] ss:$16 sps:$4 sm:$0xff]  }
  0xcc   :  { %2278 = vmatpush1.bf16.msra.mxu1 %v4340_v33  ;;  %2236 = vmatprep.subr.bf16.mxu0 %v4345_v34  ;;  %v2488_v33 = vsel %vm5480_vm8, %v2479_v18, %v2487_v30  ;;  %v4421_v30 = vld [vmem:[%s6015_s1 + $0x7e8] ss:$16 sps:$4 sm:$0xff]  }
  0xcd   :  { %2279 = vmatprep.subr.bf16.mxu1 %v4348_v15  ;;  %v5502_v34 = vcombine.low %v2452_v26, %v2488_v33  ;;  %v4385_v15 = vld [vmem:[%s6015_s1 + $0x7a0] ss:$16 sps:$4 sm:$0xff]   ;;  %v4435_v26 = vld [vmem:[%s6015_s1 + $0x7ac] ss:$16 sps:$4 sm:$0xff]  }
  0xce   :  { %v4438_v33 = vld [vmem:[%s6015_s1 + $0x8ac] ss:$16 sps:$4 sm:$0xff]  }
  0xcf   :  { %2237 = vmatpush1.bf16.msra.mxu0 %v4343_v36  ;;  %v4388_v36 = vld [vmem:[%s6015_s1 + $0x6a8] ss:$16 sps:$4 sm:$0xff]  }
  0xd0   :  { %2280 = vmatpush1.bf16.msra.mxu1 %v4346_v37  ;;  %2238 = vmatprep.subr.bf16.mxu0 %v4351_v38  ;;  %v4393_v37 = vld [vmem:[%s6015_s1 + $0x784] ss:$16 sps:$4 sm:$0xff]   ;;  %v2418_v38 = vshrl.u32 %v5314_v7, 16 }
  0xd1   :  { %2281 = vmatprep.subr.bf16.mxu1 %v4354_v39  ;;  %v2421_v39 = vshll.u32 %v5314_v7, 16  ;;  %v4402_v7 = vld [vmem:[%s6015_s1 + $0x66c] ss:$16 sps:$4 sm:$0xff]  }
  0xd3   :  { %2239 = vmatpush1.bf16.msra.mxu0 %v4349_v40  ;;  %v4391_v40 = vld [vmem:[%s6015_s1 + $0x780] ss:$16 sps:$4 sm:$0xff]  }
  0xd4   :  { %2282 = vmatpush1.bf16.msra.mxu1 %v4352_v41  ;;  %2240 = vmatprep.subr.bf16.mxu0 %v4357_v42  ;;  %v2454_v41 = vshrl.u32 %v5319_v8, 16  ;;  %v2457_v42 = vshll.u32 %v5319_v8, 16  ;;  %v4397_v8 = vld [vmem:[%s6015_s1 + $0x760] ss:$16 sps:$4 sm:$0xff]  }
  0xd5   :  { %2283 = vmatprep.subr.bf16.mxu1 %v4360_v43  ;;  %v4394_v43 = vld [vmem:[%s6015_s1 + $0x688] ss:$16 sps:$4 sm:$0xff]  }
  0xd6   :  { %v2456_v48 = vrot.slane %v2454_v41, 5  ;;  %v2459_v49 = vrot.slane %v2457_v42, 6  ;;  %v4450_v41 = vld [vmem:[%s6015_s1 + $0x86c] ss:$16 sps:$4 sm:$0xff]   ;;  %v4445_v42 = vld [vmem:[%s6015_s1 + $0x768] ss:$16 sps:$4 sm:$0xff]  }
  0xd7   :  { %2241 = vmatpush1.bf16.msra.mxu0 %v4355_v44  ;;  %v4399_v44 = vld [vmem:[%s6015_s1 + $0x764] ss:$16 sps:$4 sm:$0xff]  }
  0xd8   :  { %2284 = vmatpush1.bf16.msra.mxu1 %v4358_v46  ;;  %2242 = vmatprep.subr.bf16.mxu0 %v4363_v47  ;;  %v2420_v46 = vrot.slane %v2418_v38, 5  ;;  %v2423_v47 = vrot.slane %v2421_v39, 6  ;;  %v2460_v55 = vor.u32 %v2459_v49, %v2456_v48  ;;  %v4439_v38 = vld [vmem:[%s6015_s1 + $0x788] ss:$16 sps:$4 sm:$0xff]   ;;  %v4462_v48 = vld [vmem:[%s6015_s1 + $0x82c] ss:$16 sps:$4 sm:$0xff]  }
  0xd9   :  { %2285 = vmatprep.subr.bf16.mxu1 %v4366_v52  ;;  %v4408_v52 = vld [vmem:[%s6015_s1 + $0x64c] ss:$16 sps:$4 sm:$0xff]   ;;  %v4442_v39 = vld [vmem:[%s6015_s1 + $0x888] ss:$16 sps:$4 sm:$0xff]  }
  0xda   :  { %v4457_v49 = vld [vmem:[%s6015_s1 + $0x728] ss:$16 sps:$4 sm:$0xff]  }
  0xdb   :  { %2243 = vmatpush1.bf16.msra.mxu0 %v4361_v53  ;;  %v2424_v53 = vor.u32 %v2423_v47, %v2420_v46  ;;  %v4451_v46 = vld [vmem:[%s6015_s1 + $0x748] ss:$16 sps:$4 sm:$0xff]  }
  0xdc   :  { %2286 = vmatpush1.bf16.msra.mxu1 %v4364_v54  ;;  %2244 = vmatprep.subr.bf16.mxu0 %v4369_v62  ;;  %v4403_v54 = vld [vmem:[%s6015_s1 + $0x740] ss:$16 sps:$4 sm:$0xff]   ;;  %v4406_v62 = vld [vmem:[%s6015_s1 + $0x648] ss:$16 sps:$4 sm:$0xff]  }
  0xdd   :  { %2287 = vmatprep.subr.bf16.mxu1 %v4372_v58  ;;  %v2430_v58 = vshll.u32 %v2410_v16, 16  ;;  %v2425_v0 = vrot.slane %v2424_v53, 4  ;;  %v4454_v47 = vld [vmem:[%s6015_s1 + $0x848] ss:$16 sps:$4 sm:$0xff]   ;;  %v4474_v16 = vld [vmem:[%s6015_s1 + $0xbe4] ss:$16 sps:$4 sm:$0xff]  }
  0xde   :  { %v4463_v53 = vld [vmem:[%s6015_s1 + $0x708] ss:$16 sps:$4 sm:$0xff]  }
  0xdf   :  { %2245 = vmatpush1.bf16.msra.mxu0 %v4367_v59  ;;  %v4411_v59 = vld [vmem:[%s6015_s1 + $0x724] ss:$16 sps:$4 sm:$0xff]  }
  0xe0   :  { %2288 = vmatpush1.bf16.msra.mxu1 %v4370_v60  ;;  %2246 = vmatprep.subr.bf16.mxu0 %v4375_v61  ;;  %v4414_v60 = vld [vmem:[%s6015_s1 + $0x62c] ss:$16 sps:$4 sm:$0xff]   ;;  %v2463_v61 = vshrl.u32 %v2412_v56, 16  ;;  %v4472_v56 = vld [vmem:[%s6015_s1 + $0xbe0] ss:$16 sps:$4 sm:$0xff]  }
  0xe1   :  { %2316 = vmatprep.subr.bf16.mxu1 %v4378_v2  ;;  %v2429_v2 = vrot.slane %v2427_v57, 5  ;;  %v4477_v57 = vld [vmem:[%s6015_s1 + $0x9c4] ss:$16 sps:$4 sm:$0xff]  }
  0xe2   :  { %v2465_v5 = vrot.slane %v2463_v61, 5  ;;  %v4483_v61 = vld [vmem:[%s6015_s1 + $0x9a4] ss:$16 sps:$4 sm:$0xff]  }
  0xe3   :  { %2306 = vmatmul.mubr.bf16.vlgmr.msra.gmra.mxu1 %v5238_v45  ;;  %2247 = vmatpush2.bf16.msra.mxu0 %v4373_v3  ;;  %v2432_v3 = vrot.slane %v2430_v58, 6  ;;  %v4480_v58 = vld [vmem:[%s6015_s1 + $0xbc4] ss:$16 sps:$4 sm:$0xff]  }
  0xe4   :  { %2317 = vmatpush1.bf16.msra.mxu1 %v4376_v4  ;;  %2248 = vmatprep.subr.bf16.mxu0 %v4381_v9  ;;  %v2461_v4 = vrot.slane %v2460_v55, 4  ;;  %v4409_v9 = vld [vmem:[%s6015_s1 + $0x720] ss:$16 sps:$4 sm:$0xff]  }
  0xe5   :  { %2318 = vmatprep.subr.bf16.mxu1 %v4384_v14  ;;  %2348 = vmatprep.mubr.bf16.mxu1 %v5366_v29  ;;  %v4396_v29 = vld [vmem:[%s6015_s1 + $0x68c] ss:$16 sps:$4 sm:$0xff]   ;;  %v2433_v11 = vor.u32 %v2432_v3, %v2429_v2  ;;  %v2469_v14 = vor.u32 %v2468_v6, %v2465_v5  ;;  %v4469_v55 = vld [vmem:[%s6015_s1 + $0x9e0] ss:$16 sps:$4 sm:$0xff]   ;;  %v4489_v2 = vld [vmem:[%s6015_s1 + $0x984] ss:$16 sps:$4 sm:$0xff]  }
  0xe6   :  { %v4492_v3 = vld [vmem:[%s6015_s1 + $0xb84] ss:$16 sps:$4 sm:$0xff]   ;;  %v4490_v5 = vld [vmem:[%s6015_s1 + $0xb80] ss:$16 sps:$4 sm:$0xff]  }
  0xe7   :  { %2249 = vmatpush2.bf16.msra.mxu0 %v4379_v27  ;;  %v2434_v17 = vsel %vm5480_vm8, %v2425_v0, %v2433_v11  ;;  %v2470_v18 = vsel %vm5480_vm8, %v2461_v4, %v2469_v14  ;;  %v4426_v27 = vld [vmem:[%s6015_s1 + $0x8ec] ss:$16 sps:$4 sm:$0xff]   ;;  %v4484_v0 = vld [vmem:[%s6015_s1 + $0xba0] ss:$16 sps:$4 sm:$0xff]   ;;  %v4495_v6 = vld [vmem:[%s6015_s1 + $0x964] ss:$16 sps:$4 sm:$0xff]  }
  0xe8   :  { %2319 = vmatpush1.bf16.msra.mxu1 %v4382_v31  ;;  %2250 = vmatprep.subr.bf16.mxu0 %v4387_v32  ;;  %v5584_v21 = vcombine.low %v2434_v17, %v2470_v18  ;;  %v5586_v22 = vcombine.high %v2434_v17, %v2470_v18  ;;  %v4424_v31 = vld [vmem:[%s6015_s1 + $0x8e8] ss:$16 sps:$4 sm:$0xff]   ;;  %v4429_v32 = vld [vmem:[%s6015_s1 + $0x7cc] ss:$16 sps:$4 sm:$0xff]   ;;  %v4487_v4 = vld [vmem:[%s6015_s1 + $0x980] ss:$16 sps:$4 sm:$0xff]  }
  0xe9   :  { %2320 = vmatprep.subr.bf16.mxu1 %v4390_v35  ;;  %v4430_v35 = vld [vmem:[%s6015_s1 + $0x8c8] ss:$16 sps:$4 sm:$0xff]   ;;  %v4496_v11 = vld [vmem:[%s6015_s1 + $0xb60] ss:$16 sps:$4 sm:$0xff]   ;;  %v4507_v18 = vld [vmem:[%s6015_s1 + $0x924] ss:$16 sps:$4 sm:$0xff]  }
  0xea   :  { %v4499_v14 = vld [vmem:[%s6015_s1 + $0x940] ss:$16 sps:$4 sm:$0xff]  }
  0xeb   :  { %2251 = vmatpush2.bf16.msra.mxu0 %v4385_v15  ;;  %v4433_v15 = vld [vmem:[%s6015_s1 + $0x7a8] ss:$16 sps:$4 sm:$0xff]   ;;  %v4502_v17 = vld [vmem:[%s6015_s1 + $0xb40] ss:$16 sps:$4 sm:$0xff]  }
  0xec   :  { %2321 = vmatpush1.bf16.msra.mxu1 %v4388_v36  ;;  %2252 = vmatprep.subr.bf16.mxu0 %v4393_v37  ;;  %v4436_v36 = vld [vmem:[%s6015_s1 + $0x8a8] ss:$16 sps:$4 sm:$0xff]   ;;  %v4441_v37 = vld [vmem:[%s6015_s1 + $0x78c] ss:$16 sps:$4 sm:$0xff]  }
  0xed   :  { %2322 = vmatprep.subr.bf16.mxu1 %v4396_v29  ;;  %v4444_v29 = vld [vmem:[%s6015_s1 + $0x88c] ss:$16 sps:$4 sm:$0xff]  }
  0xef   :  { %2253 = vmatpush2.bf16.msra.mxu0 %v4391_v40  ;;  %v4447_v40 = vld [vmem:[%s6015_s1 + $0x76c] ss:$16 sps:$4 sm:$0xff]  }
  0xf0   :  { %2323 = vmatpush1.bf16.msra.mxu1 %v4394_v43  ;;  %2254 = vmatprep.subr.bf16.mxu0 %v4399_v44  ;;  %v4448_v43 = vld [vmem:[%s6015_s1 + $0x868] ss:$16 sps:$4 sm:$0xff]   ;;  %v4453_v44 = vld [vmem:[%s6015_s1 + $0x74c] ss:$16 sps:$4 sm:$0xff]  }
  0xf1   :  { %2324 = vmatprep.subr.bf16.mxu1 %v4402_v7  ;;  %v4456_v7 = vld [vmem:[%s6015_s1 + $0x84c] ss:$16 sps:$4 sm:$0xff]  }
  0xf3   :  { %2255 = vmatpush2.bf16.msra.mxu0 %v4397_v8  ;;  %v4459_v8 = vld [vmem:[%s6015_s1 + $0x72c] ss:$16 sps:$4 sm:$0xff]  }
  0xf4   :  { %2325 = vmatpush1.bf16.msra.mxu1 %v4400_v50  ;;  %2256 = vmatprep.subr.bf16.mxu0 %v4405_v51  ;;  %v4460_v50 = vld [vmem:[%s6015_s1 + $0x828] ss:$16 sps:$4 sm:$0xff]   ;;  %v4465_v51 = vld [vmem:[%s6015_s1 + $0x70c] ss:$16 sps:$4 sm:$0xff]  }
  0xf5   :  { %2326 = vmatprep.subr.bf16.mxu1 %v4408_v52  ;;  %v4468_v52 = vld [vmem:[%s6015_s1 + $0x80c] ss:$16 sps:$4 sm:$0xff]  }
  0xf7   :  { %2257 = vmatpush2.bf16.msra.mxu0 %v4403_v54  ;;  %v4466_v54 = vld [vmem:[%s6015_s1 + $0x808] ss:$16 sps:$4 sm:$0xff]  }
  0xf8   :  { %2327 = vmatpush1.bf16.msra.mxu1 %v4406_v62  ;;  %2258 = vmatprep.subr.bf16.mxu0 %v4411_v59  ;;  %v4471_v62 = vld [vmem:[%s6015_s1 + $0x9e4] ss:$16 sps:$4 sm:$0xff]   ;;  %v4475_v59 = vld [vmem:[%s6015_s1 + $0x9c0] ss:$16 sps:$4 sm:$0xff]  }
  0xf9   :  { %2328 = vmatprep.subr.bf16.mxu1 %v4414_v60  ;;  %v4478_v60 = vld [vmem:[%s6015_s1 + $0xbc0] ss:$16 sps:$4 sm:$0xff]  }
  0xfb   :  { %2259 = vmatpush2.bf16.msra.mxu0 %v4409_v9  ;;  %v4498_v9 = vld [vmem:[%s6015_s1 + $0xb64] ss:$16 sps:$4 sm:$0xff]  }
  0xfc   :  { %2329 = vmatpush1.bf16.msra.mxu1 %v4412_v10  ;;  %2260 = vmatprep.subr.bf16.mxu0 %v4417_v12  ;;  %v4493_v10 = vld [vmem:[%s6015_s1 + $0x960] ss:$16 sps:$4 sm:$0xff]   ;;  %v4501_v12 = vld [vmem:[%s6015_s1 + $0x944] ss:$16 sps:$4 sm:$0xff]  }
  0xfd   :  { %2330 = vmatprep.subr.bf16.mxu1 %v4420_v13  ;;  %v4504_v13 = vld [vmem:[%s6015_s1 + $0xb44] ss:$16 sps:$4 sm:$0xff]  }
  0xff   :  { %2261 = vmatpush2.bf16.msra.mxu0 %v4415_v19  ;;  %v4510_v19 = vld [vmem:[%s6015_s1 + $0xb24] ss:$16 sps:$4 sm:$0xff]  }
 0x100   :  { %2331 = vmatpush1.bf16.msra.mxu1 %v4418_v20  ;;  %2359 = vmatprep.subr.bf16.mxu0 %v4426_v27  ;;  %v4505_v20 = vld [vmem:[%s6015_s1 + $0x920] ss:$16 sps:$4 sm:$0xff]   ;;  %v4513_v27 = vld [vmem:[%s6015_s1 + $0x904] ss:$16 sps:$4 sm:$0xff]  }
 0x101   :  { %2332 = vmatprep.subr.bf16.mxu1 %v4423_v25  ;;  %v4508_v25 = vld [vmem:[%s6015_s1 + $0xb20] ss:$16 sps:$4 sm:$0xff]  }
 0x102   :  { %2263 = vmatmul.mubr.bf16.vlgmr.msra.gmra.mxu0 %v5596_v28 }
 0x103   :  { %2360 = vmatpush1.bf16.msra.mxu0 %v4424_v31  ;;  %2391 = vmatprep.mubr.bf16.mxu0 %v4617_v1  ;;  %v4514_v31 = vld [vmem:[%s6015_s1 + $0xb00] ss:$16 sps:$4 sm:$0xff]  }
 0x104   :  { %2333 = vmatpush2.bf16.msra.mxu1 %v4421_v30  ;;  %2361 = vmatprep.subr.bf16.mxu0 %v4432_v23  ;;  %v4511_v30 = vld [vmem:[%s6015_s1 + $0x900] ss:$16 sps:$4 sm:$0xff]   ;;  %v4522_v23 = vld [vmem:[%s6015_s1 + $0x9ec] ss:$16 sps:$4 sm:$0xff]  }
 0x105   :  { %2334 = vmatprep.subr.bf16.mxu1 %v4429_v32  ;;  %v4519_v32 = vld [vmem:[%s6015_s1 + $0xae4] ss:$16 sps:$4 sm:$0xff]  }
 0x107   :  { %2362 = vmatpush1.bf16.msra.mxu0 %v4430_v35  ;;  %v4520_v35 = vld [vmem:[%s6015_s1 + $0x9e8] ss:$16 sps:$4 sm:$0xff]  }
 0x108   :  { %2335 = vmatpush2.bf16.msra.mxu1 %v4427_v24  ;;  %2363 = vmatprep.subr.bf16.mxu0 %v4438_v33  ;;  %v4517_v24 = vld [vmem:[%s6015_s1 + $0xae0] ss:$16 sps:$4 sm:$0xff]   ;;  %v4528_v33 = vld [vmem:[%s6015_s1 + $0x9cc] ss:$16 sps:$4 sm:$0xff]  }
 0x109   :  { %2336 = vmatprep.subr.bf16.mxu1 %v4435_v26  ;;  %v4525_v26 = vld [vmem:[%s6015_s1 + $0xac4] ss:$16 sps:$4 sm:$0xff]  }
 0x10b   :  { %2364 = vmatpush1.bf16.msra.mxu0 %v4436_v36  ;;  %v4526_v36 = vld [vmem:[%s6015_s1 + $0x9c8] ss:$16 sps:$4 sm:$0xff]  }
 0x10c   :  { %2337 = vmatpush2.bf16.msra.mxu1 %v4433_v15  ;;  %2365 = vmatprep.subr.bf16.mxu0 %v4444_v29  ;;  %v4523_v15 = vld [vmem:[%s6015_s1 + $0xac0] ss:$16 sps:$4 sm:$0xff]   ;;  %v4534_v29 = vld [vmem:[%s6015_s1 + $0x9ac] ss:$16 sps:$4 sm:$0xff]  }
 0x10d   :  { %2338 = vmatprep.subr.bf16.mxu1 %v4441_v37  ;;  %v4531_v37 = vld [vmem:[%s6015_s1 + $0xaa4] ss:$16 sps:$4 sm:$0xff]  }
 0x10f   :  { %2366 = vmatpush1.bf16.msra.mxu0 %v4442_v39  ;;  %v4532_v39 = vld [vmem:[%s6015_s1 + $0x9a8] ss:$16 sps:$4 sm:$0xff]  }
 0x110   :  { %2339 = vmatpush2.bf16.msra.mxu1 %v4439_v38  ;;  %2367 = vmatprep.subr.bf16.mxu0 %v4450_v41  ;;  %v4529_v38 = vld [vmem:[%s6015_s1 + $0xaa0] ss:$16 sps:$4 sm:$0xff]  }
 0x111   :  { %2340 = vmatprep.subr.bf16.mxu1 %v4447_v40  ;;  %v4537_v40 = vld [vmem:[%s6015_s1 + $0xa84] ss:$16 sps:$4 sm:$0xff]   ;;  %v4535_v41 = vld [vmem:[%s6015_s1 + $0xa80] ss:$16 sps:$4 sm:$0xff]  }
 0x113   :  { %2368 = vmatpush1.bf16.msra.mxu0 %v4448_v43  ;;  %v4543_v43 = vld [vmem:[%s6015_s1 + $0xa64] ss:$16 sps:$4 sm:$0xff]  }
 0x114   :  { %2341 = vmatpush2.bf16.msra.mxu1 %v4445_v42  ;;  %2369 = vmatprep.subr.bf16.mxu0 %v4456_v7  ;;  %v4538_v42 = vld [vmem:[%s6015_s1 + $0x988] ss:$16 sps:$4 sm:$0xff]   ;;  %v4541_v7 = vld [vmem:[%s6015_s1 + $0xa60] ss:$16 sps:$4 sm:$0xff]  }
 0x115   :  { %2342 = vmatprep.subr.bf16.mxu1 %v4453_v44  ;;  %v4546_v44 = vld [vmem:[%s6015_s1 + $0x96c] ss:$16 sps:$4 sm:$0xff]  }
 0x117   :  { %2370 = vmatpush1.bf16.msra.mxu0 %v4454_v47  ;;  %v4549_v47 = vld [vmem:[%s6015_s1 + $0xa44] ss:$16 sps:$4 sm:$0xff]  }
 0x118   :  { %2343 = vmatpush2.bf16.msra.mxu1 %v4451_v46  ;;  %2371 = vmatprep.subr.bf16.mxu0 %v4462_v48  ;;  %v4544_v46 = vld [vmem:[%s6015_s1 + $0x968] ss:$16 sps:$4 sm:$0xff]   ;;  %v4547_v48 = vld [vmem:[%s6015_s1 + $0xa40] ss:$16 sps:$4 sm:$0xff]  }
 0x119   :  { %2344 = vmatprep.subr.bf16.mxu1 %v4459_v8  ;;  %v4552_v8 = vld [vmem:[%s6015_s1 + $0x94c] ss:$16 sps:$4 sm:$0xff]  }
 0x11b   :  { %2372 = vmatpush1.bf16.msra.mxu0 %v4460_v50  ;;  %v4555_v50 = vld [vmem:[%s6015_s1 + $0xa24] ss:$16 sps:$4 sm:$0xff]  }
 0x11c   :  { %2345 = vmatpush2.bf16.msra.mxu1 %v4457_v49  ;;  %2373 = vmatprep.subr.bf16.mxu0 %v4468_v52  ;;  %v4550_v49 = vld [vmem:[%s6015_s1 + $0x948] ss:$16 sps:$4 sm:$0xff]   ;;  %v4553_v52 = vld [vmem:[%s6015_s1 + $0xa20] ss:$16 sps:$4 sm:$0xff]  }
 0x11d   :  { %2346 = vmatprep.subr.bf16.mxu1 %v4465_v51  ;;  %v4558_v51 = vld [vmem:[%s6015_s1 + $0x92c] ss:$16 sps:$4 sm:$0xff]  }
 0x11f   :  { %2374 = vmatpush1.bf16.msra.mxu0 %v4466_v54  ;;  %v4561_v54 = vld [vmem:[%s6015_s1 + $0xa04] ss:$16 sps:$4 sm:$0xff]  }
 0x120   :  { %2347 = vmatpush2.bf16.msra.mxu1 %v4463_v53  ;;  %3078 = vmatprep.subr.bf16.mxu0 %v4471_v62  ;;  %v4556_v53 = vld [vmem:[%s6015_s1 + $0x928] ss:$16 sps:$4 sm:$0xff]   ;;  %v4564_v62 = vld [vmem:[%s6015_s1 + $0x90c] ss:$16 sps:$4 sm:$0xff]  }
 0x121   :  { %3121 = vmatprep.subr.bf16.mxu1 %v4474_v16  ;;  %v4559_v16 = vld [vmem:[%s6015_s1 + $0xa00] ss:$16 sps:$4 sm:$0xff]  }
 0x122   :  { %2392 = vmatmul.mubr.bf16.vlgmr.msra.gmra.mxu0 %v5238_v45  ;;  %v4486_v45 = vld [vmem:[%s6015_s1 + $0xba4] ss:$16 sps:$4 sm:$0xff]  }
 0x123   :  { %2349 = vmatmul.mubr.bf16.vlgmr.msra.gmra.mxu1 %v5596_v28  ;;  %3079 = vmatpush1.bf16.msra.mxu0 %v4469_v55  ;;  %v4516_v28 = vld [vmem:[%s6015_s1 + $0xb04] ss:$16 sps:$4 sm:$0xff]   ;;  %v4562_v55 = vld [vmem:[%s6015_s1 + $0x908] ss:$16 sps:$4 sm:$0xff]  }
 0x124   :  { %3122 = vmatpush1.bf16.msra.mxu1 %v4472_v56  ;;  %3080 = vmatprep.subr.bf16.mxu0 %v4477_v57  ;;  %v4567_v56 = vld [vmem:[%s6015_s1 + $0xaec] ss:$16 sps:$4 sm:$0xff]  }
 0x125   :  { %3123 = vmatprep.subr.bf16.mxu1 %v4480_v58  ;;  %3153 = vmatprep.mubr.bf16.mxu1 %v4617_v1  ;;  %v4570_v57 = vld [vmem:[%s6015_s1 + $0xbec] ss:$16 sps:$4 sm:$0xff]   ;;  %v4565_v58 = vld [vmem:[%s6015_s1 + $0xae8] ss:$16 sps:$4 sm:$0xff]  }
 0x126   :  { %3110 = vmatprep.mubr.bf16.mxu0 %v5586_v22 }
 0x127   :  { %3081 = vmatpush1.bf16.msra.mxu0 %v4475_v59  ;;  %v4568_v59 = vld [vmem:[%s6015_s1 + $0xbe8] ss:$16 sps:$4 sm:$0xff]  }
 0x128   :  { %3124 = vmatpush1.bf16.msra.mxu1 %v4478_v60  ;;  %3082 = vmatprep.subr.bf16.mxu0 %v4483_v61  ;;  %v4573_v60 = vld [vmem:[%s6015_s1 + $0xacc] ss:$16 sps:$4 sm:$0xff]  }
 0x129   :  { %3125 = vmatprep.subr.bf16.mxu1 %v4486_v45  ;;  %v4576_v61 = vld [vmem:[%s6015_s1 + $0xbcc] ss:$16 sps:$4 sm:$0xff]   ;;  %v4571_v45 = vld [vmem:[%s6015_s1 + $0xac8] ss:$16 sps:$4 sm:$0xff]  }
 0x12b   :  { %3083 = vmatpush1.bf16.msra.mxu0 %v4481_v63  ;;  %v4574_v63 = vld [vmem:[%s6015_s1 + $0xbc8] ss:$16 sps:$4 sm:$0xff]  }
 0x12c   :  { %3126 = vmatpush1.bf16.msra.mxu1 %v4484_v0  ;;  %3084 = vmatprep.subr.bf16.mxu0 %v4489_v2  ;;  %v4579_v0 = vld [vmem:[%s6015_s1 + $0xaac] ss:$16 sps:$4 sm:$0xff]  }
 0x12d   :  { %3127 = vmatprep.subr.bf16.mxu1 %v4492_v3  ;;  %v4582_v2 = vld [vmem:[%s6015_s1 + $0xbac] ss:$16 sps:$4 sm:$0xff]   ;;  %v4577_v3 = vld [vmem:[%s6015_s1 + $0xaa8] ss:$16 sps:$4 sm:$0xff]  }
 0x12f   :  { %3085 = vmatpush1.bf16.msra.mxu0 %v4487_v4  ;;  %v4580_v4 = vld [vmem:[%s6015_s1 + $0xba8] ss:$16 sps:$4 sm:$0xff]  }
 0x130   :  { %3128 = vmatpush1.bf16.msra.mxu1 %v4490_v5  ;;  %3086 = vmatprep.subr.bf16.mxu0 %v4495_v6  ;;  %v4585_v5 = vld [vmem:[%s6015_s1 + $0xa8c] ss:$16 sps:$4 sm:$0xff]   ;;  %v4583_v6 = vld [vmem:[%s6015_s1 + $0xa88] ss:$16 sps:$4 sm:$0xff]  }
 0x131   :  { %3129 = vmatprep.subr.bf16.mxu1 %v4498_v9  ;;  %v4586_v9 = vld [vmem:[%s6015_s1 + $0xb88] ss:$16 sps:$4 sm:$0xff]  }
 0x133   :  { %3087 = vmatpush1.bf16.msra.mxu0 %v4493_v10  ;;  %v4591_v10 = vld [vmem:[%s6015_s1 + $0xa6c] ss:$16 sps:$4 sm:$0xff]  }
 0x134   :  { %3130 = vmatpush1.bf16.msra.mxu1 %v4496_v11  ;;  %3088 = vmatprep.subr.bf16.mxu0 %v4501_v12  ;;  %v4594_v11 = vld [vmem:[%s6015_s1 + $0xb6c] ss:$16 sps:$4 sm:$0xff]   ;;  %v4589_v12 = vld [vmem:[%s6015_s1 + $0xa68] ss:$16 sps:$4 sm:$0xff]  }
 0x135   :  { %3131 = vmatprep.subr.bf16.mxu1 %v4504_v13  ;;  %v4592_v13 = vld [vmem:[%s6015_s1 + $0xb68] ss:$16 sps:$4 sm:$0xff]  }
 0x137   :  { %3089 = vmatpush1.bf16.msra.mxu0 %v4499_v14  ;;  %v4597_v14 = vld [vmem:[%s6015_s1 + $0xa4c] ss:$16 sps:$4 sm:$0xff]  }
 0x138   :  { %3132 = vmatpush1.bf16.msra.mxu1 %v4502_v17  ;;  %3090 = vmatprep.subr.bf16.mxu0 %v4507_v18  ;;  %v4600_v17 = vld [vmem:[%s6015_s1 + $0xb4c] ss:$16 sps:$4 sm:$0xff]   ;;  %v4595_v18 = vld [vmem:[%s6015_s1 + $0xa48] ss:$16 sps:$4 sm:$0xff]  }
 0x139   :  { %3133 = vmatprep.subr.bf16.mxu1 %v4510_v19  ;;  %v4598_v19 = vld [vmem:[%s6015_s1 + $0xb48] ss:$16 sps:$4 sm:$0xff]  }
 0x13b   :  { %3091 = vmatpush1.bf16.msra.mxu0 %v4505_v20  ;;  %v4603_v20 = vld [vmem:[%s6015_s1 + $0xa2c] ss:$16 sps:$4 sm:$0xff]  }
 0x13c   :  { %3134 = vmatpush1.bf16.msra.mxu1 %v4508_v25  ;;  %3092 = vmatprep.subr.bf16.mxu0 %v4513_v27  ;;  %v4606_v25 = vld [vmem:[%s6015_s1 + $0xb2c] ss:$16 sps:$4 sm:$0xff]   ;;  %v4601_v27 = vld [vmem:[%s6015_s1 + $0xa28] ss:$16 sps:$4 sm:$0xff]  }
 0x13d   :  { %3135 = vmatprep.subr.bf16.mxu1 %v4516_v28  ;;  %v4604_v28 = vld [vmem:[%s6015_s1 + $0xb28] ss:$16 sps:$4 sm:$0xff]  }
 0x13f   :  { %3093 = vmatpush1.bf16.msra.mxu0 %v4511_v30  ;;  %v4609_v30 = vld [vmem:[%s6015_s1 + $0xa0c] ss:$16 sps:$4 sm:$0xff]  }
 0x140   :  { %3136 = vmatpush1.bf16.msra.mxu1 %v4514_v31  ;;  %3094 = vmatprep.subr.bf16.mxu0 %v4519_v32  ;;  %v4612_v31 = vld [vmem:[%s6015_s1 + $0xb0c] ss:$16 sps:$4 sm:$0xff]   ;;  %v4607_v32 = vld [vmem:[%s6015_s1 + $0xa08] ss:$16 sps:$4 sm:$0xff]  }
 0x141   :  { %3164 = vmatprep.subr.bf16.mxu1 %v4522_v23  ;;  %v4610_v23 = vld [vmem:[%s6015_s1 + $0xb08] ss:$16 sps:$4 sm:$0xff]  }
 0x143   :  { %3154 = vmatmul.mubr.bf16.vlgmr.msra.gmra.mxu1 %v5502_v34  ;;  %3095 = vmatpush2.bf16.msra.mxu0 %v4517_v24  ;;  %v804_v24 = vpop.f32.mrf.mxu0 }
 0x144   :  { %3165 = vmatpush1.bf16.msra.mxu1 %v4520_v35  ;;  %3096 = vmatprep.subr.bf16.mxu0 %v4525_v26  ;;  %v847_v35 = vpop.f32.mrf.mxu1 }
 0x145   :  { %3166 = vmatprep.subr.bf16.mxu1 %v4528_v33  ;;  %3196 = vmatprep.mubr.bf16.mxu1 %v5586_v22  ;;  %v4540_v22 = vld [vmem:[%s6015_s1 + $0x98c] ss:$16 sps:$4 sm:$0xff]   ;;  %v806_v26 = vpop.f32.mrf.mxu0 }
 0x146   :  { %v849_v33 = vpop.f32.mrf.mxu1 }
 0x147   :  { %3097 = vmatpush2.bf16.msra.mxu0 %v4523_v15  ;;  %v808_v15 = vpop.f32.mrf.mxu0 }
 0x148   :  { %3167 = vmatpush1.bf16.msra.mxu1 %v4526_v36  ;;  %3098 = vmatprep.subr.bf16.mxu0 %v4531_v37  ;;  %v851_v36 = vpop.f32.mrf.mxu1 }
 0x149   :  { %3168 = vmatprep.subr.bf16.mxu1 %v4534_v29  ;;  %v810_v37 = vpop.f32.mrf.mxu0 }
 0x14a   :  { %v853_v29 = vpop.f32.mrf.mxu1 }
 0x14b   :  { %3099 = vmatpush2.bf16.msra.mxu0 %v4529_v38  ;;  %v933_v38 = vpop.f32.mrf.mxu0 }
 0x14c   :  { %3169 = vmatpush1.bf16.msra.mxu1 %v4532_v39  ;;  %3100 = vmatprep.subr.bf16.mxu0 %v4537_v40  ;;  %v890_v39 = vpop.f32.mrf.mxu1 }
 0x14d   :  { %3170 = vmatprep.subr.bf16.mxu1 %v4540_v22  ;;  %v935_v40 = vpop.f32.mrf.mxu0 }
 0x14e   :  { %v892_v22 = vpop.f32.mrf.mxu1 }
 0x14f   :  { %3101 = vmatpush2.bf16.msra.mxu0 %v4535_v41  ;;  %v937_v41 = vpop.f32.mrf.mxu0 }
 0x150   :  { %3171 = vmatpush1.bf16.msra.mxu1 %v4538_v42  ;;  %3102 = vmatprep.subr.bf16.mxu0 %v4543_v43  ;;  %v894_v42 = vpop.f32.mrf.mxu1 }
 0x151   :  { %3172 = vmatprep.subr.bf16.mxu1 %v4546_v44  ;;  %v939_v43 = vpop.f32.mrf.mxu0 }
 0x152   :  { %v896_v44 = vpop.f32.mrf.mxu1 }
 0x153   :  { %3103 = vmatpush2.bf16.msra.mxu0 %v4541_v7 }
 0x154   :  { %3173 = vmatpush1.bf16.msra.mxu1 %v4544_v46  ;;  %3104 = vmatprep.subr.bf16.mxu0 %v4549_v47 }
 0x155   :  { %3174 = vmatprep.subr.bf16.mxu1 %v4552_v8 }
 0x157   :  { %3105 = vmatpush2.bf16.msra.mxu0 %v4547_v48 }
 0x158   :  { %3175 = vmatpush1.bf16.msra.mxu1 %v4550_v49  ;;  %3106 = vmatprep.subr.bf16.mxu0 %v4555_v50 }
 0x159   :  { %3176 = vmatprep.subr.bf16.mxu1 %v4558_v51 }
 0x15b   :  { %3107 = vmatpush2.bf16.msra.mxu0 %v4553_v52 }
 0x15c   :  { %3177 = vmatpush1.bf16.msra.mxu1 %v4556_v53  ;;  %3108 = vmatprep.subr.bf16.mxu0 %v4561_v54 }
 0x15d   :  { %3178 = vmatprep.subr.bf16.mxu1 %v4564_v62 }
 0x15f   :  { %3109 = vmatpush2.bf16.msra.mxu0 %v4559_v16 }
 0x160   :  { %3179 = vmatpush1.bf16.msra.mxu1 %v4562_v55  ;;  %3207 = vmatprep.subr.bf16.mxu0 %v4570_v57 }
 0x161   :  { %3180 = vmatprep.subr.bf16.mxu1 %v4567_v56 }
 0x162   :  { %3111 = vmatmul.mubr.bf16.vlgmr.msra.gmra.mxu0 %v5584_v21  ;;  %v1472_v7 = vpop.f32.mrf.mxu0 }
 0x163   :  { %3208 = vmatpush1.bf16.msra.mxu0 %v4568_v59  ;;  %3239 = vmatprep.mubr.bf16.mxu0 %v4617_v1  ;;  %v4588_v1 = vld [vmem:[%s6015_s1 + $0xb8c] ss:$16 sps:$4 sm:$0xff]  }
 0x164   :  { %3181 = vmatpush2.bf16.msra.mxu1 %v4565_v58  ;;  %3209 = vmatprep.subr.bf16.mxu0 %v4576_v61  ;;  %v1474_v46 = vpop.f32.mrf.mxu0 }
 0x165   :  { %3182 = vmatprep.subr.bf16.mxu1 %v4573_v60 }
 0x166   :  { %v1476_v47 = vpop.f32.mrf.mxu0 }
 0x167   :  { %3210 = vmatpush1.bf16.msra.mxu0 %v4574_v63 }
 0x168   :  { %3183 = vmatpush2.bf16.msra.mxu1 %v4571_v45  ;;  %3211 = vmatprep.subr.bf16.mxu0 %v4582_v2  ;;  %v1478_v48 = vpop.f32.mrf.mxu0 }
 0x169   :  { %3184 = vmatprep.subr.bf16.mxu1 %v4579_v0 }
 0x16b   :  { %3212 = vmatpush1.bf16.msra.mxu0 %v4580_v4 }
 0x16c   :  { %3185 = vmatpush2.bf16.msra.mxu1 %v4577_v3  ;;  %3213 = vmatprep.subr.bf16.mxu0 %v4588_v1 }
 0x16d   :  { %3186 = vmatprep.subr.bf16.mxu1 %v4585_v5 }
 0x16f   :  { %3214 = vmatpush1.bf16.msra.mxu0 %v4586_v9 }
 0x170   :  { %3187 = vmatpush2.bf16.msra.mxu1 %v4583_v6  ;;  %3215 = vmatprep.subr.bf16.mxu0 %v4594_v11 }
 0x171   :  { %3188 = vmatprep.subr.bf16.mxu1 %v4591_v10 }
 0x173   :  { %3216 = vmatpush1.bf16.msra.mxu0 %v4592_v13  ;;  %v848_v13 = vadd.f32 %v847_v35, %v804_v24 }
 0x174   :  { %3189 = vmatpush2.bf16.msra.mxu1 %v4589_v12  ;;  %3217 = vmatprep.subr.bf16.mxu0 %v4600_v17 }
 0x175   :  { %3190 = vmatprep.subr.bf16.mxu1 %v4597_v14  ;;  %v850_v14 = vadd.f32 %v849_v33, %v806_v26 }
 0x177   :  { %3218 = vmatpush1.bf16.msra.mxu0 %v4598_v19  ;;  %v852_v19 = vadd.f32 %v851_v36, %v808_v15 }
 0x178   :  { %3191 = vmatpush2.bf16.msra.mxu1 %v4595_v18  ;;  %3219 = vmatprep.subr.bf16.mxu0 %v4606_v25  ;;  %v3260_v18 = vlaneseq  ;;  %v934_v25 = vadd.f32 %v933_v38, %v890_v39 }
 0x179   :  { %3192 = vmatprep.subr.bf16.mxu1 %v4603_v20  ;;  %v854_v20 = vadd.f32 %v853_v29, %v810_v37 }
 0x17a   :  { %v5996_v35 = vshrl.u32 %v3260_v18, 7 }
 0x17b   :  { %3220 = vmatpush1.bf16.msra.mxu0 %v4604_v28  ;;  %v1473_v28 = vadd.f32 %v1472_v7, %v848_v13 }
 0x17c   :  { %3193 = vmatpush2.bf16.msra.mxu1 %v4601_v27  ;;  %3221 = vmatprep.subr.bf16.mxu0 %v4612_v31  ;;  %v936_v27 = vadd.f32 %v935_v40, %v892_v22 }
 0x17d   :  { %3194 = vmatprep.subr.bf16.mxu1 %v4609_v30  ;;  %v1475_v30 = vadd.f32 %v1474_v46, %v850_v14 }
 0x17f   :  { %3222 = vmatpush1.bf16.msra.mxu0 %v4610_v23  ;;  %v1477_v23 = vadd.f32 %v1476_v47, %v852_v19  ;;  %v3270_v47 = vsub.s32 2, %v5996_v35 }
 0x180   :  { %3195 = vmatpush2.bf16.msra.mxu1 %v4607_v32  ;;  %v938_v32 = vadd.f32 %v937_v41, %v894_v42  ;;  %v3262_v42 = vsub.s32 0, %v5996_v35 }
 0x182   :  { %3240 = vmatmul.mubr.bf16.vlgmr.msra.gmra.mxu0 %v5502_v34  ;;  %v1601_v50 = vpop.f32.mrf.mxu0 }
 0x183   :  { %3197 = vmatmul.mubr.bf16.vlgmr.msra.gmra.mxu1 %v5584_v21  ;;  %v1515_v21 = vpop.f32.mrf.mxu1 }
 0x184   :  { %v1603_v52 = vpop.f32.mrf.mxu0  ;;  %v1516_v26 = vadd.f32 %v1515_v21, %v1473_v28  ;;  %v3258_v21 = vld [vmem:[%s6017_s2] sm:$0xf] }
 0x185   :  { %v1517_v34 = vpop.f32.mrf.mxu1 }
 0x186   :  { %v1605_v54 = vpop.f32.mrf.mxu0  ;;  %v1518_v33 = vadd.f32 %v1517_v34, %v1475_v30 }
 0x187   :  { %v1519_v8 = vpop.f32.mrf.mxu1 }
 0x188   :  { %v1607_v16 = vpop.f32.mrf.mxu0  ;;  %v1520_v37 = vadd.f32 %v1519_v8, %v1477_v23 }
 0x189   :  { %v1521_v49 = vpop.f32.mrf.mxu1 }
 0x18b   :  { %v1558_v51 = vpop.f32.mrf.mxu1 }
 0x18d   :  { %v1560_v53 = vpop.f32.mrf.mxu1 }
 0x18f   :  { %v1562_v62 = vpop.f32.mrf.mxu1 }
 0x190   :  { %v1563_v15 = vadd.f32 %v1562_v62, %v938_v32  ;;  %v3274_v62 = vsub.s32 3, %v5996_v35 }
 0x191   :  { %v1564_v55 = vpop.f32.mrf.mxu1 }
 0x192   :  { %v1606_v8 = vadd.f32 %v1605_v54, %v1563_v15 }
 0x1a3   :  { %v2307_v57 = vpop.f32.mrf.mxu1 }
 0x1a5   :  { %v2309_v59 = vpop.f32.mrf.mxu1 }
 0x1a7   :  { %v2311_v61 = vpop.f32.mrf.mxu1 }
 0x1a9   :  { %v2313_v63 = vpop.f32.mrf.mxu1 }
 0x1c2   :  { %v2264_v56 = vpop.f32.mrf.mxu0 }
 0x1c4   :  { %v2266_v58 = vpop.f32.mrf.mxu0 }
 0x1c5   :  { %v2310_v39 = vadd.f32 %v2309_v59, %v2266_v58  ;;  %v3263_v58 = vrot.slane %v3258_v21, %v3262_v42 }
 0x1c6   :  { %v2268_v60 = vpop.f32.mrf.mxu0 }
 0x1c8   :  { %v2270_v45 = vpop.f32.mrf.mxu0 }
 0x1c9   :  { %v2314_v40 = vadd.f32 %v2313_v63, %v2270_v45 }
 0x1e2   :  { %v2393_v0 = vpop.f32.mrf.mxu0 }
 0x1e3   :  { %v2350_v2 = vpop.f32.mrf.mxu1 }
 0x1e4   :  { %v2395_v3 = vpop.f32.mrf.mxu0 }
 0x1e5   :  { %v2352_v4 = vpop.f32.mrf.mxu1 }
 0x1e6   :  { %v5988_v5 = vpop.f32.mrf.mxu0 }
 0x1e7   :  { %6026 = vst [vmem:[#allocation2_spill] sm:$0xff] %v5988_v5  ;;  %v5990_v1 = vpop.f32.mrf.mxu1  ;;  %v1479_v5 = vadd.f32 %v1478_v48, %v854_v20 }
 0x1e8   :  { %6027 = vst [vmem:[#allocation3_spill] sm:$0xff] %v5990_v1  ;;  %v5992_v6 = vpop.f32.mrf.mxu0  ;;  %v1559_v1 = vadd.f32 %v1558_v51, %v934_v25  ;;  %v2394_v51 = vadd.f32 %v2393_v0, %v2350_v2  ;;  %v3288_v0 = vld [vmem:[%s6018_s3] sm:$0xf] }
 0x1e9   :  { %6028 = vst [vmem:[#allocation4_spill] sm:$0xff] %v5992_v6  ;;  %v5994_v9 = vpop.f32.mrf.mxu1  ;;  %v940_v6 = vadd.f32 %v939_v43, %v896_v44  ;;  %v1522_v38 = vadd.f32 %v1521_v49, %v1479_v5  ;;  %v3266_v43 = vsub.s32 1, %v5996_v35  ;;  %v2308_v44 = vadd.f32 %v2307_v57, %v2264_v56 }
 0x1ea   :  { %6029 = vst [vmem:[#allocation5_spill] sm:$0xff] %v5994_v9  ;;  %v1561_v9 = vadd.f32 %v1560_v53, %v936_v27  ;;  %v1602_v22 = vadd.f32 %v1601_v50, %v1559_v1  ;;  %v2312_v49 = vadd.f32 %v2311_v61, %v2268_v60  ;;  %v2403_v50 = vadd.f32 %v2310_v39, %v1518_v33 }
 0x1eb   :  { %v1565_v36 = vadd.f32 %v1564_v55, %v940_v6  ;;  %v2396_v55 = vadd.f32 %v2395_v3, %v2352_v4  ;;  %v3267_v56 = vrot.slane %v3258_v21, %v3266_v43  ;;  %v2402_v59 = vadd.f32 %v2308_v44, %v1516_v26 }
 0x1ec   :  { %v1604_v7 = vadd.f32 %v1603_v52, %v1561_v9  ;;  %v2407_v52 = vadd.f32 %v2314_v40, %v1522_v38  ;;  %v3271_v6 = vrot.slane %v3258_v21, %v3270_v47  ;;  %v2406_v9 = vadd.f32 %v2312_v49, %v1520_v37 }
 0x1ed   :  { %v1608_v48 = vadd.f32 %v1607_v16, %v1565_v36  ;;  %v2404_v54 = vadd.f32 %v2394_v51, %v1602_v22  ;;  %v3301_v30 = vrot.slane %v3288_v0, %v3270_v47 }
 0x1ee   :  { %v6031_v60 = vld [vmem:[#allocation2_spill] sm:$0xff]  ;;  %v2405_v18 = vadd.f32 %v2396_v55, %v1604_v7 }
 0x1ef   :  { %v6030_v16 = vld [vmem:[#allocation3_spill] sm:$0xff] }
 0x1f0   :  { %v2398_v61 = vadd.f32 %v6031_v60, %v6030_v16  ;;  %v6033_v4 = vld [vmem:[#allocation4_spill] sm:$0xff] }
 0x1f1   :  { %v6032_v3 = vld [vmem:[#allocation5_spill] sm:$0xff] }
 0x203   :  { %v3155_v11 = vpop.f32.mrf.mxu1 }
 0x205   :  { %v3157_v17 = vpop.f32.mrf.mxu1 }
 0x207   :  { %v3159_v24 = vpop.f32.mrf.mxu1 }
 0x209   :  { %v3161_v41 = vpop.f32.mrf.mxu1 }
 0x222   :  { %v3112_v10 = vpop.f32.mrf.mxu0 }
 0x223   :  { %v3156_v53 = vadd.f32 %v3155_v11, %v3112_v10  ;;  %v2400_v10 = vadd.f32 %v6033_v4, %v6032_v3 }
 0x224   :  { %v3114_v12 = vpop.f32.mrf.mxu0 }
 0x225   :  { %v3158_v46 = vadd.f32 %v3157_v17, %v3114_v12  ;;  %v3250_v11 = vadd.f32 %v3156_v53, %v2402_v59  ;;  %v3297_v12 = vrot.slane %v3288_v0, %v3266_v43  ;;  %v3275_v17 = vrot.slane %v3258_v21, %v3274_v62 }
 0x226   :  { %v3116_v31 = vpop.f32.mrf.mxu0  ;;  %v2409_v15 = vadd.f32 %v2400_v10, %v1608_v48 }
 0x227   :  { %v3160_v57 = vadd.f32 %v3159_v24, %v3116_v31  ;;  %v3251_v45 = vadd.f32 %v3158_v46, %v2403_v50  ;;  %v3305_v31 = vrot.slane %v3288_v0, %v3274_v62  ;;  %v2408_v24 = vadd.f32 %v2398_v61, %v1606_v8 }
 0x228   :  { %v3118_v29 = vpop.f32.mrf.mxu0  ;;  %v3280_v36 = vmul.f32 %v3263_v58, %v3250_v11 }
 0x229   :  { %v3162_v34 = vadd.f32 %v3161_v41, %v3118_v29  ;;  %v3254_v19 = vadd.f32 %v3160_v57, %v2406_v9  ;;  %v3281_v27 = vmul.f32 %v3267_v56, %v3251_v45  ;;  %v3293_v29 = vrot.slane %v3288_v0, %v3262_v42 }
 0x22b   :  { %v3255_v63 = vadd.f32 %v3162_v34, %v2407_v52  ;;  %v3284_v39 = vmul.f32 %v3263_v58, %v3254_v19  ;;  %v3311_v41 = vadd.f32 %v3297_v12, %v3281_v27  ;;  %v3310_v47 = vadd.f32 %v3293_v29, %v3280_v36 }
 0x22d   :  { %v3285_v28 = vmul.f32 %v3267_v56, %v3255_v63  ;;  %v3314_v8 = vadd.f32 %v3293_v29, %v3284_v39  ;;  %v3319_v48 = vmax.f32 %v3311_v41, 0.0  ;;  %v3318_v62 = vmax.f32 %v3310_v47, 0.0 }
 0x22f   :  { %v3315_v43 = vadd.f32 %v3297_v12, %v3285_v28  ;;  %v3322_v55 = vmax.f32 %v3314_v8, 0.0  ;;  %v3326_v59 = vmax.f32 %v3318_v62, %v3319_v48 }
 0x231   :  { %v3323_v52 = vmax.f32 %v3315_v43, 0.0 }
 0x233   :  { %v3327_v45 = vmax.f32 %v3322_v55, %v3323_v52 }
 0x242   :  { %v3241_v1 = vpop.f32.mrf.mxu0 }
 0x243   :  { %v3198_v5 = vpop.f32.mrf.mxu1 }
 0x244   :  { %v3242_v2 = vadd.f32 %v3241_v1, %v3198_v5  ;;  %v3243_v14 = vpop.f32.mrf.mxu0 }
 0x245   :  { %v3200_v13 = vpop.f32.mrf.mxu1 }
 0x246   :  { %v3252_v20 = vadd.f32 %v3242_v2, %v2404_v54  ;;  %v3244_v25 = vadd.f32 %v3243_v14, %v3200_v13  ;;  %v3245_v23 = vpop.f32.mrf.mxu0 }
 0x247   :  { %v3202_v32 = vpop.f32.mrf.mxu1 }
 0x248   :  { %v3282_v35 = vmul.f32 %v3271_v6, %v3252_v20  ;;  %v3253_v26 = vadd.f32 %v3244_v25, %v2405_v18  ;;  %v3246_v33 = vadd.f32 %v3245_v23, %v3202_v32  ;;  %v3247_v38 = vpop.f32.mrf.mxu0 }
 0x249   :  { %v3204_v37 = vpop.f32.mrf.mxu1 }
 0x24a   :  { %v3283_v40 = vmul.f32 %v3275_v17, %v3253_v26  ;;  %v3256_v22 = vadd.f32 %v3246_v33, %v2408_v24  ;;  %v3248_v7 = vadd.f32 %v3247_v38, %v3204_v37  ;;  %v3312_v44 = vadd.f32 %v3301_v30, %v3282_v35 }
 0x24c   :  { %v3313_v21 = vadd.f32 %v3305_v31, %v3283_v40  ;;  %v3286_v46 = vmul.f32 %v3271_v6, %v3256_v22  ;;  %v3257_v34 = vadd.f32 %v3248_v7, %v2409_v15  ;;  %v3320_v42 = vmax.f32 %v3312_v44, 0.0 }
 0x24e   :  { %v3321_v49 = vmax.f32 %v3313_v21, 0.0  ;;  %v3316_v51 = vadd.f32 %v3301_v30, %v3286_v46  ;;  %v3287_v50 = vmul.f32 %v3275_v17, %v3257_v34 }
 0x250   :  { %v3317_v53 = vadd.f32 %v3305_v31, %v3287_v50  ;;  %v3328_v58 = vmax.f32 %v3320_v42, %v3321_v49  ;;  %v3324_v56 = vmax.f32 %v3316_v51, 0.0 }
 0x252   :  { %v3325_v57 = vmax.f32 %v3317_v53, 0.0  ;;  %v3330_v5 = vmax.f32 %v3326_v59, %v3328_v58 }
 0x254   :  { %v3329_v63 = vmax.f32 %v3324_v56, %v3325_v57 }
 0x256   :  { %v3331_v1 = vmax.f32 %v3327_v45, %v3329_v63 }
 0x258   :  { %v4031_v6 = vpack.c.bf16 %v3331_v1, %v3330_v5 }
 0x25a   :  { %4032 = vst [vmem:[%s6019_s4] sm:$0xff] %v4031_v6  }

// kernel: _lambda_.5
= control target key start
LH: loop header
LB: loop body
LE: loop exit
PB: predicated region body
PF: predicated region fallthrough
CT: control target
= control target key end

     0   :  { %v157_v28 = vlaneseq  ;;  %v1011_v36 = vmov 1966171168   ;;  %s1247_s0 = inlined_call_operand.vmem [shape: bf16[2,1024], index: 0, kind: input, shape index: {}]   ;;  %s1248_s1 = inlined_call_operand.vmem [shape: bf16[1024,128], index: 1, kind: input, shape index: {}]   ;;  %s1249_s2 = inlined_call_operand.vmem [shape: f32[1,128], index: 2, kind: input, shape index: {}]   ;;  %s1250_s3 = inlined_call_operand.hbm [shape: f32[2,128], index: 3, kind: output, shape index: {}]  }
   0x1   :  { %v924_v0 = vld [vmem:[%s1248_s1 + $0x78] sm:$0xff]   ;;  %v928_v4 = vld [vmem:[%s1248_s1 + $0x70] sm:$0xff]   ;;  %v932_v8 = vld [vmem:[%s1248_s1 + $0x68] sm:$0xff]   ;;  %v155_v37 = vunpack.c.l.s4 %v1011_v36 }
   0x2   :  { %v925_v1 = vld [vmem:[%s1248_s1 + $0xf8] sm:$0xff]   ;;  %834 = vmatprep.subr.bf16.mxu0 %v924_v0  ;;  %v929_v5 = vld [vmem:[%s1248_s1 + $0xf0] sm:$0xff]   ;;  %v933_v9 = vld [vmem:[%s1248_s1 + $0xe8] sm:$0xff]   ;;  %v158_v33 = vshrl.u32 %v157_v28, 7 }
   0x3   :  { %v926_v2 = vld [vmem:[%s1248_s1 + $0x38] sm:$0xff]   ;;  %856 = vmatprep.subr.bf16.mxu1 %v925_v1  ;;  %v930_v6 = vld [vmem:[%s1248_s1 + $0x30] sm:$0xff]   ;;  %v934_v10 = vld [vmem:[%s1248_s1 + $0x28] sm:$0xff]   ;;  %v156_v40 = vunpack.c.0.s8 %v155_v37 }
   0x4   :  { %v927_v3 = vld [vmem:[%s1248_s1 + $0xb8] sm:$0xff]   ;;  %835 = vmatpush3.bf16.msra.mxu0 %v926_v2  ;;  %v931_v7 = vld [vmem:[%s1248_s1 + $0xb0] sm:$0xff]   ;;  %v935_v11 = vld [vmem:[%s1248_s1 + $0xa8] sm:$0xff]  }
   0x5   :  { %857 = vmatpush3.bf16.msra.mxu1 %v927_v3  ;;  %836 = vmatprep.subr.bf16.mxu0 %v928_v4  ;;  %v936_v12 = vld [vmem:[%s1248_s1 + $0x60] sm:$0xff]   ;;  %v940_v16 = vld [vmem:[%s1248_s1 + $0x58] sm:$0xff]   ;;  %v944_v20 = vld [vmem:[%s1248_s1 + $0x50] sm:$0xff]   ;;  %v1138_v41 = vsub.s32 %v156_v40, %v158_v33 }
   0x6   :  { %858 = vmatprep.subr.bf16.mxu1 %v929_v5  ;;  %v937_v13 = vld [vmem:[%s1248_s1 + $0xe0] sm:$0xff]   ;;  %v941_v17 = vld [vmem:[%s1248_s1 + $0xd8] sm:$0xff]   ;;  %v945_v21 = vld [vmem:[%s1248_s1 + $0xd0] sm:$0xff]  }
   0x7   :  { %v938_v14 = vld [vmem:[%s1248_s1 + $0x20] sm:$0xff]   ;;  %v942_v18 = vld [vmem:[%s1248_s1 + $0x18] sm:$0xff]   ;;  %v946_v22 = vld [vmem:[%s1248_s1 + $0x10] sm:$0xff]  }
   0x8   :  { %837 = vmatpush3.bf16.msra.mxu0 %v930_v6  ;;  %v939_v15 = vld [vmem:[%s1248_s1 + $0xa0] sm:$0xff]   ;;  %v943_v19 = vld [vmem:[%s1248_s1 + $0x98] sm:$0xff]   ;;  %v947_v23 = vld [vmem:[%s1248_s1 + $0x90] sm:$0xff]  }
   0x9   :  { %859 = vmatpush3.bf16.msra.mxu1 %v931_v7  ;;  %838 = vmatprep.subr.bf16.mxu0 %v932_v8  ;;  %v948_v24 = vld [vmem:[%s1248_s1 + $0x48] sm:$0xff]   ;;  %v952_v29 = vld [vmem:[%s1248_s1 + $0x40] sm:$0xff]   ;;  %v957_v35 = vld [vmem:[%s1248_s1 + $0x178] sm:$0xff]  }
   0xa   :  { %860 = vmatprep.subr.bf16.mxu1 %v933_v9  ;;  %v949_v25 = vld [vmem:[%s1248_s1 + $0xc8] sm:$0xff]   ;;  %v953_v30 = vld [vmem:[%s1248_s1 + $0xc0] sm:$0xff]   ;;  %v958_v38 = vld [vmem:[%s1248_s1 + $0x1f8] sm:$0xff]  }
   0xb   :  { %v950_v26 = vld [vmem:[%s1248_s1 + $0x8] sm:$0xff]   ;;  %v954_v31 = vld [vmem:[%s1248_s1] sm:$0xff]   ;;  %v959_v48 = vld [vmem:[%s1248_s1 + $0x138] sm:$0xff]  }
   0xc   :  { %839 = vmatpush3.bf16.msra.mxu0 %v934_v10  ;;  %v951_v27 = vld [vmem:[%s1248_s1 + $0x88] sm:$0xff]   ;;  %v955_v32 = vld [vmem:[%s1248_s1 + $0x80] sm:$0xff]   ;;  %v961_v51 = vld [vmem:[%s1248_s1 + $0x170] sm:$0xff]  }
   0xd   :  { %861 = vmatpush3.bf16.msra.mxu1 %v935_v11  ;;  %840 = vmatprep.subr.bf16.mxu0 %v936_v12  ;;  %v16_v34 = vld [vmem:[%s1247_s0] sm:$0xff]  ;;  %v960_v53 = vld [vmem:[%s1248_s1 + $0x1b8] sm:$0xff]   ;;  %v962_v54 = vld [vmem:[%s1248_s1 + $0x1f0] sm:$0xff]  }
   0xe   :  { %862 = vmatprep.subr.bf16.mxu1 %v937_v13  ;;  %v153_v39 = vcombine.high %v16_v34, %v16_v34  ;;  %v160_v42 = vrot.slane %v16_v34, %v1138_v41  ;;  %v963_v56 = vld [vmem:[%s1248_s1 + $0x130] sm:$0xff]   ;;  %v965_v57 = vld [vmem:[%s1248_s1 + $0x168] sm:$0xff]   ;;  %v969_v61 = vld [vmem:[%s1248_s1 + $0x160] sm:$0xff]  }
   0xf   :  { %v964_v58 = vld [vmem:[%s1248_s1 + $0x1b0] sm:$0xff]   ;;  %v966_v59 = vld [vmem:[%s1248_s1 + $0x1e8] sm:$0xff]   ;;  %v970_v63 = vld [vmem:[%s1248_s1 + $0x1e0] sm:$0xff]  }
  0x10   :  { %841 = vmatpush3.bf16.msra.mxu0 %v938_v14  ;;  %v1142_v43 = vrot.slane %v153_v39, %v1138_v41  ;;  %v168_v44 = vcombine.high %v160_v42, %v160_v42  ;;  %v176_v45 = vrot.slane %v160_v42, %v1138_v41  ;;  %v967_v60 = vld [vmem:[%s1248_s1 + $0x128] sm:$0xff]   ;;  %v971_v0 = vld [vmem:[%s1248_s1 + $0x120] sm:$0xff]   ;;  %v973_v1 = vld [vmem:[%s1248_s1 + $0x158] sm:$0xff]  }
  0x11   :  { %863 = vmatpush3.bf16.msra.mxu1 %v939_v15  ;;  %842 = vmatprep.subr.bf16.mxu0 %v940_v16  ;;  %v968_v62 = vld [vmem:[%s1248_s1 + $0x1a8] sm:$0xff]   ;;  %v972_v2 = vld [vmem:[%s1248_s1 + $0x1a0] sm:$0xff]   ;;  %v974_v3 = vld [vmem:[%s1248_s1 + $0x1d8] sm:$0xff]  }
  0x12   :  { %864 = vmatprep.subr.bf16.mxu1 %v941_v17  ;;  %v169_v46 = vcombine.high %v1142_v43, %v1142_v43  ;;  %v190_v47 = vrot.slane %v168_v44, %v1138_v41  ;;  %v198_v50 = vcombine.high %v176_v45, %v176_v45  ;;  %v975_v4 = vld [vmem:[%s1248_s1 + $0x118] sm:$0xff]   ;;  %v977_v5 = vld [vmem:[%s1248_s1 + $0x150] sm:$0xff]   ;;  %v981_v9 = vld [vmem:[%s1248_s1 + $0x148] sm:$0xff]  }
  0x13   :  { %v976_v6 = vld [vmem:[%s1248_s1 + $0x198] sm:$0xff]   ;;  %v978_v7 = vld [vmem:[%s1248_s1 + $0x1d0] sm:$0xff]  }
  0x14   :  { %843 = vmatpush3.bf16.msra.mxu0 %v942_v18  ;;  %v197_v49 = vrot.slane %v169_v46, %v1138_v41  ;;  %626 = vmatprep.mubr.bf16.mxu0 %v190_v47  ;;  %v200_v52 = vcombine.high %v190_v47, %v190_v47  ;;  %v979_v8 = vld [vmem:[%s1248_s1 + $0x110] sm:$0xff]  }
  0x15   :  { %865 = vmatpush3.bf16.msra.mxu1 %v943_v19  ;;  %844 = vmatprep.subr.bf16.mxu0 %v944_v20 }
  0x16   :  { %866 = vmatprep.subr.bf16.mxu1 %v945_v21  ;;  %v201_v55 = vcombine.high %v197_v49, %v197_v49  ;;  %666 = vmatprep.mubr.bf16.mxu1 %v200_v52 }
  0x18   :  { %845 = vmatpush3.bf16.msra.mxu0 %v946_v22 }
  0x19   :  { %867 = vmatpush3.bf16.msra.mxu1 %v947_v23  ;;  %846 = vmatprep.subr.bf16.mxu0 %v948_v24 }
  0x1a   :  { %868 = vmatprep.subr.bf16.mxu1 %v949_v25 }
  0x1c   :  { %847 = vmatpush3.bf16.msra.mxu0 %v950_v26 }
  0x1d   :  { %869 = vmatpush3.bf16.msra.mxu1 %v951_v27  ;;  %848 = vmatprep.subr.bf16.mxu0 %v952_v29 }
  0x1e   :  { %870 = vmatprep.subr.bf16.mxu1 %v953_v30 }
  0x20   :  { %849 = vmatpush3.bf16.msra.mxu0 %v954_v31 }
  0x21   :  { %871 = vmatpush3.bf16.msra.mxu1 %v955_v32  ;;  %878 = vmatprep.subr.bf16.mxu0 %v957_v35 }
  0x22   :  { %900 = vmatprep.subr.bf16.mxu1 %v958_v38 }
  0x23   :  { %627 = vmatmul.mubr.bf16.vlgmr.msra.gmra.mxu0 %v176_v45 }
  0x24   :  { %879 = vmatpush3.bf16.msra.mxu0 %v959_v48  ;;  %667 = vmatmul.mubr.bf16.vlgmr.msra.gmra.mxu1 %v198_v50 }
  0x25   :  { %880 = vmatprep.subr.bf16.mxu0 %v961_v51  ;;  %901 = vmatpush3.bf16.msra.mxu1 %v960_v53 }
  0x26   :  { %706 = vmatprep.mubr.bf16.mxu0 %v197_v49  ;;  %902 = vmatprep.subr.bf16.mxu1 %v962_v54 }
  0x27   :  { %746 = vmatprep.mubr.bf16.mxu1 %v201_v55 }
  0x28   :  { %881 = vmatpush3.bf16.msra.mxu0 %v963_v56 }
  0x29   :  { %882 = vmatprep.subr.bf16.mxu0 %v965_v57  ;;  %903 = vmatpush3.bf16.msra.mxu1 %v964_v58 }
  0x2a   :  { %904 = vmatprep.subr.bf16.mxu1 %v966_v59 }
  0x2c   :  { %883 = vmatpush3.bf16.msra.mxu0 %v967_v60 }
  0x2d   :  { %884 = vmatprep.subr.bf16.mxu0 %v969_v61  ;;  %905 = vmatpush3.bf16.msra.mxu1 %v968_v62 }
  0x2e   :  { %906 = vmatprep.subr.bf16.mxu1 %v970_v63 }
  0x30   :  { %885 = vmatpush3.bf16.msra.mxu0 %v971_v0 }
  0x31   :  { %886 = vmatprep.subr.bf16.mxu0 %v973_v1  ;;  %907 = vmatpush3.bf16.msra.mxu1 %v972_v2 }
  0x32   :  { %908 = vmatprep.subr.bf16.mxu1 %v974_v3 }
  0x34   :  { %887 = vmatpush3.bf16.msra.mxu0 %v975_v4 }
  0x35   :  { %888 = vmatprep.subr.bf16.mxu0 %v977_v5 }
  0x36   :  { %8 = vsyncpa [#allocation3], 0  ;;  %909 = vmatpush3.bf16.msra.mxu1 %v976_v6  ;;  %v980_v10 = vld [vmem:[%s1248_s1 + $0x190] sm:$0xff]   ;;  %v982_v11 = vld [vmem:[%s1248_s1 + $0x1c8] sm:$0xff]   ;;  %v183_v17 = vrot.slane %v1142_v43, %v1138_v41 }
  0x37   :  { %910 = vmatprep.subr.bf16.mxu1 %v978_v7  ;;  %v983_v12 = vld [vmem:[%s1248_s1 + $0x108] sm:$0xff]   ;;  %v985_v13 = vld [vmem:[%s1248_s1 + $0x140] sm:$0xff]  }
  0x38   :  { %889 = vmatpush3.bf16.msra.mxu0 %v979_v8  ;;  %v984_v14 = vld [vmem:[%s1248_s1 + $0x188] sm:$0xff]   ;;  %v986_v15 = vld [vmem:[%s1248_s1 + $0x1c0] sm:$0xff]   ;;  %v199_v19 = vcombine.high %v183_v17, %v183_v17 }
  0x39   :  { %890 = vmatprep.subr.bf16.mxu0 %v981_v9  ;;  %v987_v16 = vld [vmem:[%s1248_s1 + $0x100] sm:$0xff]  }
  0x3a   :  { %911 = vmatpush3.bf16.msra.mxu1 %v980_v10  ;;  %v988_v18 = vld [vmem:[%s1248_s1 + $0x180] sm:$0xff]   ;;  %s1012_s1 = smov [#allocation2]  }
  0x3b   :  { %912 = vmatprep.subr.bf16.mxu1 %v982_v11  ;;  %v769_v29 = vld [vmem:[%s1249_s2] ss:$0 sm:$0xff]  ;;  %s761_s6 = sshll.u32 %s1012_s1, 4  ;;  %s762_s6 = int_to_ptr.vmem [resolvable:$true] %s761_s6 }
  0x3c   :  { %891 = vmatpush3.bf16.msra.mxu0 %v983_v12  ;;  %s989_s2 = scalar_lea.vmem %s762_s6, 32  ;;  %p994_p1 = scmp.lt.s32.totalorder %s762_s6, %s762_s6 }
  0x3d   :  { %892 = vmatprep.subr.bf16.mxu0 %v985_v13  ;;  %p990_p0 = scmp.ne.s32.totalorder %s762_s6, %s989_s2  ;;  %p995_p2 = scmp.lt.s32.totalorder %s989_s2, %s989_s2 }
  0x3e   :  { %913 = vmatpush3.bf16.msra.mxu1 %v984_v14 }
  0x3f   :  { %914 = vmatprep.subr.bf16.mxu1 %v986_v15  ;;  %p996_p3 = por %p995_p2, %p994_p1 }
  0x40   :  { %893 = vmatpush3.bf16.msra.mxu0 %v987_v16 }
  0x41   :  { %p997_p4 = pnand %p996_p3, %p990_p0 }
  0x42   :  { %915 = vmatpush3.bf16.msra.mxu1 %v988_v18 }
  0x43   :  { %707 = vmatmul.mubr.bf16.vlgmr.msra.gmra.mxu0 %v183_v17 }
  0x45   :  { %747 = vmatmul.mubr.bf16.vlgmr.msra.gmra.mxu1 %v199_v19 }
  0xe3   :  { %v850_v20 = vpop.f32.mrf.mxu0 }
  0xe4   :  { %v872_v21 = vpop.f32.mrf.mxu1 }
  0xe5   :  { %v851_v22 = vpop.f32.mrf.mxu0 }
  0xe6   :  { %v873_v23 = vpop.f32.mrf.mxu1  ;;  %v852_v28 = vadd.f32 %v851_v22, %v850_v20 }
  0xe7   :  { %v853_v24 = vpop.f32.mrf.mxu0  ;;  %v874_v31 = vadd.f32 %v873_v23, %v872_v21 }
  0xe8   :  { %v875_v25 = vpop.f32.mrf.mxu1  ;;  %v629_v30 = vadd.f32 %v852_v28, %v769_v29 }
  0xe9   :  { %v854_v26 = vpop.f32.mrf.mxu0 }
  0xea   :  { %v876_v27 = vpop.f32.mrf.mxu1  ;;  %v669_v35 = vadd.f32 %v874_v31, %v629_v30 }
 0x103   :  { %v894_v32 = vpop.f32.mrf.mxu0 }
 0x105   :  { %v916_v33 = vpop.f32.mrf.mxu1  ;;  %v895_v34 = vpop.f32.mrf.mxu0 }
 0x106   :  { %v896_v36 = vadd.f32 %v895_v34, %v894_v32 }
 0x107   :  { %v917_v37 = vpop.f32.mrf.mxu1  ;;  %v897_v38 = vpop.f32.mrf.mxu0 }
 0x108   :  { %v709_v39 = vadd.f32 %v896_v36, %v669_v35  ;;  %v918_v40 = vadd.f32 %v917_v37, %v916_v33 }
 0x109   :  { %v919_v41 = vpop.f32.mrf.mxu1  ;;  %v898_v42 = vpop.f32.mrf.mxu0 }
 0x10a   :  { %v749_v43 = vadd.f32 %v918_v40, %v709_v39 }
 0x10b   :  { %v920_v44 = vpop.f32.mrf.mxu1 }
 0x10c   :  { %754 = vst [vmem:[#allocation2] sm:$0x3] %v749_v43 }
 0x10d   :  { %1000 = shalt.err (!%p997_p4)
}
 0x10e   :  { %764 = dma.vmem_to_hbm [thread:$0]  %s762_s6, 32, %s1250_s3, [#allocation3]  }
 0x10f   :  { %1009 = dma.done.wait [#allocation3], 32  }
 0x110   :  { %1010 = vsyncadd [#allocation3], 4294967264 }
 0x111   :  { %768 = vsyncpa [#allocation3], 1 }

</bundles_post_ra>
